<compile_context>
chip_gen: v6e
topology: v6e:2x2x1
jax: 0.10.0
libtpu: 0.0.40
codegen_flags: <defaults>
</compile_context>

<pallas_src>
import jax
import jax.numpy as jnp
import numpy as np
from jax.experimental import pallas as pl
from jax.experimental.pallas import tpu as pltpu

# ---- static geometry implied by the PyTorch module ---------------------------
B = 2
C_CNN = 4
H_IN, W_IN = 77, 87
KH, KW, STRIDE = 5, 15, 3
OH = (H_IN - KH) // STRIDE + 1          # 25 conv rows
OW = (W_IN - KW) // STRIDE + 1          # 25 conv cols
POOL_K, POOL_S = 5, 2
PH = (OH - POOL_K) // POOL_S + 1        # 11
PW = (OW - POOL_K) // POOL_S + 1        # 11  -> 121 flattened CNN features
K_ROW = C_CNN * KH * W_IN               # 1740: width of the row-gathered operand
NLANE = 128
KPAD = ((K_ROW + NLANE - 1) // NLANE) * NLANE   # 1792 (lane-dense, 14*128)

NUM_CHANNELS = 16
NUM_REDUCED = 8
SEQ_LEN = NUM_REDUCED                   # BatchNorm1d on (B, T, reduced) needs T == reduced
LSTM_CELLS = 32
BN_EPS = 1e-5


def _sigmoid(z):
    return 1.0 / (1.0 + jnp.exp(-z))


# ---- structural (weight-independent) constants, built once on host -----------
def _build_static_mats():
    # MK[b*25 + 2*pi, pi*4 + o] = 1   (diagonal pi==pi' mask for the pool gather)
    mk = np.zeros((B * OH, NLANE), np.float32)
    for b in range(B):
        for pi in range(PH):
            mk[b * OH + 2 * pi, pi * 4:(pi + 1) * 4] = 1.0
    # SelB[b, r] = 1 for rows r belonging to batch b (per-batch row sum)
    selb = np.zeros((B, B * OH), np.float32)
    for b in range(B):
        selb[b, b * OH:(b + 1) * OH] = 1.0
    # G[pi*4 + o, o] = 1   (sum the per-pi lane groups into the 4 outputs)
    gmat = np.zeros((NLANE, 4), np.float32)
    for pi in range(PH):
        for o in range(4):
            gmat[pi * 4 + o, o] = 1.0
    # AVG: block-diagonal (2x2 blocks of 1/(B*R)) -> per-timestep BN statistics
    avg = np.zeros((SEQ_LEN * B, SEQ_LEN * B), np.float32)
    for t in range(SEQ_LEN):
        avg[t * B:(t + 1) * B, t * B:(t + 1) * B] = 1.0 / (B * NUM_REDUCED)
    return mk, selb, gmat, avg


MK_NP, SELB_NP, GMAT_NP, AVG_NP = _build_static_mats()


# ------------------------------- Pallas kernel --------------------------------
def almodel_kernel(r_hbm, m_hbm, bconv_ref, xl_ref, wd_ref, bd_ref,
                   avg_ref, gcol_ref, bcol_ref,
                   wih_ref, whh_ref, blstm_ref, wfc_ref, bfc_ref,
                   wj_ref, mk_ref, selb_ref, gmat_ref,
                   woutb_ref, bout_ref,
                   o_ref,
                   r_vmem, m_vmem, gx_ref, dma_sem):
    f32 = jnp.float32

    # Kick off the two big CNN-operand DMAs; they overlap with the serial LSTM
    # branch below (which only touches small, already-resident VMEM inputs).
    cp_r = pltpu.make_async_copy(r_hbm, r_vmem, dma_sem.at[0])
    cp_m = pltpu.make_async_copy(m_hbm, m_vmem, dma_sem.at[1])
    cp_r.start()
    cp_m.start()

    # ---------------- LSTM branch: dense -> BatchNorm1d -> LSTM -> fc -> softmax
    # Rows of xl are ordered (t, b): row = t*B + b.
    xd = jnp.dot(xl_ref[...], wd_ref[...], preferred_element_type=f32) + bd_ref[...]   # (T*B, R)

    # BatchNorm1d training-mode statistics: per timestep t (the PyTorch channel
    # axis), biased stats over (batch, feature).  AVG sums each (t) row pair.
    mu = jnp.sum(jnp.dot(avg_ref[...], xd, preferred_element_type=f32),
                 axis=1, keepdims=True)                                                 # (T*B, 1)
    dev = xd - mu
    var = jnp.sum(jnp.dot(avg_ref[...], dev * dev, preferred_element_type=f32),
                  axis=1, keepdims=True)
    xn = gcol_ref[...] * dev * jax.lax.rsqrt(var + BN_EPS) + bcol_ref[...]

    # Hoisted LSTM input projection for every timestep at once.
    gx_ref[...] = jnp.dot(xn, wih_ref[...], preferred_element_type=f32) + blstm_ref[...]  # (T*B, 4H)

    hc = LSTM_CELLS
    h = jnp.zeros((B, hc), f32)
    c = jnp.zeros((B, hc), f32)
    for t in range(SEQ_LEN):
        gates = gx_ref[B * t:B * t + B, :] + jnp.dot(h, whh_ref[...],
                                                     preferred_element_type=f32)        # (B, 4H)
        i_g = _sigmoid(gates[:, 0 * hc:1 * hc])
        f_g = _sigmoid(gates[:, 1 * hc:2 * hc])
        g_g = jnp.tanh(gates[:, 2 * hc:3 * hc])
        o_g = _sigmoid(gates[:, 3 * hc:4 * hc])
        c = f_g * c + i_g * g_g
        h = o_g * jnp.tanh(c)

    logits = jnp.dot(h, wfc_ref[...], preferred_element_type=f32) + bfc_ref[...]
    logits = logits - jnp.max(logits, axis=1, keepdims=True)
    e = jnp.exp(logits)
    out2 = e / jnp.sum(e, axis=1, keepdims=True)            # softmax(dim=1), (B, 4)

    # ---------------- CNN branch: Conv2d + MaxPool2d + Flatten + Linear(121-part)
    cp_r.wait()
    cp_m.wait()

    # One MXU matmul does the whole Conv2d:  cm[b*25+i, j] = conv[b, i, j] + bias.
    cm = jnp.dot(r_vmem[...], m_vmem[...], preferred_element_type=f32) + bconv_ref[...]  # (50, 128)

    # Max-pool via shift matmuls (iota-built 0/1 off-diagonal matrices).
    r128 = jax.lax.broadcasted_iota(jnp.int32, (NLANE, NLANE), 0)
    c128 = jax.lax.broadcasted_iota(jnp.int32, (NLANE, NLANE), 1)
    r50 = jax.lax.broadcasted_iota(jnp.int32, (B * OH, B * OH), 0)
    c50 = jax.lax.broadcasted_iota(jnp.int32, (B * OH, B * OH), 1)

    # width direction:  wmax[r, l] = max_{dj<5} cm[r, l + dj]
    wmax = cm
    for dj in range(1, POOL_K):
        ws = (r128 == c128 + dj).astype(f32)                # ws[c, l] = (c == l + dj)
        wmax = jnp.maximum(wmax, jnp.dot(cm, ws, preferred_element_type=f32))

    # height direction: hmax[r, l] = max_{di<5} wmax[r + di, l]
    hmax = wmax
    for di in range(1, POOL_K):
        hs = (c50 == r50 + di).astype(f32)                  # hs[r, c] = (c == r + di)
        hmax = jnp.maximum(hmax, jnp.dot(hs, wmax, preferred_element_type=f32))

    # Strided (stride-2) pooled-value selection + flatten + Linear(121 -> 4),
    # all folded into three small matmuls plus one mask multiply:
    #   out1c[b, o] = sum_{pi,pj} hmax[b*25 + 2pi, 2pj] * Wa[pi*11 + pj, o]
    t_mat = jnp.dot(hmax, wj_ref[...], preferred_element_type=f32)                       # (50, 128)
    s_mat = jnp.dot(selb_ref[...], t_mat * mk_ref[...], preferred_element_type=f32)      # (B, 128)
    out1c = jnp.dot(s_mat, gmat_ref[...], preferred_element_type=f32)                    # (B, 4)

    # concat + outLayer Linear(125 -> 4): split-weight form.
    out = out1c + jnp.dot(out2, woutb_ref[...], preferred_element_type=f32) + bout_ref[...]
    o_ref[...] = out.astype(o_ref.dtype)


# ------------------------------- wrapper ---------------------------------------
@jax.jit
def almodel_forward(cnnx, lstmx, params):
    f32 = jnp.float32
    x = cnnx.astype(f32)

    # Row-gathered conv operand R (static strided slices, no gathers):
    #   R[b*25 + i, (c*KH + kh)*W_IN + w] = x[b, c, 3i + kh, w]
    slabs = [x[:, :, kh:kh + STRIDE * (OH - 1) + 1:STRIDE, :] for kh in range(KH)]  # (B,C,OH,W) each
    rg = jnp.stack(slabs, axis=3)                       # (B, C, OH, KH, W)
    rg = jnp.transpose(rg, (0, 2, 1, 3, 4))             # (B, OH, C, KH, W)
    r_mat = rg.reshape(B * OH, K_ROW)
    r_mat = jnp.pad(r_mat, ((0, 0), (0, KPAD - K_ROW)))                              # (50, 1792)

    # Correlation matrix M so that (R @ M)[b*25+i, j] = conv[b, i, j] (no bias):
    #   M[(c*KH + kh)*W_IN + w, j] = conv_w[c, kh, w - 3j]  if 0 <= w - 3j < KW
    wt = params["conv_w"].astype(f32)[0]                                             # (C, KH, KW)
    kw_idx = jnp.arange(W_IN)[:, None] - STRIDE * jnp.arange(OW)[None, :]            # (87, 25)
    valid = (kw_idx >= 0) & (kw_idx < KW)
    kw_c = jnp.clip(kw_idx, 0, KW - 1)
    m_mat = jnp.where(valid[None, None], wt[:, :, kw_c], 0.0)                        # (C, KH, 87, 25)
    m_mat = m_mat.reshape(K_ROW, OW)
    m_mat = jnp.pad(m_mat, ((0, KPAD - K_ROW), (0, NLANE - OW)))                     # (1792, 128)
    bconv = params["conv_b"].reshape(1, 1).astype(f32)

    # Fold the 121->4 half of outLayer into the pool-selection matmul weights.
    w_out_t = params["out_w"].T.astype(f32)              # (125, 4)
    wa3 = w_out_t[:PH * PW].reshape(PH, PW, 4)           # [pi, pj, o]
    wj_small = jnp.transpose(wa3, (1, 0, 2)).reshape(PW, PH * 4)                     # [pj, pi*4+o]
    wj_body = jnp.zeros((PW, 2, PH * 4), f32).at[:, 0, :].set(wj_small)
    wj_body = wj_body.reshape(2 * PW, PH * 4)            # rows 2*pj hold the weights
    wj = jnp.pad(wj_body, ((0, NLANE - 2 * PW), (0, NLANE - PH * 4)))                # (128, 128)
    woutb = w_out_t[PH * PW:]                            # (4, 4)
    bout = params["out_b"].reshape(1, -1).astype(f32)

    # LSTM branch operands (rows ordered (t, b) so each timestep is 2 contiguous rows).
    xl2 = jnp.transpose(lstmx.astype(f32), (1, 0, 2)).reshape(SEQ_LEN * B, NUM_CHANNELS)
    wd = params["dense_w"].T.astype(f32)                 # (Cin, reduced)
    bd = params["dense_b"].reshape(1, -1).astype(f32)
    g_col = jnp.repeat(params["bn_gamma"].astype(f32), B).reshape(SEQ_LEN * B, 1)
    b_col = jnp.repeat(params["bn_beta"].astype(f32), B).reshape(SEQ_LEN * B, 1)
    wih = params["w_ih"].T.astype(f32)                   # (reduced, 4H)
    whh = params["w_hh"].T.astype(f32)                   # (H, 4H)
    blstm = (params["b_ih"] + params["b_hh"]).reshape(1, -1).astype(f32)
    wfc = params["fc_w"].T.astype(f32)                   # (H, 4)
    bfc = params["fc_b"].reshape(1, -1).astype(f32)

    args = (r_mat, m_mat, bconv, xl2, wd, bd,
            jnp.asarray(AVG_NP), g_col, b_col,
            wih, whh, blstm, wfc, bfc,
            wj, jnp.asarray(MK_NP), jnp.asarray(SELB_NP), jnp.asarray(GMAT_NP),
            woutb, bout)

    in_specs = ([pl.BlockSpec(memory_space=pl.ANY)] * 2 +                 # R, M: manual DMA
                [pl.BlockSpec(memory_space=pltpu.MemorySpace.VMEM)] * (len(args) - 2))

    return pl.pallas_call(
        almodel_kernel,
        out_shape=jax.ShapeDtypeStruct((B, 4), jnp.float32),
        in_specs=in_specs,
        out_specs=pl.BlockSpec(memory_space=pltpu.MemorySpace.VMEM),
        scratch_shapes=[
            pltpu.VMEM((B * OH, KPAD), jnp.float32),      # R landing buffer
            pltpu.VMEM((KPAD, NLANE), jnp.float32),       # M landing buffer
            pltpu.VMEM((SEQ_LEN * B, 4 * LSTM_CELLS), jnp.float32),   # hoisted LSTM gates_x
            pltpu.SemaphoreType.DMA((2,)),
        ],
    )(*args)


# ------------------------------- pure-JAX reference -----------------------------
def reference_forward(cnnx, lstmx, p):
    conv = jax.lax.conv_general_dilated(
        cnnx, p["conv_w"], window_strides=(STRIDE, STRIDE), padding="VALID",
        dimension_numbers=("NCHW", "OIHW", "NCHW"))
    conv = conv + p["conv_b"][None, :, None, None]
    pooled = jax.lax.reduce_window(conv, -jnp.inf, jax.lax.max,
                                   (1, 1, POOL_K, POOL_K), (1, 1, POOL_S, POOL_S), "VALID")
    out1 = pooled.reshape(cnnx.shape[0], -1)

    xd = lstmx @ p["dense_w"].T + p["dense_b"]
    mu = xd.mean(axis=(0, 2), keepdims=True)
    var = ((xd - mu) ** 2).mean(axis=(0, 2), keepdims=True)
    xn = (p["bn_gamma"][None, :, None] * (xd - mu) / jnp.sqrt(var + BN_EPS)
          + p["bn_beta"][None, :, None])

    hc = LSTM_CELLS
    h = jnp.zeros((lstmx.shape[0], hc), jnp.float32)
    c = jnp.zeros_like(h)
    for t in range(lstmx.shape[1]):
        g = xn[:, t, :] @ p["w_ih"].T + h @ p["w_hh"].T + p["b_ih"] + p["b_hh"]
        i = jax.nn.sigmoid(g[:, :hc])
        f = jax.nn.sigmoid(g[:, hc:2 * hc])
        gg = jnp.tanh(g[:, 2 * hc:3 * hc])
        o = jax.nn.sigmoid(g[:, 3 * hc:])
        c = f * c + i * gg
        h = o * jnp.tanh(c)
    out2 = jax.nn.softmax(h @ p["fc_w"].T + p["fc_b"], axis=1)
    cat = jnp.concatenate([out1, out2], axis=-1)
    return cat @ p["out_w"].T + p["out_b"]


if __name__ == "__main__":
    key = jax.random.PRNGKey(0)
    ks = jax.random.split(key, 16)
    nrm = lambda k, s, scale=0.1: scale * jax.random.normal(k, s, dtype=jnp.float32)
    params = {
        "conv_w": nrm(ks[0], (1, C_CNN, KH, KW)),
        "conv_b": nrm(ks[1], (1,)),
        "dense_w": nrm(ks[2], (NUM_REDUCED, NUM_CHANNELS)),
        "dense_b": nrm(ks[3], (NUM_REDUCED,)),
        "bn_gamma": 1.0 + nrm(ks[4], (NUM_REDUCED,)),
        "bn_beta": nrm(ks[5], (NUM_REDUCED,)),
        "w_ih": nrm(ks[6], (4 * LSTM_CELLS, NUM_REDUCED)),
        "w_hh": nrm(ks[7], (4 * LSTM_CELLS, LSTM_CELLS)),
        "b_ih": nrm(ks[8], (4 * LSTM_CELLS,)),
        "b_hh": nrm(ks[9], (4 * LSTM_CELLS,)),
        "fc_w": nrm(ks[10], (4, LSTM_CELLS)),
        "fc_b": nrm(ks[11], (4,)),
        "out_w": nrm(ks[12], (4, PH * PW + 4)),     # Linear(125, 4)
        "out_b": nrm(ks[13], (4,)),
    }
    cnnx = jax.random.normal(ks[14], (B, C_CNN, H_IN, W_IN), dtype=jnp.float32)
    lstmx = jax.random.normal(ks[15], (B, SEQ_LEN, NUM_CHANNELS), dtype=jnp.float32)

    out = jax.block_until_ready(almodel_forward(cnnx, lstmx, params))
    ref = reference_forward(cnnx, lstmx, params)
    assert out.shape == (B, 4)
    np.testing.assert_allclose(np.asarray(out), np.asarray(ref), rtol=2e-3, atol=2e-3)
    print("KERNEL_OK")
</pallas_src>

<mosaic_0001>
module attributes {stable_mosaic.version = 11 : i64} {
  func.func @almodel_kernel(%arg0: memref<50x1792xf32, #tpu.memory_space<any>>, %arg1: memref<1792x128xf32, #tpu.memory_space<any>>, %arg2: memref<1x1xf32, #tpu.memory_space<vmem>>, %arg3: memref<16x16xf32, #tpu.memory_space<vmem>>, %arg4: memref<16x8xf32, #tpu.memory_space<vmem>>, %arg5: memref<1x8xf32, #tpu.memory_space<vmem>>, %arg6: memref<16x16xf32, #tpu.memory_space<vmem>>, %arg7: memref<16x1xf32, #tpu.memory_space<vmem>>, %arg8: memref<16x1xf32, #tpu.memory_space<vmem>>, %arg9: memref<8x128xf32, #tpu.memory_space<vmem>>, %arg10: memref<32x128xf32, #tpu.memory_space<vmem>>, %arg11: memref<1x128xf32, #tpu.memory_space<vmem>>, %arg12: memref<32x4xf32, #tpu.memory_space<vmem>>, %arg13: memref<1x4xf32, #tpu.memory_space<vmem>>, %arg14: memref<128x128xf32, #tpu.memory_space<vmem>>, %arg15: memref<50x128xf32, #tpu.memory_space<vmem>>, %arg16: memref<2x50xf32, #tpu.memory_space<vmem>>, %arg17: memref<128x4xf32, #tpu.memory_space<vmem>>, %arg18: memref<4x4xf32, #tpu.memory_space<vmem>>, %arg19: memref<1x4xf32, #tpu.memory_space<vmem>>, %arg20: memref<2x4xf32, #tpu.memory_space<vmem>>, %arg21: memref<50x1792xf32, #tpu.memory_space<vmem>>, %arg22: memref<1792x128xf32, #tpu.memory_space<vmem>>, %arg23: memref<16x128xf32, #tpu.memory_space<vmem>>, %arg24: memref<2x!tpu.dma_semaphore, #tpu.memory_space<semaphore_mem>>) attributes {dimension_semantics = [], scalar_prefetch = 0 : i64, scratch_operands = 4 : i64, tpu.core_type = #tpu.core_type<tc>} {
    %c0_i32 = arith.constant 0 : i32
    %0 = tpu.memref_slice %arg24[%c0_i32] : memref<2x!tpu.dma_semaphore, #tpu.memory_space<semaphore_mem>> -> memref<1x!tpu.dma_semaphore, #tpu.memory_space<semaphore_mem>>
    %1 = tpu.memref_squeeze %0 : memref<1x!tpu.dma_semaphore, #tpu.memory_space<semaphore_mem>> -> memref<!tpu.dma_semaphore, #tpu.memory_space<semaphore_mem>>
    tpu.enqueue_dma source(%arg0 : memref<50x1792xf32, #tpu.memory_space<any>>) target(%arg21 : memref<50x1792xf32, #tpu.memory_space<vmem>>) target_semaphore(%1 : memref<!tpu.dma_semaphore, #tpu.memory_space<semaphore_mem>>)
    %c1_i32 = arith.constant 1 : i32
    %2 = tpu.memref_slice %arg24[%c1_i32] : memref<2x!tpu.dma_semaphore, #tpu.memory_space<semaphore_mem>> -> memref<1x!tpu.dma_semaphore, #tpu.memory_space<semaphore_mem>>
    %3 = tpu.memref_squeeze %2 : memref<1x!tpu.dma_semaphore, #tpu.memory_space<semaphore_mem>> -> memref<!tpu.dma_semaphore, #tpu.memory_space<semaphore_mem>>
    tpu.enqueue_dma source(%arg1 : memref<1792x128xf32, #tpu.memory_space<any>>) target(%arg22 : memref<1792x128xf32, #tpu.memory_space<vmem>>) target_semaphore(%3 : memref<!tpu.dma_semaphore, #tpu.memory_space<semaphore_mem>>)
    %c0 = arith.constant 0 : index
    %c0_0 = arith.constant 0 : index
    %4 = vector.load %arg3[%c0, %c0_0] : memref<16x16xf32, #tpu.memory_space<vmem>>, vector<16x16xf32>
    %c0_1 = arith.constant 0 : index
    %c0_2 = arith.constant 0 : index
    %5 = vector.load %arg4[%c0_1, %c0_2] : memref<16x8xf32, #tpu.memory_space<vmem>>, vector<16x8xf32>
    %cst = arith.constant dense<0.000000e+00> : vector<16x8xf32>
    %6 = tpu.matmul %4, %5, %cst {dimension_numbers = #tpu.dot_dimension_numbers<[1], [0], [0], [1], [0, 0, 1, 1], [], []>} : vector<16x16xf32>, vector<16x8xf32>, vector<16x8xf32> -> vector<16x8xf32>
    %c0_3 = arith.constant 0 : index
    %c0_4 = arith.constant 0 : index
    %7 = vector.load %arg5[%c0_3, %c0_4] : memref<1x8xf32, #tpu.memory_space<vmem>>, vector<1x8xf32>
    %8 = vector.broadcast %7 : vector<1x8xf32> to vector<16x8xf32>
    %9 = arith.addf %6, %8 : vector<16x8xf32>
    %c0_5 = arith.constant 0 : index
    %c0_6 = arith.constant 0 : index
    %10 = vector.load %arg6[%c0_5, %c0_6] : memref<16x16xf32, #tpu.memory_space<vmem>>, vector<16x16xf32>
    %cst_7 = arith.constant dense<0.000000e+00> : vector<16x8xf32>
    %11 = tpu.matmul %10, %9, %cst_7 {dimension_numbers = #tpu.dot_dimension_numbers<[1], [0], [0], [1], [0, 0, 1, 1], [], []>} : vector<16x16xf32>, vector<16x8xf32>, vector<16x8xf32> -> vector<16x8xf32>
    %cst_8 = arith.constant dense<0.000000e+00> : vector<16xf32>
    %12 = vector.multi_reduction <add>, %11, %cst_8 [1] : vector<16x8xf32> to vector<16xf32>
    %13 = vector.shape_cast %12 : vector<16xf32> to vector<16x1xf32>
    %14 = vector.broadcast %13 : vector<16x1xf32> to vector<16x8xf32>
    %15 = arith.subf %9, %14 : vector<16x8xf32>
    %c0_9 = arith.constant 0 : index
    %c0_10 = arith.constant 0 : index
    %16 = vector.load %arg6[%c0_9, %c0_10] : memref<16x16xf32, #tpu.memory_space<vmem>>, vector<16x16xf32>
    %17 = arith.mulf %15, %15 : vector<16x8xf32>
    %cst_11 = arith.constant dense<0.000000e+00> : vector<16x8xf32>
    %18 = tpu.matmul %16, %17, %cst_11 {dimension_numbers = #tpu.dot_dimension_numbers<[1], [0], [0], [1], [0, 0, 1, 1], [], []>} : vector<16x16xf32>, vector<16x8xf32>, vector<16x8xf32> -> vector<16x8xf32>
    %cst_12 = arith.constant dense<0.000000e+00> : vector<16xf32>
    %19 = vector.multi_reduction <add>, %18, %cst_12 [1] : vector<16x8xf32> to vector<16xf32>
    %20 = vector.shape_cast %19 : vector<16xf32> to vector<16x1xf32>
    %c0_13 = arith.constant 0 : index
    %c0_14 = arith.constant 0 : index
    %21 = vector.load %arg7[%c0_13, %c0_14] : memref<16x1xf32, #tpu.memory_space<vmem>>, vector<16x1xf32>
    %22 = vector.broadcast %21 : vector<16x1xf32> to vector<16x8xf32>
    %23 = arith.mulf %22, %15 : vector<16x8xf32>
    %cst_15 = arith.constant 9.99999974E-6 : f32
    %24 = vector.broadcast %cst_15 : f32 to vector<16x1xf32>
    %25 = arith.addf %20, %24 : vector<16x1xf32>
    %26 = math.rsqrt %25 : vector<16x1xf32>
    %27 = vector.broadcast %26 : vector<16x1xf32> to vector<16x8xf32>
    %28 = arith.mulf %23, %27 : vector<16x8xf32>
    %c0_16 = arith.constant 0 : index
    %c0_17 = arith.constant 0 : index
    %29 = vector.load %arg8[%c0_16, %c0_17] : memref<16x1xf32, #tpu.memory_space<vmem>>, vector<16x1xf32>
    %30 = vector.broadcast %29 : vector<16x1xf32> to vector<16x8xf32>
    %31 = arith.addf %28, %30 : vector<16x8xf32>
    %c0_18 = arith.constant 0 : index
    %c0_19 = arith.constant 0 : index
    %32 = vector.load %arg9[%c0_18, %c0_19] : memref<8x128xf32, #tpu.memory_space<vmem>>, vector<8x128xf32>
    %cst_20 = arith.constant dense<0.000000e+00> : vector<16x128xf32>
    %33 = tpu.matmul %31, %32, %cst_20 {dimension_numbers = #tpu.dot_dimension_numbers<[1], [0], [0], [1], [0, 0, 1, 1], [], []>} : vector<16x8xf32>, vector<8x128xf32>, vector<16x128xf32> -> vector<16x128xf32>
    %c0_21 = arith.constant 0 : index
    %c0_22 = arith.constant 0 : index
    %34 = vector.load %arg11[%c0_21, %c0_22] : memref<1x128xf32, #tpu.memory_space<vmem>>, vector<1x128xf32>
    %35 = vector.broadcast %34 : vector<1x128xf32> to vector<16x128xf32>
    %36 = arith.addf %33, %35 : vector<16x128xf32>
    %c0_23 = arith.constant 0 : index
    %c0_24 = arith.constant 0 : index
    %37 = vector.load %arg23[%c0_23, %c0_24] : memref<16x128xf32, #tpu.memory_space<vmem>>, vector<16x128xf32>
    tpu.vector_store %arg23[%c0_23, %c0_24], %36 {strides = array<i32>} : memref<16x128xf32, #tpu.memory_space<vmem>>, vector<16x128xf32>,
    %cst_25 = arith.constant 0.000000e+00 : f32
    %38 = vector.broadcast %cst_25 : f32 to vector<2x32xf32>
    %cst_26 = arith.constant 0.000000e+00 : f32
    %39 = vector.broadcast %cst_26 : f32 to vector<2x32xf32>
    %c0_27 = arith.constant 0 : index
    %c0_28 = arith.constant 0 : index
    %40 = vector.load %arg23[%c0_27, %c0_28] : memref<16x128xf32, #tpu.memory_space<vmem>>, vector<2x128xf32>
    %c0_29 = arith.constant 0 : index
    %c0_30 = arith.constant 0 : index
    %41 = vector.load %arg10[%c0_29, %c0_30] : memref<32x128xf32, #tpu.memory_space<vmem>>, vector<32x128xf32>
    %cst_31 = arith.constant dense<0.000000e+00> : vector<2x128xf32>
    %42 = tpu.matmul %38, %41, %cst_31 {dimension_numbers = #tpu.dot_dimension_numbers<[1], [0], [0], [1], [0, 0, 1, 1], [], []>} : vector<2x32xf32>, vector<32x128xf32>, vector<2x128xf32> -> vector<2x128xf32>
    %43 = arith.addf %40, %42 : vector<2x128xf32>
    %44 = vector.extract_strided_slice %43 {offsets = [0, 0], sizes = [2, 32], strides = [1, 1]} : vector<2x128xf32> to vector<2x32xf32>
    %cst_32 = arith.constant 0.000000e+00 : f32
    %45 = vector.broadcast %cst_32 : f32 to vector<2x32xf32>
    %46 = arith.subf %45, %44 : vector<2x32xf32>
    %47 = math.exp %46 : vector<2x32xf32>
    %cst_33 = arith.constant 1.000000e+00 : f32
    %48 = vector.broadcast %cst_33 : f32 to vector<2x32xf32>
    %49 = arith.addf %48, %47 : vector<2x32xf32>
    %cst_34 = arith.constant 1.000000e+00 : f32
    %50 = vector.broadcast %cst_34 : f32 to vector<2x32xf32>
    %51 = arith.divf %50, %49 : vector<2x32xf32>
    %52 = vector.extract_strided_slice %43 {offsets = [0, 32], sizes = [2, 32], strides = [1, 1]} : vector<2x128xf32> to vector<2x32xf32>
    %cst_35 = arith.constant 0.000000e+00 : f32
    %53 = vector.broadcast %cst_35 : f32 to vector<2x32xf32>
    %54 = arith.subf %53, %52 : vector<2x32xf32>
    %55 = math.exp %54 : vector<2x32xf32>
    %cst_36 = arith.constant 1.000000e+00 : f32
    %56 = vector.broadcast %cst_36 : f32 to vector<2x32xf32>
    %57 = arith.addf %56, %55 : vector<2x32xf32>
    %cst_37 = arith.constant 1.000000e+00 : f32
    %58 = vector.broadcast %cst_37 : f32 to vector<2x32xf32>
    %59 = arith.divf %58, %57 : vector<2x32xf32>
    %60 = vector.extract_strided_slice %43 {offsets = [0, 64], sizes = [2, 32], strides = [1, 1]} : vector<2x128xf32> to vector<2x32xf32>
    %61 = math.tanh %60 : vector<2x32xf32>
    %62 = vector.extract_strided_slice %43 {offsets = [0, 96], sizes = [2, 32], strides = [1, 1]} : vector<2x128xf32> to vector<2x32xf32>
    %cst_38 = arith.constant 0.000000e+00 : f32
    %63 = vector.broadcast %cst_38 : f32 to vector<2x32xf32>
    %64 = arith.subf %63, %62 : vector<2x32xf32>
    %65 = math.exp %64 : vector<2x32xf32>
    %cst_39 = arith.constant 1.000000e+00 : f32
    %66 = vector.broadcast %cst_39 : f32 to vector<2x32xf32>
    %67 = arith.addf %66, %65 : vector<2x32xf32>
    %cst_40 = arith.constant 1.000000e+00 : f32
    %68 = vector.broadcast %cst_40 : f32 to vector<2x32xf32>
    %69 = arith.divf %68, %67 : vector<2x32xf32>
    %70 = arith.mulf %59, %39 : vector<2x32xf32>
    %71 = arith.mulf %51, %61 : vector<2x32xf32>
    %72 = arith.addf %70, %71 : vector<2x32xf32>
    %73 = math.tanh %72 : vector<2x32xf32>
    %74 = arith.mulf %69, %73 : vector<2x32xf32>
    %c2 = arith.constant 2 : index
    %c0_41 = arith.constant 0 : index
    %75 = vector.load %arg23[%c2, %c0_41] : memref<16x128xf32, #tpu.memory_space<vmem>>, vector<2x128xf32>
    %c0_42 = arith.constant 0 : index
    %c0_43 = arith.constant 0 : index
    %76 = vector.load %arg10[%c0_42, %c0_43] : memref<32x128xf32, #tpu.memory_space<vmem>>, vector<32x128xf32>
    %cst_44 = arith.constant dense<0.000000e+00> : vector<2x128xf32>
    %77 = tpu.matmul %74, %76, %cst_44 {dimension_numbers = #tpu.dot_dimension_numbers<[1], [0], [0], [1], [0, 0, 1, 1], [], []>} : vector<2x32xf32>, vector<32x128xf32>, vector<2x128xf32> -> vector<2x128xf32>
    %78 = arith.addf %75, %77 : vector<2x128xf32>
    %79 = vector.extract_strided_slice %78 {offsets = [0, 0], sizes = [2, 32], strides = [1, 1]} : vector<2x128xf32> to vector<2x32xf32>
    %cst_45 = arith.constant 0.000000e+00 : f32
    %80 = vector.broadcast %cst_45 : f32 to vector<2x32xf32>
    %81 = arith.subf %80, %79 : vector<2x32xf32>
    %82 = math.exp %81 : vector<2x32xf32>
    %cst_46 = arith.constant 1.000000e+00 : f32
    %83 = vector.broadcast %cst_46 : f32 to vector<2x32xf32>
    %84 = arith.addf %83, %82 : vector<2x32xf32>
    %cst_47 = arith.constant 1.000000e+00 : f32
    %85 = vector.broadcast %cst_47 : f32 to vector<2x32xf32>
    %86 = arith.divf %85, %84 : vector<2x32xf32>
    %87 = vector.extract_strided_slice %78 {offsets = [0, 32], sizes = [2, 32], strides = [1, 1]} : vector<2x128xf32> to vector<2x32xf32>
    %cst_48 = arith.constant 0.000000e+00 : f32
    %88 = vector.broadcast %cst_48 : f32 to vector<2x32xf32>
    %89 = arith.subf %88, %87 : vector<2x32xf32>
    %90 = math.exp %89 : vector<2x32xf32>
    %cst_49 = arith.constant 1.000000e+00 : f32
    %91 = vector.broadcast %cst_49 : f32 to vector<2x32xf32>
    %92 = arith.addf %91, %90 : vector<2x32xf32>
    %cst_50 = arith.constant 1.000000e+00 : f32
    %93 = vector.broadcast %cst_50 : f32 to vector<2x32xf32>
    %94 = arith.divf %93, %92 : vector<2x32xf32>
    %95 = vector.extract_strided_slice %78 {offsets = [0, 64], sizes = [2, 32], strides = [1, 1]} : vector<2x128xf32> to vector<2x32xf32>
    %96 = math.tanh %95 : vector<2x32xf32>
    %97 = vector.extract_strided_slice %78 {offsets = [0, 96], sizes = [2, 32], strides = [1, 1]} : vector<2x128xf32> to vector<2x32xf32>
    %cst_51 = arith.constant 0.000000e+00 : f32
    %98 = vector.broadcast %cst_51 : f32 to vector<2x32xf32>
    %99 = arith.subf %98, %97 : vector<2x32xf32>
    %100 = math.exp %99 : vector<2x32xf32>
    %cst_52 = arith.constant 1.000000e+00 : f32
    %101 = vector.broadcast %cst_52 : f32 to vector<2x32xf32>
    %102 = arith.addf %101, %100 : vector<2x32xf32>
    %cst_53 = arith.constant 1.000000e+00 : f32
    %103 = vector.broadcast %cst_53 : f32 to vector<2x32xf32>
    %104 = arith.divf %103, %102 : vector<2x32xf32>
    %105 = arith.mulf %94, %72 : vector<2x32xf32>
    %106 = arith.mulf %86, %96 : vector<2x32xf32>
    %107 = arith.addf %105, %106 : vector<2x32xf32>
    %108 = math.tanh %107 : vector<2x32xf32>
    %109 = arith.mulf %104, %108 : vector<2x32xf32>
    %c4 = arith.constant 4 : index
    %c0_54 = arith.constant 0 : index
    %110 = vector.load %arg23[%c4, %c0_54] : memref<16x128xf32, #tpu.memory_space<vmem>>, vector<2x128xf32>
    %c0_55 = arith.constant 0 : index
    %c0_56 = arith.constant 0 : index
    %111 = vector.load %arg10[%c0_55, %c0_56] : memref<32x128xf32, #tpu.memory_space<vmem>>, vector<32x128xf32>
    %cst_57 = arith.constant dense<0.000000e+00> : vector<2x128xf32>
    %112 = tpu.matmul %109, %111, %cst_57 {dimension_numbers = #tpu.dot_dimension_numbers<[1], [0], [0], [1], [0, 0, 1, 1], [], []>} : vector<2x32xf32>, vector<32x128xf32>, vector<2x128xf32> -> vector<2x128xf32>
    %113 = arith.addf %110, %112 : vector<2x128xf32>
    %114 = vector.extract_strided_slice %113 {offsets = [0, 0], sizes = [2, 32], strides = [1, 1]} : vector<2x128xf32> to vector<2x32xf32>
    %cst_58 = arith.constant 0.000000e+00 : f32
    %115 = vector.broadcast %cst_58 : f32 to vector<2x32xf32>
    %116 = arith.subf %115, %114 : vector<2x32xf32>
    %117 = math.exp %116 : vector<2x32xf32>
    %cst_59 = arith.constant 1.000000e+00 : f32
    %118 = vector.broadcast %cst_59 : f32 to vector<2x32xf32>
    %119 = arith.addf %118, %117 : vector<2x32xf32>
    %cst_60 = arith.constant 1.000000e+00 : f32
    %120 = vector.broadcast %cst_60 : f32 to vector<2x32xf32>
    %121 = arith.divf %120, %119 : vector<2x32xf32>
    %122 = vector.extract_strided_slice %113 {offsets = [0, 32], sizes = [2, 32], strides = [1, 1]} : vector<2x128xf32> to vector<2x32xf32>
    %cst_61 = arith.constant 0.000000e+00 : f32
    %123 = vector.broadcast %cst_61 : f32 to vector<2x32xf32>
    %124 = arith.subf %123, %122 : vector<2x32xf32>
    %125 = math.exp %124 : vector<2x32xf32>
    %cst_62 = arith.constant 1.000000e+00 : f32
    %126 = vector.broadcast %cst_62 : f32 to vector<2x32xf32>
    %127 = arith.addf %126, %125 : vector<2x32xf32>
    %cst_63 = arith.constant 1.000000e+00 : f32
    %128 = vector.broadcast %cst_63 : f32 to vector<2x32xf32>
    %129 = arith.divf %128, %127 : vector<2x32xf32>
    %130 = vector.extract_strided_slice %113 {offsets = [0, 64], sizes = [2, 32], strides = [1, 1]} : vector<2x128xf32> to vector<2x32xf32>
    %131 = math.tanh %130 : vector<2x32xf32>
    %132 = vector.extract_strided_slice %113 {offsets = [0, 96], sizes = [2, 32], strides = [1, 1]} : vector<2x128xf32> to vector<2x32xf32>
    %cst_64 = arith.constant 0.000000e+00 : f32
    %133 = vector.broadcast %cst_64 : f32 to vector<2x32xf32>
    %134 = arith.subf %133, %132 : vector<2x32xf32>
    %135 = math.exp %134 : vector<2x32xf32>
    %cst_65 = arith.constant 1.000000e+00 : f32
    %136 = vector.broadcast %cst_65 : f32 to vector<2x32xf32>
    %137 = arith.addf %136, %135 : vector<2x32xf32>
    %cst_66 = arith.constant 1.000000e+00 : f32
    %138 = vector.broadcast %cst_66 : f32 to vector<2x32xf32>
    %139 = arith.divf %138, %137 : vector<2x32xf32>
    %140 = arith.mulf %129, %107 : vector<2x32xf32>
    %141 = arith.mulf %121, %131 : vector<2x32xf32>
    %142 = arith.addf %140, %141 : vector<2x32xf32>
    %143 = math.tanh %142 : vector<2x32xf32>
    %144 = arith.mulf %139, %143 : vector<2x32xf32>
    %c6 = arith.constant 6 : index
    %c0_67 = arith.constant 0 : index
    %145 = vector.load %arg23[%c6, %c0_67] : memref<16x128xf32, #tpu.memory_space<vmem>>, vector<2x128xf32>
    %c0_68 = arith.constant 0 : index
    %c0_69 = arith.constant 0 : index
    %146 = vector.load %arg10[%c0_68, %c0_69] : memref<32x128xf32, #tpu.memory_space<vmem>>, vector<32x128xf32>
    %cst_70 = arith.constant dense<0.000000e+00> : vector<2x128xf32>
    %147 = tpu.matmul %144, %146, %cst_70 {dimension_numbers = #tpu.dot_dimension_numbers<[1], [0], [0], [1], [0, 0, 1, 1], [], []>} : vector<2x32xf32>, vector<32x128xf32>, vector<2x128xf32> -> vector<2x128xf32>
    %148 = arith.addf %145, %147 : vector<2x128xf32>
    %149 = vector.extract_strided_slice %148 {offsets = [0, 0], sizes = [2, 32], strides = [1, 1]} : vector<2x128xf32> to vector<2x32xf32>
    %cst_71 = arith.constant 0.000000e+00 : f32
    %150 = vector.broadcast %cst_71 : f32 to vector<2x32xf32>
    %151 = arith.subf %150, %149 : vector<2x32xf32>
    %152 = math.exp %151 : vector<2x32xf32>
    %cst_72 = arith.constant 1.000000e+00 : f32
    %153 = vector.broadcast %cst_72 : f32 to vector<2x32xf32>
    %154 = arith.addf %153, %152 : vector<2x32xf32>
    %cst_73 = arith.constant 1.000000e+00 : f32
    %155 = vector.broadcast %cst_73 : f32 to vector<2x32xf32>
    %156 = arith.divf %155, %154 : vector<2x32xf32>
    %157 = vector.extract_strided_slice %148 {offsets = [0, 32], sizes = [2, 32], strides = [1, 1]} : vector<2x128xf32> to vector<2x32xf32>
    %cst_74 = arith.constant 0.000000e+00 : f32
    %158 = vector.broadcast %cst_74 : f32 to vector<2x32xf32>
    %159 = arith.subf %158, %157 : vector<2x32xf32>
    %160 = math.exp %159 : vector<2x32xf32>
    %cst_75 = arith.constant 1.000000e+00 : f32
    %161 = vector.broadcast %cst_75 : f32 to vector<2x32xf32>
    %162 = arith.addf %161, %160 : vector<2x32xf32>
    %cst_76 = arith.constant 1.000000e+00 : f32
    %163 = vector.broadcast %cst_76 : f32 to vector<2x32xf32>
    %164 = arith.divf %163, %162 : vector<2x32xf32>
    %165 = vector.extract_strided_slice %148 {offsets = [0, 64], sizes = [2, 32], strides = [1, 1]} : vector<2x128xf32> to vector<2x32xf32>
    %166 = math.tanh %165 : vector<2x32xf32>
    %167 = vector.extract_strided_slice %148 {offsets = [0, 96], sizes = [2, 32], strides = [1, 1]} : vector<2x128xf32> to vector<2x32xf32>
    %cst_77 = arith.constant 0.000000e+00 : f32
    %168 = vector.broadcast %cst_77 : f32 to vector<2x32xf32>
    %169 = arith.subf %168, %167 : vector<2x32xf32>
    %170 = math.exp %169 : vector<2x32xf32>
    %cst_78 = arith.constant 1.000000e+00 : f32
    %171 = vector.broadcast %cst_78 : f32 to vector<2x32xf32>
    %172 = arith.addf %171, %170 : vector<2x32xf32>
    %cst_79 = arith.constant 1.000000e+00 : f32
    %173 = vector.broadcast %cst_79 : f32 to vector<2x32xf32>
    %174 = arith.divf %173, %172 : vector<2x32xf32>
    %175 = arith.mulf %164, %142 : vector<2x32xf32>
    %176 = arith.mulf %156, %166 : vector<2x32xf32>
    %177 = arith.addf %175, %176 : vector<2x32xf32>
    %178 = math.tanh %177 : vector<2x32xf32>
    %179 = arith.mulf %174, %178 : vector<2x32xf32>
    %c8 = arith.constant 8 : index
    %c0_80 = arith.constant 0 : index
    %180 = vector.load %arg23[%c8, %c0_80] : memref<16x128xf32, #tpu.memory_space<vmem>>, vector<2x128xf32>
    %c0_81 = arith.constant 0 : index
    %c0_82 = arith.constant 0 : index
    %181 = vector.load %arg10[%c0_81, %c0_82] : memref<32x128xf32, #tpu.memory_space<vmem>>, vector<32x128xf32>
    %cst_83 = arith.constant dense<0.000000e+00> : vector<2x128xf32>
    %182 = tpu.matmul %179, %181, %cst_83 {dimension_numbers = #tpu.dot_dimension_numbers<[1], [0], [0], [1], [0, 0, 1, 1], [], []>} : vector<2x32xf32>, vector<32x128xf32>, vector<2x128xf32> -> vector<2x128xf32>
    %183 = arith.addf %180, %182 : vector<2x128xf32>
    %184 = vector.extract_strided_slice %183 {offsets = [0, 0], sizes = [2, 32], strides = [1, 1]} : vector<2x128xf32> to vector<2x32xf32>
    %cst_84 = arith.constant 0.000000e+00 : f32
    %185 = vector.broadcast %cst_84 : f32 to vector<2x32xf32>
    %186 = arith.subf %185, %184 : vector<2x32xf32>
    %187 = math.exp %186 : vector<2x32xf32>
    %cst_85 = arith.constant 1.000000e+00 : f32
    %188 = vector.broadcast %cst_85 : f32 to vector<2x32xf32>
    %189 = arith.addf %188, %187 : vector<2x32xf32>
    %cst_86 = arith.constant 1.000000e+00 : f32
    %190 = vector.broadcast %cst_86 : f32 to vector<2x32xf32>
    %191 = arith.divf %190, %189 : vector<2x32xf32>
    %192 = vector.extract_strided_slice %183 {offsets = [0, 32], sizes = [2, 32], strides = [1, 1]} : vector<2x128xf32> to vector<2x32xf32>
    %cst_87 = arith.constant 0.000000e+00 : f32
    %193 = vector.broadcast %cst_87 : f32 to vector<2x32xf32>
    %194 = arith.subf %193, %192 : vector<2x32xf32>
    %195 = math.exp %194 : vector<2x32xf32>
    %cst_88 = arith.constant 1.000000e+00 : f32
    %196 = vector.broadcast %cst_88 : f32 to vector<2x32xf32>
    %197 = arith.addf %196, %195 : vector<2x32xf32>
    %cst_89 = arith.constant 1.000000e+00 : f32
    %198 = vector.broadcast %cst_89 : f32 to vector<2x32xf32>
    %199 = arith.divf %198, %197 : vector<2x32xf32>
    %200 = vector.extract_strided_slice %183 {offsets = [0, 64], sizes = [2, 32], strides = [1, 1]} : vector<2x128xf32> to vector<2x32xf32>
    %201 = math.tanh %200 : vector<2x32xf32>
    %202 = vector.extract_strided_slice %183 {offsets = [0, 96], sizes = [2, 32], strides = [1, 1]} : vector<2x128xf32> to vector<2x32xf32>
    %cst_90 = arith.constant 0.000000e+00 : f32
    %203 = vector.broadcast %cst_90 : f32 to vector<2x32xf32>
    %204 = arith.subf %203, %202 : vector<2x32xf32>
    %205 = math.exp %204 : vector<2x32xf32>
    %cst_91 = arith.constant 1.000000e+00 : f32
    %206 = vector.broadcast %cst_91 : f32 to vector<2x32xf32>
    %207 = arith.addf %206, %205 : vector<2x32xf32>
    %cst_92 = arith.constant 1.000000e+00 : f32
    %208 = vector.broadcast %cst_92 : f32 to vector<2x32xf32>
    %209 = arith.divf %208, %207 : vector<2x32xf32>
    %210 = arith.mulf %199, %177 : vector<2x32xf32>
    %211 = arith.mulf %191, %201 : vector<2x32xf32>
    %212 = arith.addf %210, %211 : vector<2x32xf32>
    %213 = math.tanh %212 : vector<2x32xf32>
    %214 = arith.mulf %209, %213 : vector<2x32xf32>
    %c10 = arith.constant 10 : index
    %c0_93 = arith.constant 0 : index
    %215 = vector.load %arg23[%c10, %c0_93] : memref<16x128xf32, #tpu.memory_space<vmem>>, vector<2x128xf32>
    %c0_94 = arith.constant 0 : index
    %c0_95 = arith.constant 0 : index
    %216 = vector.load %arg10[%c0_94, %c0_95] : memref<32x128xf32, #tpu.memory_space<vmem>>, vector<32x128xf32>
    %cst_96 = arith.constant dense<0.000000e+00> : vector<2x128xf32>
    %217 = tpu.matmul %214, %216, %cst_96 {dimension_numbers = #tpu.dot_dimension_numbers<[1], [0], [0], [1], [0, 0, 1, 1], [], []>} : vector<2x32xf32>, vector<32x128xf32>, vector<2x128xf32> -> vector<2x128xf32>
    %218 = arith.addf %215, %217 : vector<2x128xf32>
    %219 = vector.extract_strided_slice %218 {offsets = [0, 0], sizes = [2, 32], strides = [1, 1]} : vector<2x128xf32> to vector<2x32xf32>
    %cst_97 = arith.constant 0.000000e+00 : f32
    %220 = vector.broadcast %cst_97 : f32 to vector<2x32xf32>
    %221 = arith.subf %220, %219 : vector<2x32xf32>
    %222 = math.exp %221 : vector<2x32xf32>
    %cst_98 = arith.constant 1.000000e+00 : f32
    %223 = vector.broadcast %cst_98 : f32 to vector<2x32xf32>
    %224 = arith.addf %223, %222 : vector<2x32xf32>
    %cst_99 = arith.constant 1.000000e+00 : f32
    %225 = vector.broadcast %cst_99 : f32 to vector<2x32xf32>
    %226 = arith.divf %225, %224 : vector<2x32xf32>
    %227 = vector.extract_strided_slice %218 {offsets = [0, 32], sizes = [2, 32], strides = [1, 1]} : vector<2x128xf32> to vector<2x32xf32>
    %cst_100 = arith.constant 0.000000e+00 : f32
    %228 = vector.broadcast %cst_100 : f32 to vector<2x32xf32>
    %229 = arith.subf %228, %227 : vector<2x32xf32>
    %230 = math.exp %229 : vector<2x32xf32>
    %cst_101 = arith.constant 1.000000e+00 : f32
    %231 = vector.broadcast %cst_101 : f32 to vector<2x32xf32>
    %232 = arith.addf %231, %230 : vector<2x32xf32>
    %cst_102 = arith.constant 1.000000e+00 : f32
    %233 = vector.broadcast %cst_102 : f32 to vector<2x32xf32>
    %234 = arith.divf %233, %232 : vector<2x32xf32>
    %235 = vector.extract_strided_slice %218 {offsets = [0, 64], sizes = [2, 32], strides = [1, 1]} : vector<2x128xf32> to vector<2x32xf32>
    %236 = math.tanh %235 : vector<2x32xf32>
    %237 = vector.extract_strided_slice %218 {offsets = [0, 96], sizes = [2, 32], strides = [1, 1]} : vector<2x128xf32> to vector<2x32xf32>
    %cst_103 = arith.constant 0.000000e+00 : f32
    %238 = vector.broadcast %cst_103 : f32 to vector<2x32xf32>
    %239 = arith.subf %238, %237 : vector<2x32xf32>
    %240 = math.exp %239 : vector<2x32xf32>
    %cst_104 = arith.constant 1.000000e+00 : f32
    %241 = vector.broadcast %cst_104 : f32 to vector<2x32xf32>
    %242 = arith.addf %241, %240 : vector<2x32xf32>
    %cst_105 = arith.constant 1.000000e+00 : f32
    %243 = vector.broadcast %cst_105 : f32 to vector<2x32xf32>
    %244 = arith.divf %243, %242 : vector<2x32xf32>
    %245 = arith.mulf %234, %212 : vector<2x32xf32>
    %246 = arith.mulf %226, %236 : vector<2x32xf32>
    %247 = arith.addf %245, %246 : vector<2x32xf32>
    %248 = math.tanh %247 : vector<2x32xf32>
    %249 = arith.mulf %244, %248 : vector<2x32xf32>
    %c12 = arith.constant 12 : index
    %c0_106 = arith.constant 0 : index
    %250 = vector.load %arg23[%c12, %c0_106] : memref<16x128xf32, #tpu.memory_space<vmem>>, vector<2x128xf32>
    %c0_107 = arith.constant 0 : index
    %c0_108 = arith.constant 0 : index
    %251 = vector.load %arg10[%c0_107, %c0_108] : memref<32x128xf32, #tpu.memory_space<vmem>>, vector<32x128xf32>
    %cst_109 = arith.constant dense<0.000000e+00> : vector<2x128xf32>
    %252 = tpu.matmul %249, %251, %cst_109 {dimension_numbers = #tpu.dot_dimension_numbers<[1], [0], [0], [1], [0, 0, 1, 1], [], []>} : vector<2x32xf32>, vector<32x128xf32>, vector<2x128xf32> -> vector<2x128xf32>
    %253 = arith.addf %250, %252 : vector<2x128xf32>
    %254 = vector.extract_strided_slice %253 {offsets = [0, 0], sizes = [2, 32], strides = [1, 1]} : vector<2x128xf32> to vector<2x32xf32>
    %cst_110 = arith.constant 0.000000e+00 : f32
    %255 = vector.broadcast %cst_110 : f32 to vector<2x32xf32>
    %256 = arith.subf %255, %254 : vector<2x32xf32>
    %257 = math.exp %256 : vector<2x32xf32>
    %cst_111 = arith.constant 1.000000e+00 : f32
    %258 = vector.broadcast %cst_111 : f32 to vector<2x32xf32>
    %259 = arith.addf %258, %257 : vector<2x32xf32>
    %cst_112 = arith.constant 1.000000e+00 : f32
    %260 = vector.broadcast %cst_112 : f32 to vector<2x32xf32>
    %261 = arith.divf %260, %259 : vector<2x32xf32>
    %262 = vector.extract_strided_slice %253 {offsets = [0, 32], sizes = [2, 32], strides = [1, 1]} : vector<2x128xf32> to vector<2x32xf32>
    %cst_113 = arith.constant 0.000000e+00 : f32
    %263 = vector.broadcast %cst_113 : f32 to vector<2x32xf32>
    %264 = arith.subf %263, %262 : vector<2x32xf32>
    %265 = math.exp %264 : vector<2x32xf32>
    %cst_114 = arith.constant 1.000000e+00 : f32
    %266 = vector.broadcast %cst_114 : f32 to vector<2x32xf32>
    %267 = arith.addf %266, %265 : vector<2x32xf32>
    %cst_115 = arith.constant 1.000000e+00 : f32
    %268 = vector.broadcast %cst_115 : f32 to vector<2x32xf32>
    %269 = arith.divf %268, %267 : vector<2x32xf32>
    %270 = vector.extract_strided_slice %253 {offsets = [0, 64], sizes = [2, 32], strides = [1, 1]} : vector<2x128xf32> to vector<2x32xf32>
    %271 = math.tanh %270 : vector<2x32xf32>
    %272 = vector.extract_strided_slice %253 {offsets = [0, 96], sizes = [2, 32], strides = [1, 1]} : vector<2x128xf32> to vector<2x32xf32>
    %cst_116 = arith.constant 0.000000e+00 : f32
    %273 = vector.broadcast %cst_116 : f32 to vector<2x32xf32>
    %274 = arith.subf %273, %272 : vector<2x32xf32>
    %275 = math.exp %274 : vector<2x32xf32>
    %cst_117 = arith.constant 1.000000e+00 : f32
    %276 = vector.broadcast %cst_117 : f32 to vector<2x32xf32>
    %277 = arith.addf %276, %275 : vector<2x32xf32>
    %cst_118 = arith.constant 1.000000e+00 : f32
    %278 = vector.broadcast %cst_118 : f32 to vector<2x32xf32>
    %279 = arith.divf %278, %277 : vector<2x32xf32>
    %280 = arith.mulf %269, %247 : vector<2x32xf32>
    %281 = arith.mulf %261, %271 : vector<2x32xf32>
    %282 = arith.addf %280, %281 : vector<2x32xf32>
    %283 = math.tanh %282 : vector<2x32xf32>
    %284 = arith.mulf %279, %283 : vector<2x32xf32>
    %c14 = arith.constant 14 : index
    %c0_119 = arith.constant 0 : index
    %285 = vector.load %arg23[%c14, %c0_119] : memref<16x128xf32, #tpu.memory_space<vmem>>, vector<2x128xf32>
    %c0_120 = arith.constant 0 : index
    %c0_121 = arith.constant 0 : index
    %286 = vector.load %arg10[%c0_120, %c0_121] : memref<32x128xf32, #tpu.memory_space<vmem>>, vector<32x128xf32>
    %cst_122 = arith.constant dense<0.000000e+00> : vector<2x128xf32>
    %287 = tpu.matmul %284, %286, %cst_122 {dimension_numbers = #tpu.dot_dimension_numbers<[1], [0], [0], [1], [0, 0, 1, 1], [], []>} : vector<2x32xf32>, vector<32x128xf32>, vector<2x128xf32> -> vector<2x128xf32>
    %288 = arith.addf %285, %287 : vector<2x128xf32>
    %289 = vector.extract_strided_slice %288 {offsets = [0, 0], sizes = [2, 32], strides = [1, 1]} : vector<2x128xf32> to vector<2x32xf32>
    %cst_123 = arith.constant 0.000000e+00 : f32
    %290 = vector.broadcast %cst_123 : f32 to vector<2x32xf32>
    %291 = arith.subf %290, %289 : vector<2x32xf32>
    %292 = math.exp %291 : vector<2x32xf32>
    %cst_124 = arith.constant 1.000000e+00 : f32
    %293 = vector.broadcast %cst_124 : f32 to vector<2x32xf32>
    %294 = arith.addf %293, %292 : vector<2x32xf32>
    %cst_125 = arith.constant 1.000000e+00 : f32
    %295 = vector.broadcast %cst_125 : f32 to vector<2x32xf32>
    %296 = arith.divf %295, %294 : vector<2x32xf32>
    %297 = vector.extract_strided_slice %288 {offsets = [0, 32], sizes = [2, 32], strides = [1, 1]} : vector<2x128xf32> to vector<2x32xf32>
    %cst_126 = arith.constant 0.000000e+00 : f32
    %298 = vector.broadcast %cst_126 : f32 to vector<2x32xf32>
    %299 = arith.subf %298, %297 : vector<2x32xf32>
    %300 = math.exp %299 : vector<2x32xf32>
    %cst_127 = arith.constant 1.000000e+00 : f32
    %301 = vector.broadcast %cst_127 : f32 to vector<2x32xf32>
    %302 = arith.addf %301, %300 : vector<2x32xf32>
    %cst_128 = arith.constant 1.000000e+00 : f32
    %303 = vector.broadcast %cst_128 : f32 to vector<2x32xf32>
    %304 = arith.divf %303, %302 : vector<2x32xf32>
    %305 = vector.extract_strided_slice %288 {offsets = [0, 64], sizes = [2, 32], strides = [1, 1]} : vector<2x128xf32> to vector<2x32xf32>
    %306 = math.tanh %305 : vector<2x32xf32>
    %307 = vector.extract_strided_slice %288 {offsets = [0, 96], sizes = [2, 32], strides = [1, 1]} : vector<2x128xf32> to vector<2x32xf32>
    %cst_129 = arith.constant 0.000000e+00 : f32
    %308 = vector.broadcast %cst_129 : f32 to vector<2x32xf32>
    %309 = arith.subf %308, %307 : vector<2x32xf32>
    %310 = math.exp %309 : vector<2x32xf32>
    %cst_130 = arith.constant 1.000000e+00 : f32
    %311 = vector.broadcast %cst_130 : f32 to vector<2x32xf32>
    %312 = arith.addf %311, %310 : vector<2x32xf32>
    %cst_131 = arith.constant 1.000000e+00 : f32
    %313 = vector.broadcast %cst_131 : f32 to vector<2x32xf32>
    %314 = arith.divf %313, %312 : vector<2x32xf32>
    %315 = arith.mulf %304, %282 : vector<2x32xf32>
    %316 = arith.mulf %296, %306 : vector<2x32xf32>
    %317 = arith.addf %315, %316 : vector<2x32xf32>
    %318 = math.tanh %317 : vector<2x32xf32>
    %319 = arith.mulf %314, %318 : vector<2x32xf32>
    %c0_132 = arith.constant 0 : index
    %c0_133 = arith.constant 0 : index
    %320 = vector.load %arg12[%c0_132, %c0_133] : memref<32x4xf32, #tpu.memory_space<vmem>>, vector<32x4xf32>
    %cst_134 = arith.constant dense<0.000000e+00> : vector<2x4xf32>
    %321 = tpu.matmul %319, %320, %cst_134 {dimension_numbers = #tpu.dot_dimension_numbers<[1], [0], [0], [1], [0, 0, 1, 1], [], []>} : vector<2x32xf32>, vector<32x4xf32>, vector<2x4xf32> -> vector<2x4xf32>
    %c0_135 = arith.constant 0 : index
    %c0_136 = arith.constant 0 : index
    %322 = vector.load %arg13[%c0_135, %c0_136] : memref<1x4xf32, #tpu.memory_space<vmem>>, vector<1x4xf32>
    %323 = vector.broadcast %322 : vector<1x4xf32> to vector<2x4xf32>
    %324 = arith.addf %321, %323 : vector<2x4xf32>
    %cst_137 = arith.constant dense<0xFF800000> : vector<2xf32>
    %325 = vector.multi_reduction <maximumf>, %324, %cst_137 [1] : vector<2x4xf32> to vector<2xf32>
    %326 = vector.shape_cast %325 : vector<2xf32> to vector<2x1xf32>
    %327 = vector.broadcast %326 : vector<2x1xf32> to vector<2x4xf32>
    %328 = arith.subf %324, %327 : vector<2x4xf32>
    %329 = math.exp %328 : vector<2x4xf32>
    %cst_138 = arith.constant dense<0.000000e+00> : vector<2xf32>
    %330 = vector.multi_reduction <add>, %329, %cst_138 [1] : vector<2x4xf32> to vector<2xf32>
    %331 = vector.shape_cast %330 : vector<2xf32> to vector<2x1xf32>
    %332 = vector.broadcast %331 : vector<2x1xf32> to vector<2x4xf32>
    %333 = arith.divf %329, %332 : vector<2x4xf32>
    %c0_i32_139 = arith.constant 0 : i32
    %334 = tpu.memref_slice %arg24[%c0_i32_139] : memref<2x!tpu.dma_semaphore, #tpu.memory_space<semaphore_mem>> -> memref<1x!tpu.dma_semaphore, #tpu.memory_space<semaphore_mem>>
    %335 = tpu.memref_squeeze %334 : memref<1x!tpu.dma_semaphore, #tpu.memory_space<semaphore_mem>> -> memref<!tpu.dma_semaphore, #tpu.memory_space<semaphore_mem>>
    tpu.wait_dma2 semaphore(%335 : memref<!tpu.dma_semaphore, #tpu.memory_space<semaphore_mem>>) src(%arg0 : memref<50x1792xf32, #tpu.memory_space<any>>) dst(%arg21 : memref<50x1792xf32, #tpu.memory_space<vmem>>)
    %c1_i32_140 = arith.constant 1 : i32
    %336 = tpu.memref_slice %arg24[%c1_i32_140] : memref<2x!tpu.dma_semaphore, #tpu.memory_space<semaphore_mem>> -> memref<1x!tpu.dma_semaphore, #tpu.memory_space<semaphore_mem>>
    %337 = tpu.memref_squeeze %336 : memref<1x!tpu.dma_semaphore, #tpu.memory_space<semaphore_mem>> -> memref<!tpu.dma_semaphore, #tpu.memory_space<semaphore_mem>>
    tpu.wait_dma2 semaphore(%337 : memref<!tpu.dma_semaphore, #tpu.memory_space<semaphore_mem>>) src(%arg1 : memref<1792x128xf32, #tpu.memory_space<any>>) dst(%arg22 : memref<1792x128xf32, #tpu.memory_space<vmem>>)
    %c0_141 = arith.constant 0 : index
    %c0_142 = arith.constant 0 : index
    %338 = vector.load %arg21[%c0_141, %c0_142] : memref<50x1792xf32, #tpu.memory_space<vmem>>, vector<50x1792xf32>
    %c0_143 = arith.constant 0 : index
    %c0_144 = arith.constant 0 : index
    %339 = vector.load %arg22[%c0_143, %c0_144] : memref<1792x128xf32, #tpu.memory_space<vmem>>, vector<1792x128xf32>
    %cst_145 = arith.constant dense<0.000000e+00> : vector<50x128xf32>
    %340 = tpu.matmul %338, %339, %cst_145 {dimension_numbers = #tpu.dot_dimension_numbers<[1], [0], [0], [1], [0, 0, 1, 1], [], []>} : vector<50x1792xf32>, vector<1792x128xf32>, vector<50x128xf32> -> vector<50x128xf32>
    %c0_146 = arith.constant 0 : index
    %c0_147 = arith.constant 0 : index
    %341 = vector.load %arg2[%c0_146, %c0_147] : memref<1x1xf32, #tpu.memory_space<vmem>>, vector<1x1xf32>
    %342 = vector.broadcast %341 : vector<1x1xf32> to vector<50x128xf32>
    %343 = arith.addf %340, %342 : vector<50x128xf32>
    %344 = tpu.iota {dimensions = array<i32: 0>} : vector<128x128xi32>
    %345 = tpu.iota {dimensions = array<i32: 1>} : vector<128x128xi32>
    %346 = tpu.iota {dimensions = array<i32: 0>} : vector<50x50xi32>
    %347 = tpu.iota {dimensions = array<i32: 1>} : vector<50x50xi32>
    %c1_i32_148 = arith.constant 1 : i32
    %348 = vector.broadcast %c1_i32_148 : i32 to vector<128x128xi32>
    %349 = arith.addi %345, %348 : vector<128x128xi32>
    %350 = arith.cmpi eq, %344, %349 : vector<128x128xi32>
    %351 = arith.extui %350 : vector<128x128xi1> to vector<128x128xi32>
    %352 = arith.sitofp %351 : vector<128x128xi32> to vector<128x128xf32>
    %cst_149 = arith.constant dense<0.000000e+00> : vector<50x128xf32>
    %353 = tpu.matmul %343, %352, %cst_149 {dimension_numbers = #tpu.dot_dimension_numbers<[1], [0], [0], [1], [0, 0, 1, 1], [], []>} : vector<50x128xf32>, vector<128x128xf32>, vector<50x128xf32> -> vector<50x128xf32>
    %354 = arith.maximumf %343, %353 : vector<50x128xf32>
    %c2_i32 = arith.constant 2 : i32
    %355 = vector.broadcast %c2_i32 : i32 to vector<128x128xi32>
    %356 = arith.addi %345, %355 : vector<128x128xi32>
    %357 = arith.cmpi eq, %344, %356 : vector<128x128xi32>
    %358 = arith.extui %357 : vector<128x128xi1> to vector<128x128xi32>
    %359 = arith.sitofp %358 : vector<128x128xi32> to vector<128x128xf32>
    %cst_150 = arith.constant dense<0.000000e+00> : vector<50x128xf32>
    %360 = tpu.matmul %343, %359, %cst_150 {dimension_numbers = #tpu.dot_dimension_numbers<[1], [0], [0], [1], [0, 0, 1, 1], [], []>} : vector<50x128xf32>, vector<128x128xf32>, vector<50x128xf32> -> vector<50x128xf32>
    %361 = arith.maximumf %354, %360 : vector<50x128xf32>
    %c3_i32 = arith.constant 3 : i32
    %362 = vector.broadcast %c3_i32 : i32 to vector<128x128xi32>
    %363 = arith.addi %345, %362 : vector<128x128xi32>
    %364 = arith.cmpi eq, %344, %363 : vector<128x128xi32>
    %365 = arith.extui %364 : vector<128x128xi1> to vector<128x128xi32>
    %366 = arith.sitofp %365 : vector<128x128xi32> to vector<128x128xf32>
    %cst_151 = arith.constant dense<0.000000e+00> : vector<50x128xf32>
    %367 = tpu.matmul %343, %366, %cst_151 {dimension_numbers = #tpu.dot_dimension_numbers<[1], [0], [0], [1], [0, 0, 1, 1], [], []>} : vector<50x128xf32>, vector<128x128xf32>, vector<50x128xf32> -> vector<50x128xf32>
    %368 = arith.maximumf %361, %367 : vector<50x128xf32>
    %c4_i32 = arith.constant 4 : i32
    %369 = vector.broadcast %c4_i32 : i32 to vector<128x128xi32>
    %370 = arith.addi %345, %369 : vector<128x128xi32>
    %371 = arith.cmpi eq, %344, %370 : vector<128x128xi32>
    %372 = arith.extui %371 : vector<128x128xi1> to vector<128x128xi32>
    %373 = arith.sitofp %372 : vector<128x128xi32> to vector<128x128xf32>
    %cst_152 = arith.constant dense<0.000000e+00> : vector<50x128xf32>
    %374 = tpu.matmul %343, %373, %cst_152 {dimension_numbers = #tpu.dot_dimension_numbers<[1], [0], [0], [1], [0, 0, 1, 1], [], []>} : vector<50x128xf32>, vector<128x128xf32>, vector<50x128xf32> -> vector<50x128xf32>
    %375 = arith.maximumf %368, %374 : vector<50x128xf32>
    %c1_i32_153 = arith.constant 1 : i32
    %376 = vector.broadcast %c1_i32_153 : i32 to vector<50x50xi32>
    %377 = arith.addi %346, %376 : vector<50x50xi32>
    %378 = arith.cmpi eq, %347, %377 : vector<50x50xi32>
    %379 = arith.extui %378 : vector<50x50xi1> to vector<50x50xi32>
    %380 = arith.sitofp %379 : vector<50x50xi32> to vector<50x50xf32>
    %cst_154 = arith.constant dense<0.000000e+00> : vector<50x128xf32>
    %381 = tpu.matmul %380, %375, %cst_154 {dimension_numbers = #tpu.dot_dimension_numbers<[1], [0], [0], [1], [0, 0, 1, 1], [], []>} : vector<50x50xf32>, vector<50x128xf32>, vector<50x128xf32> -> vector<50x128xf32>
    %382 = arith.maximumf %375, %381 : vector<50x128xf32>
    %c2_i32_155 = arith.constant 2 : i32
    %383 = vector.broadcast %c2_i32_155 : i32 to vector<50x50xi32>
    %384 = arith.addi %346, %383 : vector<50x50xi32>
    %385 = arith.cmpi eq, %347, %384 : vector<50x50xi32>
    %386 = arith.extui %385 : vector<50x50xi1> to vector<50x50xi32>
    %387 = arith.sitofp %386 : vector<50x50xi32> to vector<50x50xf32>
    %cst_156 = arith.constant dense<0.000000e+00> : vector<50x128xf32>
    %388 = tpu.matmul %387, %375, %cst_156 {dimension_numbers = #tpu.dot_dimension_numbers<[1], [0], [0], [1], [0, 0, 1, 1], [], []>} : vector<50x50xf32>, vector<50x128xf32>, vector<50x128xf32> -> vector<50x128xf32>
    %389 = arith.maximumf %382, %388 : vector<50x128xf32>
    %c3_i32_157 = arith.constant 3 : i32
    %390 = vector.broadcast %c3_i32_157 : i32 to vector<50x50xi32>
    %391 = arith.addi %346, %390 : vector<50x50xi32>
    %392 = arith.cmpi eq, %347, %391 : vector<50x50xi32>
    %393 = arith.extui %392 : vector<50x50xi1> to vector<50x50xi32>
    %394 = arith.sitofp %393 : vector<50x50xi32> to vector<50x50xf32>
    %cst_158 = arith.constant dense<0.000000e+00> : vector<50x128xf32>
    %395 = tpu.matmul %394, %375, %cst_158 {dimension_numbers = #tpu.dot_dimension_numbers<[1], [0], [0], [1], [0, 0, 1, 1], [], []>} : vector<50x50xf32>, vector<50x128xf32>, vector<50x128xf32> -> vector<50x128xf32>
    %396 = arith.maximumf %389, %395 : vector<50x128xf32>
    %c4_i32_159 = arith.constant 4 : i32
    %397 = vector.broadcast %c4_i32_159 : i32 to vector<50x50xi32>
    %398 = arith.addi %346, %397 : vector<50x50xi32>
    %399 = arith.cmpi eq, %347, %398 : vector<50x50xi32>
    %400 = arith.extui %399 : vector<50x50xi1> to vector<50x50xi32>
    %401 = arith.sitofp %400 : vector<50x50xi32> to vector<50x50xf32>
    %cst_160 = arith.constant dense<0.000000e+00> : vector<50x128xf32>
    %402 = tpu.matmul %401, %375, %cst_160 {dimension_numbers = #tpu.dot_dimension_numbers<[1], [0], [0], [1], [0, 0, 1, 1], [], []>} : vector<50x50xf32>, vector<50x128xf32>, vector<50x128xf32> -> vector<50x128xf32>
    %403 = arith.maximumf %396, %402 : vector<50x128xf32>
    %c0_161 = arith.constant 0 : index
    %c0_162 = arith.constant 0 : index
    %404 = vector.load %arg14[%c0_161, %c0_162] : memref<128x128xf32, #tpu.memory_space<vmem>>, vector<128x128xf32>
    %cst_163 = arith.constant dense<0.000000e+00> : vector<50x128xf32>
    %405 = tpu.matmul %403, %404, %cst_163 {dimension_numbers = #tpu.dot_dimension_numbers<[1], [0], [0], [1], [0, 0, 1, 1], [], []>} : vector<50x128xf32>, vector<128x128xf32>, vector<50x128xf32> -> vector<50x128xf32>
    %c0_164 = arith.constant 0 : index
    %c0_165 = arith.constant 0 : index
    %406 = vector.load %arg16[%c0_164, %c0_165] : memref<2x50xf32, #tpu.memory_space<vmem>>, vector<2x50xf32>
    %c0_166 = arith.constant 0 : index
    %c0_167 = arith.constant 0 : index
    %407 = vector.load %arg15[%c0_166, %c0_167] : memref<50x128xf32, #tpu.memory_space<vmem>>, vector<50x128xf32>
    %408 = arith.mulf %405, %407 : vector<50x128xf32>
    %cst_168 = arith.constant dense<0.000000e+00> : vector<2x128xf32>
    %409 = tpu.matmul %406, %408, %cst_168 {dimension_numbers = #tpu.dot_dimension_numbers<[1], [0], [0], [1], [0, 0, 1, 1], [], []>} : vector<2x50xf32>, vector<50x128xf32>, vector<2x128xf32> -> vector<2x128xf32>
    %c0_169 = arith.constant 0 : index
    %c0_170 = arith.constant 0 : index
    %410 = vector.load %arg17[%c0_169, %c0_170] : memref<128x4xf32, #tpu.memory_space<vmem>>, vector<128x4xf32>
    %cst_171 = arith.constant dense<0.000000e+00> : vector<2x4xf32>
    %411 = tpu.matmul %409, %410, %cst_171 {dimension_numbers = #tpu.dot_dimension_numbers<[1], [0], [0], [1], [0, 0, 1, 1], [], []>} : vector<2x128xf32>, vector<128x4xf32>, vector<2x4xf32> -> vector<2x4xf32>
    %c0_172 = arith.constant 0 : index
    %c0_173 = arith.constant 0 : index
    %412 = vector.load %arg18[%c0_172, %c0_173] : memref<4x4xf32, #tpu.memory_space<vmem>>, vector<4x4xf32>
    %cst_174 = arith.constant dense<0.000000e+00> : vector<2x4xf32>
    %413 = tpu.matmul %333, %412, %cst_174 {dimension_numbers = #tpu.dot_dimension_numbers<[1], [0], [0], [1], [0, 0, 1, 1], [], []>} : vector<2x4xf32>, vector<4x4xf32>, vector<2x4xf32> -> vector<2x4xf32>
    %414 = arith.addf %411, %413 : vector<2x4xf32>
    %c0_175 = arith.constant 0 : index
    %c0_176 = arith.constant 0 : index
    %415 = vector.load %arg19[%c0_175, %c0_176] : memref<1x4xf32, #tpu.memory_space<vmem>>, vector<1x4xf32>
    %416 = vector.broadcast %415 : vector<1x4xf32> to vector<2x4xf32>
    %417 = arith.addf %414, %416 : vector<2x4xf32>
    %c0_177 = arith.constant 0 : index
    %c0_178 = arith.constant 0 : index
    %418 = vector.load %arg20[%c0_177, %c0_178] : memref<2x4xf32, #tpu.memory_space<vmem>>, vector<2x4xf32>
    tpu.vector_store %arg20[%c0_177, %c0_178], %417 {strides = array<i32>} : memref<2x4xf32, #tpu.memory_space<vmem>>, vector<2x4xf32>,
    return
  }
}

</mosaic_0001>

<bundles_post_ra>
// kernel: almodel_forward.1
= control target key start
LH: loop header
LB: loop body
LE: loop exit
PB: predicated region body
PF: predicated region fallthrough
CT: control target
= control target key end

     0   :  { %s9429_s0 = inlined_call_operand.vmem [shape: f32[50,1792], index: 0, kind: input, shape index: {}]   ;;  %s9430_s1 = inlined_call_operand.vmem [shape: f32[1792,128], index: 1, kind: input, shape index: {}]   ;;  %s9431_s2 = inlined_call_operand.<no memory space> [shape: f32[1,1], index: 2, kind: input, shape index: {}]   ;;  %s9432_s3 = inlined_call_operand.vmem [shape: f32[16,16], index: 3, kind: input, shape index: {}]   ;;  %s9433_s4 = inlined_call_operand.vmem [shape: f32[16,8], index: 4, kind: input, shape index: {}]   ;;  %s9434_s5 = inlined_call_operand.vmem [shape: f32[1,8], index: 5, kind: input, shape index: {}]   ;;  %s9435_s6 = inlined_call_operand.vmem [shape: f32[16,16], index: 6, kind: input, shape index: {}]   ;;  %s9436_s7 = inlined_call_operand.vmem [shape: f32[16,1], index: 7, kind: input, shape index: {}]   ;;  %s9437_s8 = inlined_call_operand.vmem [shape: f32[16,1], index: 8, kind: input, shape index: {}]   ;;  %s9438_s9 = inlined_call_operand.vmem [shape: f32[8,128], index: 9, kind: input, shape index: {}]   ;;  %s9439_s10 = inlined_call_operand.vmem [shape: f32[32,128], index: 10, kind: input, shape index: {}]   ;;  %s9440_s11 = inlined_call_operand.vmem [shape: f32[1,128], index: 11, kind: input, shape index: {}]   ;;  %s9441_s12 = inlined_call_operand.vmem [shape: f32[32,4], index: 12, kind: input, shape index: {}]   ;;  %s9442_s13 = inlined_call_operand.vmem [shape: f32[1,4], index: 13, kind: input, shape index: {}]   ;;  %s9443_s14 = inlined_call_operand.vmem [shape: f32[128,128], index: 14, kind: input, shape index: {}]   ;;  %s9444_s15 = inlined_call_operand.vmem [shape: f32[50,128], index: 15, kind: input, shape index: {}]   ;;  %s9445_s16 = inlined_call_operand.vmem [shape: f32[2,50], index: 16, kind: input, shape index: {}]   ;;  %s9446_s17 = inlined_call_operand.vmem [shape: f32[128,4], index: 17, kind: input, shape index: {}]   ;;  %s9447_s18 = inlined_call_operand.vmem [shape: f32[4,4], index: 18, kind: input, shape index: {}]   ;;  %s9448_s19 = inlined_call_operand.vmem [shape: f32[1,4], index: 19, kind: input, shape index: {}]   ;;  %s9449_s20 = inlined_call_operand.hbm [shape: f32[2,4], index: 20, kind: output, shape index: {}]  }
   0x1   :  { %9483 = sst [smem:[#allocation198_spill]] %s9429_s0 }
   0x2   :  { %9484 = sst [smem:[#allocation199_spill]] %s9430_s1 }
   0x3   :  { %9485 = sst [smem:[#allocation200_spill]] %s9431_s2 }
   0x4   :  { %9486 = sst [smem:[#allocation201_spill]] %s9432_s3 }
   0x5   :  { %9487 = sst [smem:[#allocation202_spill]] %s9433_s4 }
   0x6   :  { %s9488_s23 = sld [smem:[#allocation200_spill]] }
   0xc   :  { %v25_v0 = vstv %s9488_s23 }
   0xd   :  { %26 = vst [vmem:[#allocation6] sm:$0x1] %v25_v0 }
   0xe   :  { %27 = vsyncpa [#allocation8], 0  ;;  %s9489_s25 = sld [smem:[#allocation198_spill]] }
  0x14   :  { %v97_v1 = vld [vmem:[%s9489_s25] sm:$0xff]  ;;  %v99_v2 = vld [vmem:[%s9489_s25 + $0x8] sm:$0xff]  ;;  %v101_v3 = vld [vmem:[%s9489_s25 + $0x10] sm:$0xff] }
  0x15   :  { %98 = vst [vmem:[#allocation2 + $0x2b0] sm:$0xff] %v97_v1  ;;  %100 = vst [vmem:[#allocation2 + $0xd0] sm:$0xff] %v99_v2  ;;  %v103_v4 = vld [vmem:[%s9489_s25 + $0x18] sm:$0xff]  ;;  %v105_v5 = vld [vmem:[%s9489_s25 + $0x20] sm:$0xff] }
  0x16   :  { %102 = vst [vmem:[#allocation2 + $0x10] sm:$0xff] %v101_v3  ;;  %104 = vst [vmem:[#allocation2 + $0x48] sm:$0xff] %v103_v4  ;;  %v107_v6 = vld [vmem:[%s9489_s25 + $0x28] sm:$0xff]  ;;  %v109_v7 = vld [vmem:[%s9489_s25 + $0x30] sm:$0xff] }
  0x17   :  { %106 = vst [vmem:[#allocation2 + $0x30] sm:$0xff] %v105_v5  ;;  %v111_v8 = vld [vmem:[%s9489_s25 + $0x38] sm:$0xff]  ;;  %108 = vst [vmem:[#allocation2 + $0xf0] sm:$0xff] %v107_v6  ;;  %v113_v9 = vld [vmem:[%s9489_s25 + $0x40] sm:$0xff] }
  0x18   :  { %110 = vst [vmem:[#allocation2 + $0xf8] sm:$0xff] %v109_v7  ;;  %112 = vst [vmem:[#allocation2 + $0x78] sm:$0xff] %v111_v8  ;;  %v115_v10 = vld [vmem:[%s9489_s25 + $0x48] sm:$0xff]  ;;  %v117_v11 = vld [vmem:[%s9489_s25 + $0x50] sm:$0xff] }
  0x19   :  { %114 = vst [vmem:[#allocation2 + $0x300] sm:$0xff] %v113_v9  ;;  %116 = vst [vmem:[#allocation2 + $0x130] sm:$0xff] %v115_v10  ;;  %v119_v12 = vld [vmem:[%s9489_s25 + $0x58] sm:$0xff]  ;;  %v121_v13 = vld [vmem:[%s9489_s25 + $0x60] sm:$0xff] }
  0x1a   :  { %118 = vst [vmem:[#allocation2 + $0xe8] sm:$0xff] %v117_v11  ;;  %v123_v14 = vld [vmem:[%s9489_s25 + $0x68] sm:$0xff]  ;;  %120 = vst [vmem:[#allocation2 + $0x40] sm:$0xff] %v119_v12  ;;  %v125_v15 = vld [vmem:[%s9489_s25 + $0x70] sm:$0xff] }
  0x1b   :  { %122 = vst [vmem:[#allocation2 + $0x2c0] sm:$0xff] %v121_v13  ;;  %124 = vst [vmem:[#allocation2 + $0x2a8] sm:$0xff] %v123_v14  ;;  %v127_v16 = vld [vmem:[%s9489_s25 + $0x78] sm:$0xff]  ;;  %v129_v17 = vld [vmem:[%s9489_s25 + $0x80] sm:$0xff] }
  0x1c   :  { %126 = vst [vmem:[#allocation2 + $0x170] sm:$0xff] %v125_v15  ;;  %128 = vst [vmem:[#allocation2 + $0x180] sm:$0xff] %v127_v16  ;;  %v131_v18 = vld [vmem:[%s9489_s25 + $0x88] sm:$0xff]  ;;  %v133_v19 = vld [vmem:[%s9489_s25 + $0x90] sm:$0xff] }
  0x1d   :  { %130 = vst [vmem:[#allocation2 + $0x18] sm:$0xff] %v129_v17  ;;  %v135_v20 = vld [vmem:[%s9489_s25 + $0x98] sm:$0xff]  ;;  %132 = vst [vmem:[#allocation2 + $0x2b8] sm:$0xff] %v131_v18  ;;  %v137_v21 = vld [vmem:[%s9489_s25 + $0xa0] sm:$0xff] }
  0x1e   :  { %134 = vst [vmem:[#allocation2 + $0x250] sm:$0xff] %v133_v19  ;;  %136 = vst [vmem:[#allocation2 + $0x28] sm:$0xff] %v135_v20  ;;  %v139_v22 = vld [vmem:[%s9489_s25 + $0xa8] sm:$0xff]  ;;  %v141_v23 = vld [vmem:[%s9489_s25 + $0xb0] sm:$0xff] }
  0x1f   :  { %138 = vst [vmem:[#allocation2 + $0x70] sm:$0xff] %v137_v21  ;;  %140 = vst [vmem:[#allocation2 + $0x230] sm:$0xff] %v139_v22  ;;  %v143_v24 = vld [vmem:[%s9489_s25 + $0xb8] sm:$0xff]  ;;  %v145_v25 = vld [vmem:[%s9489_s25 + $0xc0] sm:$0xff] }
  0x20   :  { %142 = vst [vmem:[#allocation2 + $0xb0] sm:$0xff] %v141_v23  ;;  %v147_v26 = vld [vmem:[%s9489_s25 + $0xc8] sm:$0xff]  ;;  %144 = vst [vmem:[#allocation2 + $0x100] sm:$0xff] %v143_v24  ;;  %v149_v27 = vld [vmem:[%s9489_s25 + $0xd0] sm:$0xff] }
  0x21   :  { %146 = vst [vmem:[#allocation2 + $0x1b8] sm:$0xff] %v145_v25  ;;  %148 = vst [vmem:[#allocation2 + $0x228] sm:$0xff] %v147_v26  ;;  %v151_v28 = vld [vmem:[%s9489_s25 + $0xd8] sm:$0xff]  ;;  %v153_v29 = vld [vmem:[%s9489_s25 + $0xe0] sm:$0xff] }
  0x22   :  { %150 = vst [vmem:[#allocation2 + $0x260] sm:$0xff] %v149_v27  ;;  %152 = vst [vmem:[#allocation2 + $0x240] sm:$0xff] %v151_v28  ;;  %v155_v30 = vld [vmem:[%s9489_s25 + $0xe8] sm:$0xff]  ;;  %v157_v31 = vld [vmem:[%s9489_s25 + $0xf0] sm:$0xff] }
  0x23   :  { %154 = vst [vmem:[#allocation2 + $0x138] sm:$0xff] %v153_v29  ;;  %v159_v32 = vld [vmem:[%s9489_s25 + $0xf8] sm:$0xff]  ;;  %156 = vst [vmem:[#allocation2 + $0x160] sm:$0xff] %v155_v30  ;;  %v161_v33 = vld [vmem:[%s9489_s25 + $0x100] sm:$0xff] }
  0x24   :  { %158 = vst [vmem:[#allocation2 + $0xa0] sm:$0xff] %v157_v31  ;;  %160 = vst [vmem:[#allocation2 + $0x2e8] sm:$0xff] %v159_v32  ;;  %v163_v34 = vld [vmem:[%s9489_s25 + $0x108] sm:$0xff]  ;;  %v165_v35 = vld [vmem:[%s9489_s25 + $0x110] sm:$0xff] }
  0x25   :  { %162 = vst [vmem:[#allocation2 + $0x1b0] sm:$0xff] %v161_v33  ;;  %164 = vst [vmem:[#allocation2 + $0x1c0] sm:$0xff] %v163_v34  ;;  %v167_v36 = vld [vmem:[%s9489_s25 + $0x118] sm:$0xff]  ;;  %v169_v37 = vld [vmem:[%s9489_s25 + $0x120] sm:$0xff] }
  0x26   :  { %166 = vst [vmem:[#allocation2 + $0x88] sm:$0xff] %v165_v35  ;;  %v171_v38 = vld [vmem:[%s9489_s25 + $0x128] sm:$0xff]  ;;  %168 = vst [vmem:[#allocation2 + $0x190] sm:$0xff] %v167_v36  ;;  %v173_v39 = vld [vmem:[%s9489_s25 + $0x130] sm:$0xff] }
  0x27   :  { %170 = vst [vmem:[#allocation2 + $0x210] sm:$0xff] %v169_v37  ;;  %172 = vst [vmem:[#allocation2 + $0x80] sm:$0xff] %v171_v38  ;;  %v175_v40 = vld [vmem:[%s9489_s25 + $0x138] sm:$0xff]  ;;  %v177_v41 = vld [vmem:[%s9489_s25 + $0x140] sm:$0xff] }
  0x28   :  { %174 = vst [vmem:[#allocation2 + $0x198] sm:$0xff] %v173_v39  ;;  %176 = vst [vmem:[#allocation2 + $0x220] sm:$0xff] %v175_v40  ;;  %v179_v42 = vld [vmem:[%s9489_s25 + $0x148] sm:$0xff]  ;;  %v181_v43 = vld [vmem:[%s9489_s25 + $0x150] sm:$0xff] }
  0x29   :  { %178 = vst [vmem:[#allocation2 + $0x258] sm:$0xff] %v177_v41  ;;  %v183_v44 = vld [vmem:[%s9489_s25 + $0x158] sm:$0xff]  ;;  %180 = vst [vmem:[#allocation2 + $0x1d0] sm:$0xff] %v179_v42  ;;  %v185_v45 = vld [vmem:[%s9489_s25 + $0x160] sm:$0xff] }
  0x2a   :  { %182 = vst [vmem:[#allocation2 + $0x288] sm:$0xff] %v181_v43  ;;  %184 = vst [vmem:[#allocation2 + $0x108] sm:$0xff] %v183_v44  ;;  %v187_v46 = vld [vmem:[%s9489_s25 + $0x168] sm:$0xff]  ;;  %v189_v47 = vld [vmem:[%s9489_s25 + $0x170] sm:$0xff] }
  0x2b   :  { %186 = vst [vmem:[#allocation2 + $0xc0] sm:$0xff] %v185_v45  ;;  %188 = vst [vmem:[#allocation2 + $0x290] sm:$0xff] %v187_v46  ;;  %v191_v48 = vld [vmem:[%s9489_s25 + $0x178] sm:$0xff]  ;;  %v193_v49 = vld [vmem:[%s9489_s25 + $0x180] sm:$0xff] }
  0x2c   :  { %190 = vst [vmem:[#allocation2 + $0x308] sm:$0xff] %v189_v47  ;;  %v195_v50 = vld [vmem:[%s9489_s25 + $0x188] sm:$0xff]  ;;  %192 = vst [vmem:[#allocation2] sm:$0xff] %v191_v48  ;;  %v197_v51 = vld [vmem:[%s9489_s25 + $0x190] sm:$0xff] }
  0x2d   :  { %194 = vst [vmem:[#allocation2 + $0xe0] sm:$0xff] %v193_v49  ;;  %196 = vst [vmem:[#allocation2 + $0x98] sm:$0xff] %v195_v50  ;;  %v199_v52 = vld [vmem:[%s9489_s25 + $0x198] sm:$0xff]  ;;  %v201_v53 = vld [vmem:[%s9489_s25 + $0x1a0] sm:$0xff] }
  0x2e   :  { %198 = vst [vmem:[#allocation2 + $0x1f8] sm:$0xff] %v197_v51  ;;  %200 = vst [vmem:[#allocation2 + $0x2e0] sm:$0xff] %v199_v52  ;;  %v203_v54 = vld [vmem:[%s9489_s25 + $0x1a8] sm:$0xff]  ;;  %v205_v55 = vld [vmem:[%s9489_s25 + $0x1b0] sm:$0xff] }
  0x2f   :  { %202 = vst [vmem:[#allocation2 + $0x200] sm:$0xff] %v201_v53  ;;  %v207_v56 = vld [vmem:[%s9489_s25 + $0x1b8] sm:$0xff]  ;;  %204 = vst [vmem:[#allocation2 + $0x2f0] sm:$0xff] %v203_v54  ;;  %v209_v57 = vld [vmem:[%s9489_s25 + $0x1c0] sm:$0xff] }
  0x30   :  { %206 = vst [vmem:[#allocation2 + $0x8] sm:$0xff] %v205_v55  ;;  %208 = vst [vmem:[#allocation2 + $0x268] sm:$0xff] %v207_v56  ;;  %v211_v58 = vld [vmem:[%s9489_s25 + $0x1c8] sm:$0xff]  ;;  %v213_v59 = vld [vmem:[%s9489_s25 + $0x1d0] sm:$0xff] }
  0x31   :  { %210 = vst [vmem:[#allocation2 + $0x2c8] sm:$0xff] %v209_v57  ;;  %212 = vst [vmem:[#allocation2 + $0x148] sm:$0xff] %v211_v58  ;;  %v215_v60 = vld [vmem:[%s9489_s25 + $0x1d8] sm:$0xff]  ;;  %v217_v61 = vld [vmem:[%s9489_s25 + $0x1e0] sm:$0xff] }
  0x32   :  { %214 = vst [vmem:[#allocation2 + $0x68] sm:$0xff] %v213_v59  ;;  %v219_v62 = vld [vmem:[%s9489_s25 + $0x1e8] sm:$0xff]  ;;  %216 = vst [vmem:[#allocation2 + $0x188] sm:$0xff] %v215_v60  ;;  %v221_v63 = vld [vmem:[%s9489_s25 + $0x1f0] sm:$0xff] }
  0x33   :  { %218 = vst [vmem:[#allocation2 + $0x158] sm:$0xff] %v217_v61  ;;  %220 = vst [vmem:[#allocation2 + $0x1a0] sm:$0xff] %v219_v62  ;;  %v223_v0 = vld [vmem:[%s9489_s25 + $0x1f8] sm:$0xff]  ;;  %v225_v1 = vld [vmem:[%s9489_s25 + $0x200] sm:$0xff] }
  0x34   :  { %222 = vst [vmem:[#allocation2 + $0x90] sm:$0xff] %v221_v63  ;;  %224 = vst [vmem:[#allocation2 + $0x118] sm:$0xff] %v223_v0  ;;  %v227_v2 = vld [vmem:[%s9489_s25 + $0x208] sm:$0xff]  ;;  %v229_v3 = vld [vmem:[%s9489_s25 + $0x210] sm:$0xff] }
  0x35   :  { %226 = vst [vmem:[#allocation2 + $0x208] sm:$0xff] %v225_v1  ;;  %v231_v4 = vld [vmem:[%s9489_s25 + $0x218] sm:$0xff]  ;;  %228 = vst [vmem:[#allocation2 + $0xb8] sm:$0xff] %v227_v2  ;;  %v233_v5 = vld [vmem:[%s9489_s25 + $0x220] sm:$0xff] }
  0x36   :  { %230 = vst [vmem:[#allocation2 + $0x238] sm:$0xff] %v229_v3  ;;  %232 = vst [vmem:[#allocation2 + $0x150] sm:$0xff] %v231_v4  ;;  %v235_v6 = vld [vmem:[%s9489_s25 + $0x228] sm:$0xff]  ;;  %v237_v7 = vld [vmem:[%s9489_s25 + $0x230] sm:$0xff] }
  0x37   :  { %234 = vst [vmem:[#allocation2 + $0x248] sm:$0xff] %v233_v5  ;;  %236 = vst [vmem:[#allocation2 + $0x2d0] sm:$0xff] %v235_v6  ;;  %v239_v8 = vld [vmem:[%s9489_s25 + $0x238] sm:$0xff]  ;;  %v241_v9 = vld [vmem:[%s9489_s25 + $0x240] sm:$0xff] }
  0x38   :  { %238 = vst [vmem:[#allocation2 + $0x280] sm:$0xff] %v237_v7  ;;  %v243_v10 = vld [vmem:[%s9489_s25 + $0x248] sm:$0xff]  ;;  %240 = vst [vmem:[#allocation2 + $0x2a0] sm:$0xff] %v239_v8  ;;  %v245_v11 = vld [vmem:[%s9489_s25 + $0x250] sm:$0xff] }
  0x39   :  { %242 = vst [vmem:[#allocation2 + $0x110] sm:$0xff] %v241_v9  ;;  %244 = vst [vmem:[#allocation2 + $0x58] sm:$0xff] %v243_v10  ;;  %v247_v12 = vld [vmem:[%s9489_s25 + $0x258] sm:$0xff]  ;;  %v249_v13 = vld [vmem:[%s9489_s25 + $0x260] sm:$0xff] }
  0x3a   :  { %246 = vst [vmem:[#allocation2 + $0x1f0] sm:$0xff] %v245_v11  ;;  %248 = vst [vmem:[#allocation2 + $0x1c8] sm:$0xff] %v247_v12  ;;  %v251_v14 = vld [vmem:[%s9489_s25 + $0x268] sm:$0xff]  ;;  %v253_v15 = vld [vmem:[%s9489_s25 + $0x270] sm:$0xff] }
  0x3b   :  { %250 = vst [vmem:[#allocation2 + $0x2d8] sm:$0xff] %v249_v13  ;;  %v255_v16 = vld [vmem:[%s9489_s25 + $0x278] sm:$0xff]  ;;  %252 = vst [vmem:[#allocation2 + $0x1e0] sm:$0xff] %v251_v14  ;;  %v257_v17 = vld [vmem:[%s9489_s25 + $0x280] sm:$0xff] }
  0x3c   :  { %254 = vst [vmem:[#allocation2 + $0x1d8] sm:$0xff] %v253_v15  ;;  %256 = vst [vmem:[#allocation2 + $0xd8] sm:$0xff] %v255_v16  ;;  %v259_v18 = vld [vmem:[%s9489_s25 + $0x288] sm:$0xff]  ;;  %v261_v19 = vld [vmem:[%s9489_s25 + $0x290] sm:$0xff] }
  0x3d   :  { %258 = vst [vmem:[#allocation2 + $0x298] sm:$0xff] %v257_v17  ;;  %260 = vst [vmem:[#allocation2 + $0x20] sm:$0xff] %v259_v18  ;;  %v263_v20 = vld [vmem:[%s9489_s25 + $0x298] sm:$0xff]  ;;  %v265_v21 = vld [vmem:[%s9489_s25 + $0x2a0] sm:$0xff] }
  0x3e   :  { %262 = vst [vmem:[#allocation2 + $0xa8] sm:$0xff] %v261_v19  ;;  %v267_v22 = vld [vmem:[%s9489_s25 + $0x2a8] sm:$0xff]  ;;  %264 = vst [vmem:[#allocation2 + $0x38] sm:$0xff] %v263_v20  ;;  %v269_v23 = vld [vmem:[%s9489_s25 + $0x2b0] sm:$0xff] }
  0x3f   :  { %266 = vst [vmem:[#allocation2 + $0x178] sm:$0xff] %v265_v21  ;;  %268 = vst [vmem:[#allocation2 + $0x50] sm:$0xff] %v267_v22  ;;  %v271_v24 = vld [vmem:[%s9489_s25 + $0x2b8] sm:$0xff]  ;;  %v273_v25 = vld [vmem:[%s9489_s25 + $0x2c0] sm:$0xff] }
  0x40   :  { %270 = vst [vmem:[#allocation2 + $0x120] sm:$0xff] %v269_v23  ;;  %272 = vst [vmem:[#allocation2 + $0xc8] sm:$0xff] %v271_v24  ;;  %v275_v26 = vld [vmem:[%s9489_s25 + $0x2c8] sm:$0xff]  ;;  %v277_v27 = vld [vmem:[%s9489_s25 + $0x2d0] sm:$0xff] }
  0x41   :  { %274 = vst [vmem:[#allocation2 + $0x1e8] sm:$0xff] %v273_v25  ;;  %v279_v28 = vld [vmem:[%s9489_s25 + $0x2d8] sm:$0xff]  ;;  %276 = vst [vmem:[#allocation2 + $0x2f8] sm:$0xff] %v275_v26  ;;  %v281_v29 = vld [vmem:[%s9489_s25 + $0x2e0] sm:$0xff] }
  0x42   :  { %278 = vst [vmem:[#allocation2 + $0x270] sm:$0xff] %v277_v27  ;;  %280 = vst [vmem:[#allocation2 + $0x278] sm:$0xff] %v279_v28  ;;  %v283_v30 = vld [vmem:[%s9489_s25 + $0x2e8] sm:$0xff]  ;;  %v285_v31 = vld [vmem:[%s9489_s25 + $0x2f0] sm:$0xff] }
  0x43   :  { %282 = vst [vmem:[#allocation2 + $0x140] sm:$0xff] %v281_v29  ;;  %284 = vst [vmem:[#allocation2 + $0x128] sm:$0xff] %v283_v30  ;;  %v287_v32 = vld [vmem:[%s9489_s25 + $0x2f8] sm:$0xff]  ;;  %v289_v33 = vld [vmem:[%s9489_s25 + $0x300] sm:$0xff] }
  0x44   :  { %286 = vst [vmem:[#allocation2 + $0x60] sm:$0xff] %v285_v31  ;;  %v291_v34 = vld [vmem:[%s9489_s25 + $0x308] sm:$0xff]  ;;  %288 = vst [vmem:[#allocation2 + $0x1a8] sm:$0xff] %v287_v32 }
  0x45   :  { %290 = vst [vmem:[#allocation2 + $0x168] sm:$0xff] %v289_v33  ;;  %292 = vst [vmem:[#allocation2 + $0x218] sm:$0xff] %v291_v34 }
  0x46   :  { %300 = vsyncadd [#allocation5], 12544  ;;  %s9490_s3 = sld [smem:[#allocation199_spill]] }
  0x4c   :  { %v6779_v35 = vld [vmem:[%s9490_s3] sm:$0xff]  ;;  %v6784_v36 = vld [vmem:[%s9490_s3 + $0x8] sm:$0xff]  ;;  %v6789_v37 = vld [vmem:[%s9490_s3 + $0x10] sm:$0xff] }
  0x4d   :  { %9491 = vst [vmem:[#allocation14_spill] sm:$0xff] %v6779_v35  ;;  %9492 = vst [vmem:[#allocation15_spill] sm:$0xff] %v6784_v36  ;;  %v6794_v38 = vld [vmem:[%s9490_s3 + $0x18] sm:$0xff]  ;;  %v6799_v39 = vld [vmem:[%s9490_s3 + $0x20] sm:$0xff] }
  0x4e   :  { %9493 = vst [vmem:[#allocation16_spill] sm:$0xff] %v6789_v37  ;;  %9494 = vst [vmem:[#allocation17_spill] sm:$0xff] %v6794_v38  ;;  %v6804_v40 = vld [vmem:[%s9490_s3 + $0x28] sm:$0xff]  ;;  %v6809_v41 = vld [vmem:[%s9490_s3 + $0x30] sm:$0xff] }
  0x4f   :  { %9495 = vst [vmem:[#allocation18_spill] sm:$0xff] %v6799_v39  ;;  %9496 = vst [vmem:[#allocation19_spill] sm:$0xff] %v6804_v40  ;;  %v6814_v42 = vld [vmem:[%s9490_s3 + $0x38] sm:$0xff]  ;;  %v6819_v43 = vld [vmem:[%s9490_s3 + $0x40] sm:$0xff] }
  0x50   :  { %v6824_v44 = vld [vmem:[%s9490_s3 + $0x48] sm:$0xff]  ;;  %v6829_v45 = vld [vmem:[%s9490_s3 + $0x50] sm:$0xff]  ;;  %v6834_v46 = vld [vmem:[%s9490_s3 + $0x58] sm:$0xff] }
  0x51   :  { %v6839_v47 = vld [vmem:[%s9490_s3 + $0x60] sm:$0xff]  ;;  %v6844_v48 = vld [vmem:[%s9490_s3 + $0x68] sm:$0xff]  ;;  %v6849_v49 = vld [vmem:[%s9490_s3 + $0x70] sm:$0xff] }
  0x52   :  { %v6854_v50 = vld [vmem:[%s9490_s3 + $0x78] sm:$0xff]  ;;  %v6859_v51 = vld [vmem:[%s9490_s3 + $0x80] sm:$0xff]  ;;  %v6864_v52 = vld [vmem:[%s9490_s3 + $0x88] sm:$0xff] }
  0x53   :  { %9497 = vst [vmem:[#allocation20_spill] sm:$0xff] %v6859_v51  ;;  %9498 = vst [vmem:[#allocation21_spill] sm:$0xff] %v6864_v52  ;;  %v6869_v53 = vld [vmem:[%s9490_s3 + $0x90] sm:$0xff]  ;;  %v6874_v54 = vld [vmem:[%s9490_s3 + $0x98] sm:$0xff] }
  0x54   :  { %9499 = vst [vmem:[#allocation22_spill] sm:$0xff] %v6869_v53  ;;  %9500 = vst [vmem:[#allocation23_spill] sm:$0xff] %v6874_v54  ;;  %v6879_v55 = vld [vmem:[%s9490_s3 + $0xa0] sm:$0xff]  ;;  %v6884_v56 = vld [vmem:[%s9490_s3 + $0xa8] sm:$0xff] }
  0x55   :  { %9501 = vst [vmem:[#allocation24_spill] sm:$0xff] %v6879_v55  ;;  %v6889_v57 = vld [vmem:[%s9490_s3 + $0xb0] sm:$0xff]  ;;  %v6894_v58 = vld [vmem:[%s9490_s3 + $0xb8] sm:$0xff]  ;;  %v6899_v59 = vld [vmem:[%s9490_s3 + $0xc0] sm:$0xff] }
  0x56   :  { %v6904_v60 = vld [vmem:[%s9490_s3 + $0xc8] sm:$0xff]  ;;  %v6909_v61 = vld [vmem:[%s9490_s3 + $0xd0] sm:$0xff]  ;;  %v6914_v62 = vld [vmem:[%s9490_s3 + $0xd8] sm:$0xff] }
  0x57   :  { %v6919_v63 = vld [vmem:[%s9490_s3 + $0xe0] sm:$0xff]  ;;  %v6924_v0 = vld [vmem:[%s9490_s3 + $0xe8] sm:$0xff]  ;;  %v6929_v1 = vld [vmem:[%s9490_s3 + $0xf0] sm:$0xff] }
  0x58   :  { %v6934_v2 = vld [vmem:[%s9490_s3 + $0xf8] sm:$0xff]  ;;  %v6939_v3 = vld [vmem:[%s9490_s3 + $0x100] sm:$0xff]  ;;  %v6944_v4 = vld [vmem:[%s9490_s3 + $0x108] sm:$0xff] }
  0x59   :  { %9502 = vst [vmem:[#allocation25_spill] sm:$0xff] %v6939_v3  ;;  %9503 = vst [vmem:[#allocation26_spill] sm:$0xff] %v6944_v4  ;;  %v6949_v5 = vld [vmem:[%s9490_s3 + $0x110] sm:$0xff]  ;;  %v6954_v6 = vld [vmem:[%s9490_s3 + $0x118] sm:$0xff] }
  0x5a   :  { %9504 = vst [vmem:[#allocation27_spill] sm:$0xff] %v6949_v5  ;;  %9505 = vst [vmem:[#allocation28_spill] sm:$0xff] %v6954_v6  ;;  %v6959_v7 = vld [vmem:[%s9490_s3 + $0x120] sm:$0xff]  ;;  %v6964_v8 = vld [vmem:[%s9490_s3 + $0x128] sm:$0xff] }
  0x5b   :  { %9506 = vst [vmem:[#allocation29_spill] sm:$0xff] %v6959_v7  ;;  %9507 = vst [vmem:[#allocation30_spill] sm:$0xff] %v6964_v8  ;;  %v6969_v9 = vld [vmem:[%s9490_s3 + $0x130] sm:$0xff]  ;;  %v6974_v10 = vld [vmem:[%s9490_s3 + $0x138] sm:$0xff] }
  0x5c   :  { %v6979_v11 = vld [vmem:[%s9490_s3 + $0x140] sm:$0xff]  ;;  %v6984_v12 = vld [vmem:[%s9490_s3 + $0x148] sm:$0xff]  ;;  %v6989_v13 = vld [vmem:[%s9490_s3 + $0x150] sm:$0xff] }
  0x5d   :  { %v6994_v14 = vld [vmem:[%s9490_s3 + $0x158] sm:$0xff]  ;;  %v6999_v15 = vld [vmem:[%s9490_s3 + $0x160] sm:$0xff]  ;;  %v7004_v16 = vld [vmem:[%s9490_s3 + $0x168] sm:$0xff] }
  0x5e   :  { %v7009_v17 = vld [vmem:[%s9490_s3 + $0x170] sm:$0xff]  ;;  %v7014_v18 = vld [vmem:[%s9490_s3 + $0x178] sm:$0xff]  ;;  %v7019_v19 = vld [vmem:[%s9490_s3 + $0x180] sm:$0xff] }
  0x5f   :  { %9508 = vst [vmem:[#allocation31_spill] sm:$0xff] %v7019_v19  ;;  %v7024_v20 = vld [vmem:[%s9490_s3 + $0x188] sm:$0xff]  ;;  %v7029_v21 = vld [vmem:[%s9490_s3 + $0x190] sm:$0xff]  ;;  %v7034_v22 = vld [vmem:[%s9490_s3 + $0x198] sm:$0xff] }
  0x60   :  { %9509 = vst [vmem:[#allocation32_spill] sm:$0xff] %v7024_v20  ;;  %9510 = vst [vmem:[#allocation33_spill] sm:$0xff] %v7029_v21  ;;  %v7039_v23 = vld [vmem:[%s9490_s3 + $0x1a0] sm:$0xff]  ;;  %v7044_v24 = vld [vmem:[%s9490_s3 + $0x1a8] sm:$0xff] }
  0x61   :  { %9511 = vst [vmem:[#allocation34_spill] sm:$0xff] %v7034_v22  ;;  %9512 = vst [vmem:[#allocation35_spill] sm:$0xff] %v7039_v23  ;;  %v7049_v25 = vld [vmem:[%s9490_s3 + $0x1b0] sm:$0xff]  ;;  %v7054_v26 = vld [vmem:[%s9490_s3 + $0x1b8] sm:$0xff] }
  0x62   :  { %9513 = vst [vmem:[#allocation36_spill] sm:$0xff] %v7044_v24  ;;  %v7059_v27 = vld [vmem:[%s9490_s3 + $0x1c0] sm:$0xff]  ;;  %v7064_v28 = vld [vmem:[%s9490_s3 + $0x1c8] sm:$0xff]  ;;  %v7069_v29 = vld [vmem:[%s9490_s3 + $0x1d0] sm:$0xff] }
  0x63   :  { %v7074_v30 = vld [vmem:[%s9490_s3 + $0x1d8] sm:$0xff]  ;;  %v7079_v31 = vld [vmem:[%s9490_s3 + $0x1e0] sm:$0xff]  ;;  %v7084_v32 = vld [vmem:[%s9490_s3 + $0x1e8] sm:$0xff] }
  0x64   :  { %v7089_v33 = vld [vmem:[%s9490_s3 + $0x1f0] sm:$0xff]  ;;  %v7094_v34 = vld [vmem:[%s9490_s3 + $0x1f8] sm:$0xff]  ;;  %v7099_v3 = vld [vmem:[%s9490_s3 + $0x200] sm:$0xff] }
  0x65   :  { %9514 = vst [vmem:[#allocation37_spill] sm:$0xff] %v7099_v3  ;;  %v7104_v19 = vld [vmem:[%s9490_s3 + $0x208] sm:$0xff]  ;;  %v7109_v35 = vld [vmem:[%s9490_s3 + $0x210] sm:$0xff]  ;;  %v7114_v4 = vld [vmem:[%s9490_s3 + $0x218] sm:$0xff] }
  0x66   :  { %9515 = vst [vmem:[#allocation38_spill] sm:$0xff] %v7104_v19  ;;  %9516 = vst [vmem:[#allocation39_spill] sm:$0xff] %v7109_v35  ;;  %v7119_v51 = vld [vmem:[%s9490_s3 + $0x220] sm:$0xff]  ;;  %v7124_v3 = vld [vmem:[%s9490_s3 + $0x228] sm:$0xff] }
  0x67   :  { %9517 = vst [vmem:[#allocation40_spill] sm:$0xff] %v7114_v4  ;;  %9518 = vst [vmem:[#allocation41_spill] sm:$0xff] %v7119_v51  ;;  %v7129_v19 = vld [vmem:[%s9490_s3 + $0x230] sm:$0xff]  ;;  %v7134_v35 = vld [vmem:[%s9490_s3 + $0x238] sm:$0xff] }
  0x68   :  { %9519 = vst [vmem:[#allocation42_spill] sm:$0xff] %v7124_v3  ;;  %9520 = vst [vmem:[#allocation43_spill] sm:$0xff] %v7129_v19  ;;  %v7139_v4 = vld [vmem:[%s9490_s3 + $0x240] sm:$0xff]  ;;  %v7144_v51 = vld [vmem:[%s9490_s3 + $0x248] sm:$0xff] }
  0x69   :  { %9521 = vst [vmem:[#allocation44_spill] sm:$0xff] %v7134_v35  ;;  %9522 = vst [vmem:[#allocation45_spill] sm:$0xff] %v7139_v4  ;;  %v7149_v3 = vld [vmem:[%s9490_s3 + $0x250] sm:$0xff]  ;;  %v7154_v19 = vld [vmem:[%s9490_s3 + $0x258] sm:$0xff] }
  0x6a   :  { %9523 = vst [vmem:[#allocation46_spill] sm:$0xff] %v7144_v51  ;;  %9524 = vst [vmem:[#allocation47_spill] sm:$0xff] %v7149_v3  ;;  %v7159_v35 = vld [vmem:[%s9490_s3 + $0x260] sm:$0xff]  ;;  %v7164_v4 = vld [vmem:[%s9490_s3 + $0x268] sm:$0xff] }
  0x6b   :  { %9525 = vst [vmem:[#allocation48_spill] sm:$0xff] %v7154_v19  ;;  %9526 = vst [vmem:[#allocation49_spill] sm:$0xff] %v7159_v35  ;;  %v7169_v51 = vld [vmem:[%s9490_s3 + $0x270] sm:$0xff]  ;;  %v7174_v3 = vld [vmem:[%s9490_s3 + $0x278] sm:$0xff] }
  0x6c   :  { %9527 = vst [vmem:[#allocation50_spill] sm:$0xff] %v7164_v4  ;;  %9528 = vst [vmem:[#allocation51_spill] sm:$0xff] %v7169_v51  ;;  %v7179_v19 = vld [vmem:[%s9490_s3 + $0x280] sm:$0xff]  ;;  %v7184_v35 = vld [vmem:[%s9490_s3 + $0x288] sm:$0xff] }
  0x6d   :  { %9529 = vst [vmem:[#allocation52_spill] sm:$0xff] %v7174_v3  ;;  %9530 = vst [vmem:[#allocation53_spill] sm:$0xff] %v7179_v19  ;;  %v7189_v4 = vld [vmem:[%s9490_s3 + $0x290] sm:$0xff]  ;;  %v7194_v51 = vld [vmem:[%s9490_s3 + $0x298] sm:$0xff] }
  0x6e   :  { %9531 = vst [vmem:[#allocation54_spill] sm:$0xff] %v7184_v35  ;;  %9532 = vst [vmem:[#allocation55_spill] sm:$0xff] %v7189_v4  ;;  %v7199_v3 = vld [vmem:[%s9490_s3 + $0x2a0] sm:$0xff]  ;;  %v7204_v19 = vld [vmem:[%s9490_s3 + $0x2a8] sm:$0xff] }
  0x6f   :  { %9533 = vst [vmem:[#allocation56_spill] sm:$0xff] %v7194_v51  ;;  %9534 = vst [vmem:[#allocation57_spill] sm:$0xff] %v7199_v3  ;;  %v7209_v35 = vld [vmem:[%s9490_s3 + $0x2b0] sm:$0xff]  ;;  %v7214_v4 = vld [vmem:[%s9490_s3 + $0x2b8] sm:$0xff] }
  0x70   :  { %9535 = vst [vmem:[#allocation58_spill] sm:$0xff] %v7204_v19  ;;  %9536 = vst [vmem:[#allocation59_spill] sm:$0xff] %v7209_v35  ;;  %v7219_v51 = vld [vmem:[%s9490_s3 + $0x2c0] sm:$0xff]  ;;  %v7224_v3 = vld [vmem:[%s9490_s3 + $0x2c8] sm:$0xff] }
  0x71   :  { %9537 = vst [vmem:[#allocation60_spill] sm:$0xff] %v7214_v4  ;;  %9538 = vst [vmem:[#allocation61_spill] sm:$0xff] %v7219_v51  ;;  %v7229_v19 = vld [vmem:[%s9490_s3 + $0x2d0] sm:$0xff]  ;;  %v7234_v35 = vld [vmem:[%s9490_s3 + $0x2d8] sm:$0xff] }
  0x72   :  { %9539 = vst [vmem:[#allocation62_spill] sm:$0xff] %v7224_v3  ;;  %9540 = vst [vmem:[#allocation63_spill] sm:$0xff] %v7229_v19  ;;  %v7239_v4 = vld [vmem:[%s9490_s3 + $0x2e0] sm:$0xff]  ;;  %v7244_v51 = vld [vmem:[%s9490_s3 + $0x2e8] sm:$0xff] }
  0x73   :  { %9541 = vst [vmem:[#allocation64_spill] sm:$0xff] %v7234_v35  ;;  %9542 = vst [vmem:[#allocation65_spill] sm:$0xff] %v7239_v4  ;;  %v7249_v3 = vld [vmem:[%s9490_s3 + $0x2f0] sm:$0xff]  ;;  %v7254_v19 = vld [vmem:[%s9490_s3 + $0x2f8] sm:$0xff] }
  0x74   :  { %9543 = vst [vmem:[#allocation66_spill] sm:$0xff] %v7244_v51  ;;  %9544 = vst [vmem:[#allocation67_spill] sm:$0xff] %v7249_v3  ;;  %v7259_v35 = vld [vmem:[%s9490_s3 + $0x300] sm:$0xff]  ;;  %v7264_v4 = vld [vmem:[%s9490_s3 + $0x308] sm:$0xff] }
  0x75   :  { %9545 = vst [vmem:[#allocation68_spill] sm:$0xff] %v7254_v19  ;;  %9546 = vst [vmem:[#allocation69_spill] sm:$0xff] %v7259_v35  ;;  %v7269_v51 = vld [vmem:[%s9490_s3 + $0x310] sm:$0xff]  ;;  %v7274_v3 = vld [vmem:[%s9490_s3 + $0x318] sm:$0xff] }
  0x76   :  { %9547 = vst [vmem:[#allocation70_spill] sm:$0xff] %v7264_v4  ;;  %9548 = vst [vmem:[#allocation71_spill] sm:$0xff] %v7269_v51  ;;  %v7279_v19 = vld [vmem:[%s9490_s3 + $0x320] sm:$0xff]  ;;  %v7284_v35 = vld [vmem:[%s9490_s3 + $0x328] sm:$0xff] }
  0x77   :  { %9549 = vst [vmem:[#allocation72_spill] sm:$0xff] %v7274_v3  ;;  %9550 = vst [vmem:[#allocation73_spill] sm:$0xff] %v7279_v19  ;;  %v7289_v4 = vld [vmem:[%s9490_s3 + $0x330] sm:$0xff]  ;;  %v7294_v51 = vld [vmem:[%s9490_s3 + $0x338] sm:$0xff] }
  0x78   :  { %9551 = vst [vmem:[#allocation74_spill] sm:$0xff] %v7284_v35  ;;  %9552 = vst [vmem:[#allocation75_spill] sm:$0xff] %v7289_v4  ;;  %v7299_v3 = vld [vmem:[%s9490_s3 + $0x340] sm:$0xff]  ;;  %v7304_v19 = vld [vmem:[%s9490_s3 + $0x348] sm:$0xff] }
  0x79   :  { %9553 = vst [vmem:[#allocation76_spill] sm:$0xff] %v7294_v51  ;;  %9554 = vst [vmem:[#allocation77_spill] sm:$0xff] %v7299_v3  ;;  %v7309_v35 = vld [vmem:[%s9490_s3 + $0x350] sm:$0xff]  ;;  %v7314_v4 = vld [vmem:[%s9490_s3 + $0x358] sm:$0xff] }
  0x7a   :  { %9555 = vst [vmem:[#allocation78_spill] sm:$0xff] %v7304_v19  ;;  %9556 = vst [vmem:[#allocation79_spill] sm:$0xff] %v7309_v35  ;;  %v7319_v51 = vld [vmem:[%s9490_s3 + $0x360] sm:$0xff]  ;;  %v7324_v3 = vld [vmem:[%s9490_s3 + $0x368] sm:$0xff] }
  0x7b   :  { %9557 = vst [vmem:[#allocation80_spill] sm:$0xff] %v7314_v4  ;;  %9558 = vst [vmem:[#allocation81_spill] sm:$0xff] %v7319_v51  ;;  %v7329_v19 = vld [vmem:[%s9490_s3 + $0x370] sm:$0xff]  ;;  %v7334_v35 = vld [vmem:[%s9490_s3 + $0x378] sm:$0xff] }
  0x7c   :  { %9559 = vst [vmem:[#allocation82_spill] sm:$0xff] %v7324_v3  ;;  %9560 = vst [vmem:[#allocation83_spill] sm:$0xff] %v7329_v19  ;;  %v7339_v4 = vld [vmem:[%s9490_s3 + $0x380] sm:$0xff]  ;;  %v7344_v51 = vld [vmem:[%s9490_s3 + $0x388] sm:$0xff] }
  0x7d   :  { %9561 = vst [vmem:[#allocation84_spill] sm:$0xff] %v7334_v35  ;;  %9562 = vst [vmem:[#allocation85_spill] sm:$0xff] %v7339_v4  ;;  %v7349_v3 = vld [vmem:[%s9490_s3 + $0x390] sm:$0xff]  ;;  %v7354_v19 = vld [vmem:[%s9490_s3 + $0x398] sm:$0xff] }
  0x7e   :  { %9563 = vst [vmem:[#allocation86_spill] sm:$0xff] %v7344_v51  ;;  %9564 = vst [vmem:[#allocation87_spill] sm:$0xff] %v7349_v3  ;;  %v7359_v35 = vld [vmem:[%s9490_s3 + $0x3a0] sm:$0xff]  ;;  %v7364_v4 = vld [vmem:[%s9490_s3 + $0x3a8] sm:$0xff] }
  0x7f   :  { %9565 = vst [vmem:[#allocation88_spill] sm:$0xff] %v7354_v19  ;;  %9566 = vst [vmem:[#allocation89_spill] sm:$0xff] %v7359_v35  ;;  %v7369_v51 = vld [vmem:[%s9490_s3 + $0x3b0] sm:$0xff]  ;;  %v7374_v3 = vld [vmem:[%s9490_s3 + $0x3b8] sm:$0xff] }
  0x80   :  { %9567 = vst [vmem:[#allocation90_spill] sm:$0xff] %v7364_v4  ;;  %9568 = vst [vmem:[#allocation91_spill] sm:$0xff] %v7369_v51  ;;  %v7379_v19 = vld [vmem:[%s9490_s3 + $0x3c0] sm:$0xff]  ;;  %v7384_v35 = vld [vmem:[%s9490_s3 + $0x3c8] sm:$0xff] }
  0x81   :  { %9569 = vst [vmem:[#allocation92_spill] sm:$0xff] %v7374_v3  ;;  %9570 = vst [vmem:[#allocation93_spill] sm:$0xff] %v7379_v19  ;;  %v7389_v4 = vld [vmem:[%s9490_s3 + $0x3d0] sm:$0xff]  ;;  %v7394_v51 = vld [vmem:[%s9490_s3 + $0x3d8] sm:$0xff] }
  0x82   :  { %9571 = vst [vmem:[#allocation94_spill] sm:$0xff] %v7384_v35  ;;  %9572 = vst [vmem:[#allocation95_spill] sm:$0xff] %v7389_v4  ;;  %v7399_v3 = vld [vmem:[%s9490_s3 + $0x3e0] sm:$0xff]  ;;  %v7404_v19 = vld [vmem:[%s9490_s3 + $0x3e8] sm:$0xff] }
  0x83   :  { %9573 = vst [vmem:[#allocation96_spill] sm:$0xff] %v7394_v51  ;;  %9574 = vst [vmem:[#allocation97_spill] sm:$0xff] %v7399_v3  ;;  %v7409_v35 = vld [vmem:[%s9490_s3 + $0x3f0] sm:$0xff]  ;;  %v7414_v4 = vld [vmem:[%s9490_s3 + $0x3f8] sm:$0xff] }
  0x84   :  { %9575 = vst [vmem:[#allocation98_spill] sm:$0xff] %v7404_v19  ;;  %9576 = vst [vmem:[#allocation99_spill] sm:$0xff] %v7409_v35  ;;  %v7419_v51 = vld [vmem:[%s9490_s3 + $0x400] sm:$0xff]  ;;  %v7424_v3 = vld [vmem:[%s9490_s3 + $0x408] sm:$0xff] }
  0x85   :  { %9577 = vst [vmem:[#allocation100_spill] sm:$0xff] %v7414_v4  ;;  %9578 = vst [vmem:[#allocation101_spill] sm:$0xff] %v7419_v51  ;;  %v7429_v19 = vld [vmem:[%s9490_s3 + $0x410] sm:$0xff]  ;;  %v7434_v35 = vld [vmem:[%s9490_s3 + $0x418] sm:$0xff] }
  0x86   :  { %9579 = vst [vmem:[#allocation102_spill] sm:$0xff] %v7424_v3  ;;  %9580 = vst [vmem:[#allocation103_spill] sm:$0xff] %v7429_v19  ;;  %v7439_v4 = vld [vmem:[%s9490_s3 + $0x420] sm:$0xff]  ;;  %v7444_v51 = vld [vmem:[%s9490_s3 + $0x428] sm:$0xff] }
  0x87   :  { %9581 = vst [vmem:[#allocation104_spill] sm:$0xff] %v7434_v35  ;;  %9582 = vst [vmem:[#allocation105_spill] sm:$0xff] %v7439_v4  ;;  %v7449_v3 = vld [vmem:[%s9490_s3 + $0x430] sm:$0xff]  ;;  %v7454_v19 = vld [vmem:[%s9490_s3 + $0x438] sm:$0xff] }
  0x88   :  { %9583 = vst [vmem:[#allocation106_spill] sm:$0xff] %v7444_v51  ;;  %9584 = vst [vmem:[#allocation107_spill] sm:$0xff] %v7449_v3  ;;  %v7459_v35 = vld [vmem:[%s9490_s3 + $0x440] sm:$0xff]  ;;  %v7464_v4 = vld [vmem:[%s9490_s3 + $0x448] sm:$0xff] }
  0x89   :  { %9585 = vst [vmem:[#allocation108_spill] sm:$0xff] %v7454_v19  ;;  %9586 = vst [vmem:[#allocation109_spill] sm:$0xff] %v7459_v35  ;;  %v7469_v51 = vld [vmem:[%s9490_s3 + $0x450] sm:$0xff]  ;;  %v7474_v3 = vld [vmem:[%s9490_s3 + $0x458] sm:$0xff] }
  0x8a   :  { %9587 = vst [vmem:[#allocation110_spill] sm:$0xff] %v7464_v4  ;;  %9588 = vst [vmem:[#allocation111_spill] sm:$0xff] %v7469_v51  ;;  %v7479_v19 = vld [vmem:[%s9490_s3 + $0x460] sm:$0xff]  ;;  %v7484_v35 = vld [vmem:[%s9490_s3 + $0x468] sm:$0xff] }
  0x8b   :  { %9589 = vst [vmem:[#allocation112_spill] sm:$0xff] %v7474_v3  ;;  %9590 = vst [vmem:[#allocation113_spill] sm:$0xff] %v7479_v19  ;;  %v7489_v4 = vld [vmem:[%s9490_s3 + $0x470] sm:$0xff]  ;;  %v7494_v51 = vld [vmem:[%s9490_s3 + $0x478] sm:$0xff] }
  0x8c   :  { %9591 = vst [vmem:[#allocation114_spill] sm:$0xff] %v7484_v35  ;;  %9592 = vst [vmem:[#allocation115_spill] sm:$0xff] %v7489_v4  ;;  %v7499_v3 = vld [vmem:[%s9490_s3 + $0x480] sm:$0xff]  ;;  %v7504_v19 = vld [vmem:[%s9490_s3 + $0x488] sm:$0xff] }
  0x8d   :  { %9593 = vst [vmem:[#allocation116_spill] sm:$0xff] %v7494_v51  ;;  %9594 = vst [vmem:[#allocation117_spill] sm:$0xff] %v7499_v3  ;;  %v7509_v35 = vld [vmem:[%s9490_s3 + $0x490] sm:$0xff]  ;;  %v7514_v4 = vld [vmem:[%s9490_s3 + $0x498] sm:$0xff] }
  0x8e   :  { %9595 = vst [vmem:[#allocation118_spill] sm:$0xff] %v7504_v19  ;;  %9596 = vst [vmem:[#allocation119_spill] sm:$0xff] %v7509_v35  ;;  %v7519_v51 = vld [vmem:[%s9490_s3 + $0x4a0] sm:$0xff]  ;;  %v7524_v3 = vld [vmem:[%s9490_s3 + $0x4a8] sm:$0xff] }
  0x8f   :  { %9597 = vst [vmem:[#allocation120_spill] sm:$0xff] %v7514_v4  ;;  %9598 = vst [vmem:[#allocation121_spill] sm:$0xff] %v7519_v51  ;;  %v7529_v19 = vld [vmem:[%s9490_s3 + $0x4b0] sm:$0xff]  ;;  %v7534_v35 = vld [vmem:[%s9490_s3 + $0x4b8] sm:$0xff] }
  0x90   :  { %9599 = vst [vmem:[#allocation122_spill] sm:$0xff] %v7524_v3  ;;  %9600 = vst [vmem:[#allocation123_spill] sm:$0xff] %v7529_v19  ;;  %v7539_v4 = vld [vmem:[%s9490_s3 + $0x4c0] sm:$0xff]  ;;  %v7544_v51 = vld [vmem:[%s9490_s3 + $0x4c8] sm:$0xff] }
  0x91   :  { %9601 = vst [vmem:[#allocation124_spill] sm:$0xff] %v7534_v35  ;;  %9602 = vst [vmem:[#allocation125_spill] sm:$0xff] %v7539_v4  ;;  %v7549_v3 = vld [vmem:[%s9490_s3 + $0x4d0] sm:$0xff]  ;;  %v7554_v19 = vld [vmem:[%s9490_s3 + $0x4d8] sm:$0xff] }
  0x92   :  { %9603 = vst [vmem:[#allocation126_spill] sm:$0xff] %v7544_v51  ;;  %9604 = vst [vmem:[#allocation127_spill] sm:$0xff] %v7549_v3  ;;  %v7559_v35 = vld [vmem:[%s9490_s3 + $0x4e0] sm:$0xff]  ;;  %v7564_v4 = vld [vmem:[%s9490_s3 + $0x4e8] sm:$0xff] }
  0x93   :  { %9605 = vst [vmem:[#allocation128_spill] sm:$0xff] %v7554_v19  ;;  %9606 = vst [vmem:[#allocation129_spill] sm:$0xff] %v7559_v35  ;;  %v7569_v51 = vld [vmem:[%s9490_s3 + $0x4f0] sm:$0xff]  ;;  %v7574_v3 = vld [vmem:[%s9490_s3 + $0x4f8] sm:$0xff] }
  0x94   :  { %9607 = vst [vmem:[#allocation130_spill] sm:$0xff] %v7564_v4  ;;  %9608 = vst [vmem:[#allocation131_spill] sm:$0xff] %v7569_v51  ;;  %v7579_v19 = vld [vmem:[%s9490_s3 + $0x500] sm:$0xff]  ;;  %v7584_v35 = vld [vmem:[%s9490_s3 + $0x508] sm:$0xff] }
  0x95   :  { %9609 = vst [vmem:[#allocation132_spill] sm:$0xff] %v7574_v3  ;;  %9610 = vst [vmem:[#allocation133_spill] sm:$0xff] %v7579_v19  ;;  %v7589_v4 = vld [vmem:[%s9490_s3 + $0x510] sm:$0xff]  ;;  %v7594_v51 = vld [vmem:[%s9490_s3 + $0x518] sm:$0xff] }
  0x96   :  { %9611 = vst [vmem:[#allocation134_spill] sm:$0xff] %v7584_v35  ;;  %9612 = vst [vmem:[#allocation135_spill] sm:$0xff] %v7589_v4  ;;  %v7599_v3 = vld [vmem:[%s9490_s3 + $0x520] sm:$0xff]  ;;  %v7604_v19 = vld [vmem:[%s9490_s3 + $0x528] sm:$0xff] }
  0x97   :  { %9613 = vst [vmem:[#allocation136_spill] sm:$0xff] %v7594_v51  ;;  %9614 = vst [vmem:[#allocation137_spill] sm:$0xff] %v7599_v3  ;;  %v7609_v35 = vld [vmem:[%s9490_s3 + $0x530] sm:$0xff]  ;;  %v7614_v4 = vld [vmem:[%s9490_s3 + $0x538] sm:$0xff] }
  0x98   :  { %9615 = vst [vmem:[#allocation138_spill] sm:$0xff] %v7604_v19  ;;  %9616 = vst [vmem:[#allocation139_spill] sm:$0xff] %v7609_v35  ;;  %v7619_v51 = vld [vmem:[%s9490_s3 + $0x540] sm:$0xff]  ;;  %v7624_v3 = vld [vmem:[%s9490_s3 + $0x548] sm:$0xff] }
  0x99   :  { %9617 = vst [vmem:[#allocation140_spill] sm:$0xff] %v7614_v4  ;;  %9618 = vst [vmem:[#allocation141_spill] sm:$0xff] %v7619_v51  ;;  %v7629_v19 = vld [vmem:[%s9490_s3 + $0x550] sm:$0xff]  ;;  %v7634_v35 = vld [vmem:[%s9490_s3 + $0x558] sm:$0xff] }
  0x9a   :  { %9619 = vst [vmem:[#allocation142_spill] sm:$0xff] %v7624_v3  ;;  %9620 = vst [vmem:[#allocation143_spill] sm:$0xff] %v7629_v19  ;;  %v7639_v4 = vld [vmem:[%s9490_s3 + $0x560] sm:$0xff]  ;;  %v7644_v51 = vld [vmem:[%s9490_s3 + $0x568] sm:$0xff] }
  0x9b   :  { %9621 = vst [vmem:[#allocation144_spill] sm:$0xff] %v7634_v35  ;;  %9622 = vst [vmem:[#allocation145_spill] sm:$0xff] %v7639_v4  ;;  %v7649_v3 = vld [vmem:[%s9490_s3 + $0x570] sm:$0xff]  ;;  %v7654_v19 = vld [vmem:[%s9490_s3 + $0x578] sm:$0xff] }
  0x9c   :  { %9623 = vst [vmem:[#allocation146_spill] sm:$0xff] %v7644_v51  ;;  %9624 = vst [vmem:[#allocation147_spill] sm:$0xff] %v7649_v3  ;;  %v7659_v35 = vld [vmem:[%s9490_s3 + $0x580] sm:$0xff]  ;;  %v7664_v4 = vld [vmem:[%s9490_s3 + $0x588] sm:$0xff] }
  0x9d   :  { %9625 = vst [vmem:[#allocation148_spill] sm:$0xff] %v7654_v19  ;;  %9626 = vst [vmem:[#allocation149_spill] sm:$0xff] %v7659_v35  ;;  %v7669_v51 = vld [vmem:[%s9490_s3 + $0x590] sm:$0xff]  ;;  %v7674_v3 = vld [vmem:[%s9490_s3 + $0x598] sm:$0xff] }
  0x9e   :  { %9627 = vst [vmem:[#allocation150_spill] sm:$0xff] %v7664_v4  ;;  %9628 = vst [vmem:[#allocation151_spill] sm:$0xff] %v7669_v51  ;;  %v7679_v19 = vld [vmem:[%s9490_s3 + $0x5a0] sm:$0xff]  ;;  %v7684_v35 = vld [vmem:[%s9490_s3 + $0x5a8] sm:$0xff] }
  0x9f   :  { %9629 = vst [vmem:[#allocation152_spill] sm:$0xff] %v7674_v3  ;;  %9630 = vst [vmem:[#allocation153_spill] sm:$0xff] %v7679_v19  ;;  %v7689_v4 = vld [vmem:[%s9490_s3 + $0x5b0] sm:$0xff]  ;;  %v7694_v51 = vld [vmem:[%s9490_s3 + $0x5b8] sm:$0xff] }
  0xa0   :  { %9631 = vst [vmem:[#allocation154_spill] sm:$0xff] %v7684_v35  ;;  %9632 = vst [vmem:[#allocation155_spill] sm:$0xff] %v7689_v4  ;;  %v7699_v3 = vld [vmem:[%s9490_s3 + $0x5c0] sm:$0xff]  ;;  %v7704_v19 = vld [vmem:[%s9490_s3 + $0x5c8] sm:$0xff] }
  0xa1   :  { %9633 = vst [vmem:[#allocation156_spill] sm:$0xff] %v7694_v51  ;;  %9634 = vst [vmem:[#allocation157_spill] sm:$0xff] %v7699_v3  ;;  %v7709_v35 = vld [vmem:[%s9490_s3 + $0x5d0] sm:$0xff]  ;;  %v7714_v4 = vld [vmem:[%s9490_s3 + $0x5d8] sm:$0xff] }
  0xa2   :  { %9635 = vst [vmem:[#allocation158_spill] sm:$0xff] %v7704_v19  ;;  %9636 = vst [vmem:[#allocation159_spill] sm:$0xff] %v7709_v35  ;;  %v7719_v51 = vld [vmem:[%s9490_s3 + $0x5e0] sm:$0xff]  ;;  %v7724_v3 = vld [vmem:[%s9490_s3 + $0x5e8] sm:$0xff] }
  0xa3   :  { %9637 = vst [vmem:[#allocation160_spill] sm:$0xff] %v7714_v4  ;;  %9638 = vst [vmem:[#allocation161_spill] sm:$0xff] %v7719_v51  ;;  %v7729_v19 = vld [vmem:[%s9490_s3 + $0x5f0] sm:$0xff]  ;;  %v7734_v35 = vld [vmem:[%s9490_s3 + $0x5f8] sm:$0xff] }
  0xa4   :  { %9639 = vst [vmem:[#allocation162_spill] sm:$0xff] %v7724_v3  ;;  %9640 = vst [vmem:[#allocation163_spill] sm:$0xff] %v7729_v19  ;;  %v7739_v4 = vld [vmem:[%s9490_s3 + $0x600] sm:$0xff]  ;;  %v7744_v51 = vld [vmem:[%s9490_s3 + $0x608] sm:$0xff] }
  0xa5   :  { %9641 = vst [vmem:[#allocation164_spill] sm:$0xff] %v7734_v35  ;;  %9642 = vst [vmem:[#allocation165_spill] sm:$0xff] %v7739_v4  ;;  %v7749_v3 = vld [vmem:[%s9490_s3 + $0x610] sm:$0xff]  ;;  %v7754_v19 = vld [vmem:[%s9490_s3 + $0x618] sm:$0xff] }
  0xa6   :  { %9643 = vst [vmem:[#allocation166_spill] sm:$0xff] %v7744_v51  ;;  %9644 = vst [vmem:[#allocation167_spill] sm:$0xff] %v7749_v3  ;;  %v7759_v35 = vld [vmem:[%s9490_s3 + $0x620] sm:$0xff]  ;;  %v7764_v4 = vld [vmem:[%s9490_s3 + $0x628] sm:$0xff] }
  0xa7   :  { %9645 = vst [vmem:[#allocation168_spill] sm:$0xff] %v7754_v19  ;;  %9646 = vst [vmem:[#allocation169_spill] sm:$0xff] %v7759_v35  ;;  %v7769_v51 = vld [vmem:[%s9490_s3 + $0x630] sm:$0xff]  ;;  %v7774_v3 = vld [vmem:[%s9490_s3 + $0x638] sm:$0xff] }
  0xa8   :  { %9647 = vst [vmem:[#allocation170_spill] sm:$0xff] %v7764_v4  ;;  %9648 = vst [vmem:[#allocation171_spill] sm:$0xff] %v7769_v51  ;;  %v7779_v19 = vld [vmem:[%s9490_s3 + $0x640] sm:$0xff]  ;;  %v7784_v35 = vld [vmem:[%s9490_s3 + $0x648] sm:$0xff] }
  0xa9   :  { %9649 = vst [vmem:[#allocation172_spill] sm:$0xff] %v7774_v3  ;;  %9650 = vst [vmem:[#allocation173_spill] sm:$0xff] %v7779_v19  ;;  %v7789_v4 = vld [vmem:[%s9490_s3 + $0x650] sm:$0xff]  ;;  %v7794_v51 = vld [vmem:[%s9490_s3 + $0x658] sm:$0xff] }
  0xaa   :  { %9651 = vst [vmem:[#allocation174_spill] sm:$0xff] %v7784_v35  ;;  %9652 = vst [vmem:[#allocation175_spill] sm:$0xff] %v7789_v4  ;;  %v7799_v3 = vld [vmem:[%s9490_s3 + $0x660] sm:$0xff]  ;;  %v7804_v19 = vld [vmem:[%s9490_s3 + $0x668] sm:$0xff] }
  0xab   :  { %9653 = vst [vmem:[#allocation176_spill] sm:$0xff] %v7794_v51  ;;  %9654 = vst [vmem:[#allocation177_spill] sm:$0xff] %v7799_v3  ;;  %v7809_v35 = vld [vmem:[%s9490_s3 + $0x670] sm:$0xff]  ;;  %v7814_v4 = vld [vmem:[%s9490_s3 + $0x678] sm:$0xff] }
  0xac   :  { %9655 = vst [vmem:[#allocation178_spill] sm:$0xff] %v7804_v19  ;;  %9656 = vst [vmem:[#allocation179_spill] sm:$0xff] %v7809_v35  ;;  %v7819_v51 = vld [vmem:[%s9490_s3 + $0x680] sm:$0xff]  ;;  %v7824_v3 = vld [vmem:[%s9490_s3 + $0x688] sm:$0xff] }
  0xad   :  { %9657 = vst [vmem:[#allocation180_spill] sm:$0xff] %v7814_v4  ;;  %9658 = vst [vmem:[#allocation181_spill] sm:$0xff] %v7819_v51  ;;  %v7829_v19 = vld [vmem:[%s9490_s3 + $0x690] sm:$0xff]  ;;  %v7834_v35 = vld [vmem:[%s9490_s3 + $0x698] sm:$0xff] }
  0xae   :  { %9659 = vst [vmem:[#allocation182_spill] sm:$0xff] %v7824_v3  ;;  %9660 = vst [vmem:[#allocation183_spill] sm:$0xff] %v7829_v19  ;;  %v7839_v4 = vld [vmem:[%s9490_s3 + $0x6a0] sm:$0xff]  ;;  %v7844_v51 = vld [vmem:[%s9490_s3 + $0x6a8] sm:$0xff] }
  0xaf   :  { %9661 = vst [vmem:[#allocation184_spill] sm:$0xff] %v7834_v35  ;;  %9662 = vst [vmem:[#allocation185_spill] sm:$0xff] %v7839_v4  ;;  %v7849_v3 = vld [vmem:[%s9490_s3 + $0x6b0] sm:$0xff]  ;;  %v7854_v19 = vld [vmem:[%s9490_s3 + $0x6b8] sm:$0xff] }
  0xb0   :  { %9663 = vst [vmem:[#allocation186_spill] sm:$0xff] %v7844_v51  ;;  %9664 = vst [vmem:[#allocation187_spill] sm:$0xff] %v7849_v3  ;;  %v7859_v35 = vld [vmem:[%s9490_s3 + $0x6c0] sm:$0xff]  ;;  %v7864_v4 = vld [vmem:[%s9490_s3 + $0x6c8] sm:$0xff] }
  0xb1   :  { %9665 = vst [vmem:[#allocation188_spill] sm:$0xff] %v7854_v19  ;;  %9666 = vst [vmem:[#allocation189_spill] sm:$0xff] %v7859_v35  ;;  %v7869_v51 = vld [vmem:[%s9490_s3 + $0x6d0] sm:$0xff]  ;;  %v7874_v3 = vld [vmem:[%s9490_s3 + $0x6d8] sm:$0xff] }
  0xb2   :  { %9667 = vst [vmem:[#allocation190_spill] sm:$0xff] %v7864_v4  ;;  %9668 = vst [vmem:[#allocation191_spill] sm:$0xff] %v7869_v51  ;;  %v7879_v19 = vld [vmem:[%s9490_s3 + $0x6e0] sm:$0xff]  ;;  %v7884_v35 = vld [vmem:[%s9490_s3 + $0x6e8] sm:$0xff] }
  0xb3   :  { %9669 = vst [vmem:[#allocation192_spill] sm:$0xff] %v7874_v3  ;;  %9670 = vst [vmem:[#allocation193_spill] sm:$0xff] %v7879_v19  ;;  %v7889_v4 = vld [vmem:[%s9490_s3 + $0x6f0] sm:$0xff]  ;;  %v7894_v51 = vld [vmem:[%s9490_s3 + $0x6f8] sm:$0xff] }
  0xb4   :  { %9671 = vst [vmem:[#allocation194_spill] sm:$0xff] %v7884_v35  ;;  %9672 = vst [vmem:[#allocation195_spill] sm:$0xff] %v7889_v4 }
  0xb5   :  { %9673 = vst [vmem:[#allocation196_spill] sm:$0xff] %v7894_v51 }
  0xb6   :  { %790 = vsyncadd [#allocation5 + $0x1], 28672  ;;  %s9674_s26 = sld [smem:[#allocation202_spill]]  ;;  %vm802_vm0 = vcmask 130048   ;;  %v884_v51 = vld [vmem:[%s9435_s6] sm:$0xff]  ;;  %vm967_vm1 = vcmask 64512  }
  0xb7   :  { %s9675_s29 = sld [smem:[#allocation201_spill]]  ;;  %5690 = vmatprep.mubr.msk.f32.mxu0 %vm802_vm0, %v884_v51  ;;  %v1079_v37 = vld [vmem:[%s9437_s8] sm:$0xff]  ;;  %vm6369_vm2 = vmmov 0   ;;  %s6370_s24 = smov 64   ;;  %vm1189_vm3 = vcmask 261120   ;;  %vm2081_vm4 = vcmask 25600  }
  0xb8   :  { %v1059_v21 = vld [vmem:[%s9436_s7] sm:$0xff] }
  0xbc   :  { %v794_v3 = vld [vmem:[%s9674_s26 + $0x8] sm:$0xff]  ;;  %v793_v19 = vld [vmem:[%s9674_s26] sm:$0xff] }
  0xbd   :  { %5672 = vmatprep.subr.mxu1 %v794_v3  ;;  %v791_v35 = vld [vmem:[%s9675_s29] sm:$0xff]  ;;  %v792_v4 = vld [vmem:[%s9675_s29 + $0x8] sm:$0xff] }
  0xbe   :  { %5673 = vmatpush3.msra.mxu1 %v794_v3  ;;  %5676 = vmatprep.mubr.msk.f32.mxu1 %vm802_vm0, %v791_v35  ;;  %v4828_v35 = vld [vmem:[%s9434_s5] ss:$0 sm:$0xff] }
  0xbf   :  { %5674 = vmatprep.subr.mxu1 %v793_v19 }
  0xc0   :  { %5675 = vmatpush3.msra.mxu1 %v793_v19  ;;  %v9454_v19 = vmov 0  }
  0xc1   :  { %5677 = vmatmul.mubr.msk.f32.vlgmr.msra.gmra.mxu1 %vm802_vm0, %v792_v4  ;;  %v885_v4 = vld [vmem:[%s9435_s6 + $0x8] sm:$0xff]  ;;  %6267 = vset.pattern.permute.xlu1 %v9454_v19 }
  0xc2   :  { %5683 = vmatprep.mubr.msk.f32.mxu1 %vm802_vm0, %v884_v51  ;;  %v1060_v51 = vld [vmem:[%s9436_s7 + $0x8] sm:$0xff]  ;;  %6266 = vset.pattern.permute.xlu0 %v9454_v19 }
  0xc3   :  { %1068 = vperm.xlu1 %6267, %v1060_v51  }
  0xc7   :  { %1083 = vperm.xlu1 %6267, %v1079_v37  }
 0x181   :  { %v5678_v3 = vpop.f32.mrf.mxu1 }
 0x182   :  { %v881_v36 = vadd.f32 %v5678_v3, %v4828_v35 }
 0x183   :  { %v875_v20 = vpop.f32.mrf.mxu1 }
 0x184   :  { %v876_v52 = vadd.f32 %v4828_v35, %v875_v20  ;;  %5679 = vmatprep.subr.mxu1 %v881_v36 }
 0x185   :  { %5680 = vmatpush3.msra.mxu1 %v881_v36 }
 0x186   :  { %5681 = vmatprep.subr.mxu1 %v876_v52 }
 0x187   :  { %5682 = vmatpush3.msra.mxu1 %v876_v52 }
 0x188   :  { %5684 = vmatmul.mubr.msk.f32.vlgmr.msra.gmra.mxu1 %vm802_vm0, %v885_v4 }
 0x248   :  { %v5685_v20 = vpop.f32.mrf.mxu1 }
 0x249   :  { %v971_v35 = vsel %vm967_vm1, %v5685_v20, 0.0 }
 0x24a   :  { %972 = vadd.xlane.f32.xlu0 %v971_v35  ;;  %v958_v3 = vpop.f32.mrf.mxu1 }
 0x24b   :  { %v968_v5 = vsel %vm967_vm1, %v958_v3, 0.0 }
 0x24e   :  { %969 = vadd.xlane.f32.xlu0 %v968_v5 }
 0x264   :  { %1063 = vperm.xlu0 %6266, %v1059_v21   ;;  %v7963_v21 = vld [vmem:[%s9439_s10 + $0x8] sm:$0xff] }
 0x2d3   :  { %v973_v51 = vpop.xlane.xlu0 %972 }
 0x2d4   :  { %v975_v19 = vsub.f32 %v881_v36, %v973_v51  ;;  %v1080_v36 = vld [vmem:[%s9437_s8 + $0x8] sm:$0xff]  ;;  %v1069_v51 = vpop.permute.xlu1 %1068 }
 0x2d6   :  { %v977_v53 = vmul.f32 %v975_v19, %v975_v19  ;;  %v1072_v54 = vmul.f32 %v1069_v51, %v975_v19 }
 0x2d7   :  { %v970_v6 = vpop.xlane.xlu0 %969 }
 0x2d8   :  { %v974_v20 = vsub.f32 %v876_v52, %v970_v6  ;;  %5686 = vmatprep.subr.mxu0 %v977_v53  ;;  %v1093_v52 = vld [vmem:[%s9438_s9] sm:$0xff]  ;;  %v9455_v6 = vmov 0.0  }
 0x2d9   :  { %5687 = vmatpush3.msra.mxu0 %v977_v53  ;;  %5693 = vmatprep.subr.mxu1 %v1093_v52  ;;  %v7947_v53 = vld [vmem:[%s9439_s10 + $0x18] sm:$0xff] }
 0x2da   :  { %v976_v35 = vmul.f32 %v974_v20, %v974_v20  ;;  %5694 = vmatpush3.msra.mxu1 %v1093_v52 }
 0x2db   :  { %5709 = vmatprep.subr.mxu1 %v9455_v6 }
 0x2dc   :  { %5688 = vmatprep.subr.mxu0 %v976_v35 }
 0x2dd   :  { %5689 = vmatpush3.msra.mxu0 %v976_v35  ;;  %v1084_v35 = vpop.permute.xlu1 %1083 }
 0x2de   :  { %5691 = vmatmul.mubr.msk.f32.vlgmr.msra.gmra.mxu0 %vm802_vm0, %v885_v4  ;;  %5698 = vmatprep.subr.mxu0 %v9455_v6  ;;  %v7970_v4 = vld [vmem:[%s9439_s10] sm:$0xff] }
 0x2df   :  { %5706 = vmatprep.mubr.msk.f32.mxu0 %vm6369_vm2, %v9455_v6  ;;  %5699 = vmatpush3.msra.mxu0 %v7947_v53  ;;  %v1064_v52 = vpop.permute.xlu0 %1063 }
 0x2e0   :  { %5700 = vmatprep.subr.mxu0 %v9455_v6  ;;  %v1071_v7 = vmul.f32 %v1064_v52, %v974_v20 }
 0x39e   :  { %v5692_v5 = vpop.f32.mrf.mxu0 }
 0x39f   :  { %v1056_v3 = vsel %vm967_vm1, %v5692_v5, 0.0 }
 0x3a0   :  { %1057 = vadd.xlane.f32.xlu1 %v1056_v3  ;;  %v1044_v38 = vpop.f32.mrf.mxu0 }
 0x3a1   :  { %v1053_v37 = vsel %vm967_vm1, %v1044_v38, 0.0  ;;  %v7953_v38 = vld [vmem:[%s9439_s10 + $0x10] sm:$0xff] }
 0x3a2   :  { %5701 = vmatpush3.msra.mxu0 %v7953_v38 }
 0x3a3   :  { %5702 = vmatprep.subr.mxu0 %v9455_v6 }
 0x3a4   :  { %1054 = vadd.xlane.f32.xlu1 %v1053_v37  ;;  %5703 = vmatpush3.msra.mxu0 %v7963_v21 }
 0x3a5   :  { %5704 = vmatprep.subr.mxu0 %v9455_v6 }
 0x3a6   :  { %5705 = vmatpush3.msra.mxu0 %v7970_v4 }
 0x3a7   :  { %5707 = vmatmul.mubr.f32.vlgmr.msra.gmra.mxu0 %v9455_v6  ;;  %5720 = vmatprep.subr.mxu0 %v9455_v6 }
 0x3a8   :  { %5721 = vmatpush3.msra.mxu0 %v7947_v53  ;;  %5728 = vmatprep.mubr.msk.f32.mxu0 %vm6369_vm2, %v9455_v6 }
 0x3a9   :  { %5722 = vmatprep.subr.mxu0 %v9455_v6 }
 0x3aa   :  { %5723 = vmatpush3.msra.mxu0 %v7953_v38 }
 0x3ab   :  { %5724 = vmatprep.subr.mxu0 %v9455_v6 }
 0x3ac   :  { %5725 = vmatpush3.msra.mxu0 %v7963_v21 }
 0x3ad   :  { %5726 = vmatprep.subr.mxu0 %v9455_v6 }
 0x3ae   :  { %5727 = vmatpush3.msra.mxu0 %v7970_v4 }
 0x3af   :  { %5742 = vmatprep.subr.mxu0 %v9455_v6 }
 0x3b5   :  { %1088 = vperm.xlu1 %6267, %v1080_v36  }
 0x429   :  { %v1058_v5 = vpop.xlane.xlu1 %1057 }
 0x42a   :  { %v1074_v3 = vadd.f32 1e-05, %v1058_v5 }
 0x42c   :  { %6268 = vrsqrt.f32 %v1074_v3 }
 0x42d   :  { %v1055_v37 = vpop.xlane.xlu1 %1054 }
 0x42e   :  { %v1073_v36 = vadd.f32 1e-05, %v1055_v37 }
 0x430   :  { %6270 = vrsqrt.f32 %v1073_v36 }
 0x431   :  { %v1089_v8 = vpop.permute.xlu1 %1088 }
 0x439   :  { %v6269_v22 = vpop.eup %6268 }
 0x43a   :  { %v1078_v23 = vmul.f32 %v6269_v22, %v1072_v54  ;;  %v4835_v54 = vld [vmem:[%s9440_s11] ss:$0 sm:$0xff]  ;;  %s6371_s11 = smov 32  }
 0x43c   :  { %v1092_v24 = vadd.f32 %v1089_v8, %v1078_v23 }
 0x43d   :  { %v6271_v39 = vpop.eup %6270 }
 0x43e   :  { %v1077_v55 = vmul.f32 %v6271_v39, %v1071_v7 }
 0x440   :  { %v1091_v40 = vadd.f32 %v1084_v35, %v1077_v55 }
 0x442   :  { %5695 = vmatprep.mubr.msk.f32.mxu1 %vm967_vm1, %v1091_v40 }
 0x443   :  { %5696 = vmatmul.mubr.msk.f32.vlgmr.msra.gmra.mxu1 %vm967_vm1, %v1092_v24 }
 0x444   :  { %5710 = vmatpush3.msra.mxu1 %v7947_v53  ;;  %5717 = vmatprep.mubr.msk.f32.mxu1 %vm6369_vm2, %v9455_v6 }
 0x445   :  { %5711 = vmatprep.subr.mxu1 %v9455_v6 }
 0x446   :  { %5712 = vmatpush3.msra.mxu1 %v7953_v38 }
 0x447   :  { %5713 = vmatprep.subr.mxu1 %v9455_v6 }
 0x448   :  { %5714 = vmatpush3.msra.mxu1 %v7963_v21 }
 0x449   :  { %5715 = vmatprep.subr.mxu1 %v9455_v6 }
 0x44a   :  { %5716 = vmatpush3.msra.mxu1 %v7970_v4 }
 0x44b   :  { %5731 = vmatprep.subr.mxu1 %v9455_v6 }
 0x467   :  { %v1259_v39 = vpop.f32.mrf.mxu0 }
 0x469   :  { %v5708_v40 = vpop.f32.mrf.mxu0 }
 0x503   :  { %v5697_v55 = vpop.f32.mrf.mxu1 }
 0x504   :  { %v1179_v7 = vadd.f32 %v5697_v55, %v4835_v54 }
 0x505   :  { %v1173_v8 = vpop.f32.mrf.mxu1 }
 0x506   :  { %1183 = vst [vmem:[#allocation4 + $0x8] sm:$0xff] %v1179_v7  ;;  %v1174_v22 = vadd.f32 %v4835_v54, %v1173_v8 }
 0x508   :  { %1182 = vst [vmem:[#allocation4] sm:$0xff] %v1174_v22 }
 0x50f   :  { %v1184_v23 = vld [vmem:[#allocation4] sm:$0x3]  ;;  %v1288_v22 = vld [vmem:[#allocation4 + $0x2] sm:$0x3] }
 0x510   :  { %v1263_v24 = vadd.f32 %v1259_v39, %v1184_v23 }
 0x512   :  { %6272 = vtanh.f32 %v1263_v24  ;;  %v1264_v20 = vsub.f32 0.0, %v1263_v24 }
 0x514   :  { %v1265_v51 = vmul.f32 1.442695, %v1264_v20 }
 0x516   :  { %6274 = vpow2.f32 %v1265_v51 }
 0x51f   :  { %v6273_v19 = vpop.eup %6272 }
 0x520   :  { %1273 = vrot.lane.b32.xlu1 %v6273_v19, %s6370_s24 }
 0x523   :  { %v6275_v35 = vpop.eup %6274 }
 0x524   :  { %v1267_v5 = vadd.f32 1.0, %v6275_v35 }
 0x526   :  { %6276 = vrcp.f32 %v1267_v5 }
 0x533   :  { %v6277_v3 = vpop.eup %6276 }
 0x534   :  { %v1271_v52 = vmul.f32 0.0, %v6277_v3 }
 0x592   :  { %v1274_v37 = vpop.permute.xlu1 %1273 }
 0x593   :  { %v1276_v36 = vmul.f32 %v6277_v3, %v1274_v37 }
 0x595   :  { %1278 = vrot.lane.b32.xlu1 %v1276_v36, %s6371_s11 }
 0x607   :  { %v1279_v40 = vpop.permute.xlu1 %1278 }
 0x608   :  { %v1281_v39 = vadd.f32 %v1279_v40, %v1271_v52 }
 0x60a   :  { %6278 = vtanh.f32 %v1281_v39 }
 0x617   :  { %v6279_v54 = vpop.eup %6278 }
 0x618   :  { %1284 = vrot.lane.b32.xlu1 %v6279_v54, %s6370_s24 }
 0x68a   :  { %v1285_v55 = vpop.permute.xlu1 %1284 }
 0x68b   :  { %v1287_v7 = vmul.f32 %v6277_v3, %v1285_v55 }
 0x68d   :  { %1290 = vrot.lane.b32.xlu1 %v1287_v7, %s6371_s11 }
 0x6ff   :  { %v1291_v8 = vpop.permute.xlu1 %1290 }
 0x700   :  { %5718 = vmatmul.mubr.msk.f32.vlgmr.msra.gmra.mxu1 %vm1189_vm3, %v1291_v8 }
 0x701   :  { %5732 = vmatpush3.msra.mxu1 %v7947_v53  ;;  %5739 = vmatprep.mubr.msk.f32.mxu1 %vm6369_vm2, %v9455_v6 }
 0x702   :  { %5733 = vmatprep.subr.mxu1 %v9455_v6 }
 0x703   :  { %5734 = vmatpush3.msra.mxu1 %v7953_v38 }
 0x704   :  { %5735 = vmatprep.subr.mxu1 %v9455_v6 }
 0x705   :  { %5736 = vmatpush3.msra.mxu1 %v7963_v21 }
 0x706   :  { %5737 = vmatprep.subr.mxu1 %v9455_v6 }
 0x707   :  { %5738 = vmatpush3.msra.mxu1 %v7970_v4 }
 0x708   :  { %5753 = vmatprep.subr.mxu1 %v9455_v6 }
 0x7c0   :  { %v1360_v23 = vpop.f32.mrf.mxu1 }
 0x7c1   :  { %v1364_v24 = vadd.f32 %v1360_v23, %v1288_v22 }
 0x7c2   :  { %v5719_v19 = vpop.f32.mrf.mxu1 }
 0x7c3   :  { %6280 = vtanh.f32 %v1364_v24  ;;  %v1365_v51 = vsub.f32 0.0, %v1364_v24 }
 0x7c5   :  { %v1366_v35 = vmul.f32 1.442695, %v1365_v51 }
 0x7c7   :  { %6282 = vpow2.f32 %v1366_v35 }
 0x7d0   :  { %v6281_v20 = vpop.eup %6280 }
 0x7d1   :  { %1374 = vrot.lane.b32.xlu1 %v6281_v20, %s6370_s24 }
 0x7d4   :  { %v6283_v5 = vpop.eup %6282 }
 0x7d5   :  { %v1368_v3 = vadd.f32 1.0, %v6283_v5 }
 0x7d7   :  { %6284 = vrcp.f32 %v1368_v3 }
 0x7e4   :  { %v6285_v37 = vpop.eup %6284 }
 0x7e5   :  { %v1372_v40 = vmul.f32 %v6285_v37, %v1281_v39  ;;  %v1389_v39 = vld [vmem:[#allocation4 + $0x4] sm:$0x3] }
 0x843   :  { %v1375_v36 = vpop.permute.xlu1 %1374 }
 0x844   :  { %v1377_v52 = vmul.f32 %v6285_v37, %v1375_v36 }
 0x846   :  { %1379 = vrot.lane.b32.xlu0 %v1377_v52, %s6371_s11 }
 0x8b8   :  { %v1380_v54 = vpop.permute.xlu0 %1379 }
 0x8b9   :  { %v1382_v55 = vadd.f32 %v1380_v54, %v1372_v40 }
 0x8bb   :  { %6286 = vtanh.f32 %v1382_v55 }
 0x8c8   :  { %v6287_v7 = vpop.eup %6286 }
 0x8c9   :  { %1385 = vrot.lane.b32.xlu1 %v6287_v7, %s6370_s24 }
 0x93b   :  { %v1386_v8 = vpop.permute.xlu1 %1385 }
 0x93c   :  { %v1388_v22 = vmul.f32 %v6285_v37, %v1386_v8 }
 0x93e   :  { %1391 = vrot.lane.b32.xlu0 %v1388_v22, %s6371_s11 }
 0x9b0   :  { %v1392_v23 = vpop.permute.xlu0 %1391 }
 0x9b1   :  { %5729 = vmatmul.mubr.msk.f32.vlgmr.msra.gmra.mxu0 %vm1189_vm3, %v1392_v23 }
 0x9b2   :  { %5743 = vmatpush3.msra.mxu0 %v7947_v53  ;;  %5750 = vmatprep.mubr.msk.f32.mxu0 %vm6369_vm2, %v9455_v6 }
 0x9b3   :  { %5744 = vmatprep.subr.mxu0 %v9455_v6 }
 0x9b4   :  { %5745 = vmatpush3.msra.mxu0 %v7953_v38 }
 0x9b5   :  { %5746 = vmatprep.subr.mxu0 %v9455_v6 }
 0x9b6   :  { %5747 = vmatpush3.msra.mxu0 %v7963_v21 }
 0x9b7   :  { %5748 = vmatprep.subr.mxu0 %v9455_v6 }
 0x9b8   :  { %5749 = vmatpush3.msra.mxu0 %v7970_v4 }
 0x9b9   :  { %5764 = vmatprep.subr.mxu0 %v9455_v6 }
 0xa71   :  { %v1461_v24 = vpop.f32.mrf.mxu0 }
 0xa72   :  { %v1465_v19 = vadd.f32 %v1461_v24, %v1389_v39 }
 0xa73   :  { %v5730_v20 = vpop.f32.mrf.mxu0 }
 0xa74   :  { %6288 = vtanh.f32 %v1465_v19  ;;  %v1466_v35 = vsub.f32 0.0, %v1465_v19 }
 0xa76   :  { %v1467_v5 = vmul.f32 1.442695, %v1466_v35 }
 0xa78   :  { %6290 = vpow2.f32 %v1467_v5 }
 0xa81   :  { %v6289_v51 = vpop.eup %6288 }
 0xa82   :  { %1475 = vrot.lane.b32.xlu1 %v6289_v51, %s6370_s24 }
 0xa85   :  { %v6291_v3 = vpop.eup %6290 }
 0xa86   :  { %v1469_v37 = vadd.f32 1.0, %v6291_v3 }
 0xa88   :  { %6292 = vrcp.f32 %v1469_v37 }
 0xa95   :  { %v6293_v36 = vpop.eup %6292 }
 0xa96   :  { %v1473_v54 = vmul.f32 %v6293_v36, %v1382_v55  ;;  %v1490_v55 = vld [vmem:[#allocation4 + $0x6] sm:$0x3] }
 0xaf4   :  { %v1476_v52 = vpop.permute.xlu1 %1475 }
 0xaf5   :  { %v1478_v40 = vmul.f32 %v6293_v36, %v1476_v52 }
 0xaf7   :  { %1480 = vrot.lane.b32.xlu0 %v1478_v40, %s6371_s11 }
 0xb69   :  { %v1481_v7 = vpop.permute.xlu0 %1480 }
 0xb6a   :  { %v1483_v8 = vadd.f32 %v1481_v7, %v1473_v54 }
 0xb6c   :  { %6294 = vtanh.f32 %v1483_v8 }
 0xb79   :  { %v6295_v22 = vpop.eup %6294 }
 0xb7a   :  { %1486 = vrot.lane.b32.xlu1 %v6295_v22, %s6370_s24 }
 0xbec   :  { %v1487_v23 = vpop.permute.xlu1 %1486 }
 0xbed   :  { %v1489_v39 = vmul.f32 %v6293_v36, %v1487_v23 }
 0xbef   :  { %1492 = vrot.lane.b32.xlu0 %v1489_v39, %s6371_s11 }
 0xc61   :  { %v1493_v24 = vpop.permute.xlu0 %1492 }
 0xc62   :  { %5740 = vmatmul.mubr.msk.f32.vlgmr.msra.gmra.mxu1 %vm1189_vm3, %v1493_v24 }
 0xc63   :  { %5754 = vmatpush3.msra.mxu1 %v7947_v53  ;;  %5761 = vmatprep.mubr.msk.f32.mxu1 %vm6369_vm2, %v9455_v6 }
 0xc64   :  { %5755 = vmatprep.subr.mxu1 %v9455_v6 }
 0xc65   :  { %5756 = vmatpush3.msra.mxu1 %v7953_v38 }
 0xc66   :  { %5757 = vmatprep.subr.mxu1 %v9455_v6 }
 0xc67   :  { %5758 = vmatpush3.msra.mxu1 %v7963_v21 }
 0xc68   :  { %5759 = vmatprep.subr.mxu1 %v9455_v6 }
 0xc69   :  { %5760 = vmatpush3.msra.mxu1 %v7970_v4 }
 0xc6a   :  { %5775 = vmatprep.subr.mxu1 %v9455_v6 }
 0xd22   :  { %v1562_v19 = vpop.f32.mrf.mxu1 }
 0xd23   :  { %v1566_v20 = vadd.f32 %v1562_v19, %v1490_v55 }
 0xd24   :  { %v5741_v51 = vpop.f32.mrf.mxu1 }
 0xd25   :  { %6296 = vtanh.f32 %v1566_v20  ;;  %v1567_v5 = vsub.f32 0.0, %v1566_v20 }
 0xd27   :  { %v1568_v3 = vmul.f32 1.442695, %v1567_v5 }
 0xd29   :  { %6298 = vpow2.f32 %v1568_v3 }
 0xd32   :  { %v6297_v35 = vpop.eup %6296 }
 0xd33   :  { %1576 = vrot.lane.b32.xlu1 %v6297_v35, %s6370_s24 }
 0xd36   :  { %v6299_v37 = vpop.eup %6298 }
 0xd37   :  { %v1570_v36 = vadd.f32 1.0, %v6299_v37 }
 0xd39   :  { %6300 = vrcp.f32 %v1570_v36 }
 0xd46   :  { %v6301_v52 = vpop.eup %6300 }
 0xd47   :  { %v1574_v7 = vmul.f32 %v6301_v52, %v1483_v8  ;;  %v1591_v8 = vld [vmem:[#allocation4 + $0x8] sm:$0x3] }
 0xda5   :  { %v1577_v40 = vpop.permute.xlu1 %1576 }
 0xda6   :  { %v1579_v54 = vmul.f32 %v6301_v52, %v1577_v40 }
 0xda8   :  { %1581 = vrot.lane.b32.xlu0 %v1579_v54, %s6371_s11 }
 0xe1a   :  { %v1582_v22 = vpop.permute.xlu0 %1581 }
 0xe1b   :  { %v1584_v23 = vadd.f32 %v1582_v22, %v1574_v7 }
 0xe1d   :  { %6302 = vtanh.f32 %v1584_v23 }
 0xe2a   :  { %v6303_v39 = vpop.eup %6302 }
 0xe2b   :  { %1587 = vrot.lane.b32.xlu1 %v6303_v39, %s6370_s24 }
 0xe9d   :  { %v1588_v24 = vpop.permute.xlu1 %1587 }
 0xe9e   :  { %v1590_v55 = vmul.f32 %v6301_v52, %v1588_v24 }
 0xea0   :  { %1593 = vrot.lane.b32.xlu0 %v1590_v55, %s6371_s11 }
 0xf12   :  { %v1594_v19 = vpop.permute.xlu0 %1593 }
 0xf13   :  { %5751 = vmatmul.mubr.msk.f32.vlgmr.msra.gmra.mxu0 %vm1189_vm3, %v1594_v19 }
 0xf14   :  { %5765 = vmatpush3.msra.mxu0 %v7947_v53  ;;  %5772 = vmatprep.mubr.msk.f32.mxu0 %vm6369_vm2, %v9455_v6 }
 0xf15   :  { %5766 = vmatprep.subr.mxu0 %v9455_v6 }
 0xf16   :  { %5767 = vmatpush3.msra.mxu0 %v7953_v38 }
 0xf17   :  { %5768 = vmatprep.subr.mxu0 %v9455_v6 }
 0xf18   :  { %5769 = vmatpush3.msra.mxu0 %v7963_v21 }
 0xf19   :  { %5770 = vmatprep.subr.mxu0 %v9455_v6 }
 0xf1a   :  { %5771 = vmatpush3.msra.mxu0 %v7970_v4 }
 0xf1b   :  { %5786 = vmatprep.subr.mxu0 %v9455_v6 }
 0xfd3   :  { %v1663_v20 = vpop.f32.mrf.mxu0 }
 0xfd4   :  { %v1667_v51 = vadd.f32 %v1663_v20, %v1591_v8 }
 0xfd5   :  { %v5752_v35 = vpop.f32.mrf.mxu0 }
 0xfd6   :  { %6304 = vtanh.f32 %v1667_v51  ;;  %v1668_v3 = vsub.f32 0.0, %v1667_v51 }
 0xfd8   :  { %v1669_v37 = vmul.f32 1.442695, %v1668_v3 }
 0xfda   :  { %6306 = vpow2.f32 %v1669_v37 }
 0xfe3   :  { %v6305_v5 = vpop.eup %6304 }
 0xfe4   :  { %1677 = vrot.lane.b32.xlu1 %v6305_v5, %s6370_s24 }
 0xfe7   :  { %v6307_v36 = vpop.eup %6306 }
 0xfe8   :  { %v1671_v52 = vadd.f32 1.0, %v6307_v36 }
 0xfea   :  { %6308 = vrcp.f32 %v1671_v52 }
 0xff7   :  { %v6309_v40 = vpop.eup %6308 }
 0xff8   :  { %v1675_v22 = vmul.f32 %v6309_v40, %v1584_v23  ;;  %v1692_v23 = vld [vmem:[#allocation4 + $0xa] sm:$0x3] }
0x1056   :  { %v1678_v54 = vpop.permute.xlu1 %1677 }
0x1057   :  { %v1680_v7 = vmul.f32 %v6309_v40, %v1678_v54 }
0x1059   :  { %1682 = vrot.lane.b32.xlu0 %v1680_v7, %s6371_s11 }
0x10cb   :  { %v1683_v39 = vpop.permute.xlu0 %1682 }
0x10cc   :  { %v1685_v24 = vadd.f32 %v1683_v39, %v1675_v22 }
0x10ce   :  { %6310 = vtanh.f32 %v1685_v24 }
0x10db   :  { %v6311_v55 = vpop.eup %6310 }
0x10dc   :  { %1688 = vrot.lane.b32.xlu1 %v6311_v55, %s6370_s24 }
0x114e   :  { %v1689_v19 = vpop.permute.xlu1 %1688 }
0x114f   :  { %v1691_v8 = vmul.f32 %v6309_v40, %v1689_v19 }
0x1151   :  { %1694 = vrot.lane.b32.xlu0 %v1691_v8, %s6371_s11  ;;  %v1793_v8 = vld [vmem:[#allocation4 + $0xc] sm:$0x3] }
0x11c3   :  { %v1695_v20 = vpop.permute.xlu0 %1694 }
0x11c4   :  { %5762 = vmatmul.mubr.msk.f32.vlgmr.msra.gmra.mxu1 %vm1189_vm3, %v1695_v20 }
0x11c5   :  { %5776 = vmatpush3.msra.mxu1 %v7947_v53  ;;  %5783 = vmatprep.mubr.msk.f32.mxu1 %vm6369_vm2, %v9455_v6 }
0x11c6   :  { %5777 = vmatprep.subr.mxu1 %v9455_v6 }
0x11c7   :  { %5778 = vmatpush3.msra.mxu1 %v7953_v38 }
0x11c8   :  { %5779 = vmatprep.subr.mxu1 %v9455_v6 }
0x11c9   :  { %5780 = vmatpush3.msra.mxu1 %v7963_v21 }
0x11ca   :  { %5781 = vmatprep.subr.mxu1 %v9455_v6 }
0x11cb   :  { %5782 = vmatpush3.msra.mxu1 %v7970_v4 }
0x1284   :  { %v1764_v51 = vpop.f32.mrf.mxu1 }
0x1285   :  { %v1768_v35 = vadd.f32 %v1764_v51, %v1692_v23 }
0x1286   :  { %v5763_v5 = vpop.f32.mrf.mxu1 }
0x1287   :  { %6312 = vtanh.f32 %v1768_v35  ;;  %v1769_v3 = vsub.f32 0.0, %v1768_v35 }
0x1289   :  { %v1770_v37 = vmul.f32 1.442695, %v1769_v3 }
0x128b   :  { %6314 = vpow2.f32 %v1770_v37 }
0x1294   :  { %v6313_v53 = vpop.eup %6312 }
0x1295   :  { %1778 = vrot.lane.b32.xlu1 %v6313_v53, %s6370_s24 }
0x1298   :  { %v6315_v38 = vpop.eup %6314 }
0x1299   :  { %v1772_v36 = vadd.f32 1.0, %v6315_v38 }
0x129b   :  { %6316 = vrcp.f32 %v1772_v36 }
0x12a8   :  { %v6317_v52 = vpop.eup %6316 }
0x12a9   :  { %v1776_v4 = vmul.f32 %v6317_v52, %v1685_v24 }
0x1307   :  { %v1779_v21 = vpop.permute.xlu1 %1778 }
0x1308   :  { %v1781_v40 = vmul.f32 %v6317_v52, %v1779_v21 }
0x130a   :  { %1783 = vrot.lane.b32.xlu0 %v1781_v40, %s6371_s11 }
0x137c   :  { %v1784_v54 = vpop.permute.xlu0 %1783 }
0x137d   :  { %v1786_v7 = vadd.f32 %v1784_v54, %v1776_v4 }
0x137f   :  { %6318 = vtanh.f32 %v1786_v7 }
0x138c   :  { %v6319_v22 = vpop.eup %6318 }
0x138d   :  { %1789 = vrot.lane.b32.xlu1 %v6319_v22, %s6370_s24 }
0x13ff   :  { %v1790_v39 = vpop.permute.xlu1 %1789 }
0x1400   :  { %v1792_v55 = vmul.f32 %v6317_v52, %v1790_v39 }
0x1402   :  { %1795 = vrot.lane.b32.xlu0 %v1792_v55, %s6371_s11  ;;  %v1894_v55 = vld [vmem:[#allocation4 + $0xe] sm:$0x3] }
0x1474   :  { %v1796_v19 = vpop.permute.xlu0 %1795 }
0x1475   :  { %5773 = vmatmul.mubr.msk.f32.vlgmr.msra.gmra.mxu0 %vm1189_vm3, %v1796_v19 }
0x1476   :  { %5794 = vmatprep.mubr.msk.f32.mxu0 %vm6369_vm2, %v9455_v6 }
0x1535   :  { %v1865_v20 = vpop.f32.mrf.mxu0 }
0x1536   :  { %v1869_v23 = vadd.f32 %v1865_v20, %v1793_v8 }
0x1537   :  { %v5774_v24 = vpop.f32.mrf.mxu0 }
0x1538   :  { %6320 = vtanh.f32 %v1869_v23  ;;  %v1870_v35 = vsub.f32 0.0, %v1869_v23 }
0x153a   :  { %v1871_v5 = vmul.f32 1.442695, %v1870_v35 }
0x153c   :  { %6322 = vpow2.f32 %v1871_v5 }
0x1545   :  { %v6321_v51 = vpop.eup %6320 }
0x1546   :  { %1879 = vrot.lane.b32.xlu1 %v6321_v51, %s6370_s24 }
0x1549   :  { %v6323_v53 = vpop.eup %6322 }
0x154a   :  { %v1873_v3 = vadd.f32 1.0, %v6323_v53 }
0x154c   :  { %6324 = vrcp.f32 %v1873_v3 }
0x1559   :  { %v6325_v37 = vpop.eup %6324 }
0x155a   :  { %v1877_v52 = vmul.f32 %v6325_v37, %v1786_v7 }
0x15b8   :  { %v1880_v38 = vpop.permute.xlu1 %1879 }
0x15b9   :  { %v1882_v36 = vmul.f32 %v6325_v37, %v1880_v38 }
0x15bb   :  { %1884 = vrot.lane.b32.xlu0 %v1882_v36, %s6371_s11 }
0x162d   :  { %v1885_v21 = vpop.permute.xlu0 %1884 }
0x162e   :  { %v1887_v40 = vadd.f32 %v1885_v21, %v1877_v52  ;;  %v1998_v52 = vld [vmem:[%s9441_s12 + $0x18] sm:$0xff]  ;;  %v1997_v21 = vld [vmem:[%s9441_s12 + $0x10] sm:$0xff] }
0x162f   :  { %5787 = vmatpush3.msra.mxu0 %v1998_v52 }
0x1630   :  { %6326 = vtanh.f32 %v1887_v40  ;;  %5788 = vmatprep.subr.mxu0 %v9455_v6 }
0x1631   :  { %5789 = vmatpush3.msra.mxu0 %v1997_v21 }
0x1632   :  { %5790 = vmatprep.subr.mxu0 %v9455_v6 }
0x163d   :  { %v6327_v4 = vpop.eup %6326 }
0x163e   :  { %1890 = vrot.lane.b32.xlu1 %v6327_v4, %s6370_s24  ;;  %v1996_v4 = vld [vmem:[%s9441_s12 + $0x8] sm:$0xff] }
0x163f   :  { %5791 = vmatpush3.msra.mxu0 %v1996_v4 }
0x1640   :  { %5792 = vmatprep.subr.mxu0 %v9455_v6 }
0x16b0   :  { %v1891_v54 = vpop.permute.xlu1 %1890 }
0x16b1   :  { %v1893_v22 = vmul.f32 %v6325_v37, %v1891_v54 }
0x16b3   :  { %1896 = vrot.lane.b32.xlu0 %v1893_v22, %s6371_s11 }
0x1725   :  { %v1897_v39 = vpop.permute.xlu0 %1896 }
0x1726   :  { %5784 = vmatmul.mubr.msk.f32.vlgmr.msra.gmra.mxu1 %vm1189_vm3, %v1897_v39 }
0x17e6   :  { %v1966_v19 = vpop.f32.mrf.mxu1 }
0x17e7   :  { %v1970_v8 = vadd.f32 %v1966_v19, %v1894_v55  ;;  %v4845_v19 = vld [vmem:[%s9442_s13] ss:$0 sm:$0xff] }
0x17e8   :  { %v5785_v20 = vpop.f32.mrf.mxu1 }
0x17e9   :  { %6328 = vtanh.f32 %v1970_v8  ;;  %v1971_v7 = vsub.f32 0.0, %v1970_v8 }
0x17eb   :  { %v1972_v24 = vmul.f32 1.442695, %v1971_v7 }
0x17ed   :  { %6330 = vpow2.f32 %v1972_v24 }
0x17f6   :  { %v6329_v23 = vpop.eup %6328 }
0x17f7   :  { %1980 = vrot.lane.b32.xlu1 %v6329_v23, %s6370_s24 }
0x17fa   :  { %v6331_v51 = vpop.eup %6330 }
0x17fb   :  { %v1974_v35 = vadd.f32 1.0, %v6331_v51 }
0x17fd   :  { %6332 = vrcp.f32 %v1974_v35 }
0x180a   :  { %v6333_v5 = vpop.eup %6332 }
0x180b   :  { %v1978_v37 = vmul.f32 %v6333_v5, %v1887_v40  ;;  %v1995_v40 = vld [vmem:[%s9441_s12] sm:$0xff] }
0x180c   :  { %5793 = vmatpush3.msra.mxu0 %v1995_v40 }
0x1869   :  { %v1981_v53 = vpop.permute.xlu1 %1980 }
0x186a   :  { %v1983_v3 = vmul.f32 %v6333_v5, %v1981_v53 }
0x186c   :  { %1985 = vrot.lane.b32.xlu0 %v1983_v3, %s6371_s11 }
0x18de   :  { %v1986_v38 = vpop.permute.xlu0 %1985 }
0x18df   :  { %v1988_v36 = vadd.f32 %v1986_v38, %v1978_v37 }
0x18e1   :  { %6334 = vtanh.f32 %v1988_v36 }
0x18ee   :  { %v6335_v54 = vpop.eup %6334 }
0x18ef   :  { %1991 = vrot.lane.b32.xlu1 %v6335_v54, %s6370_s24 }
0x1961   :  { %v1992_v22 = vpop.permute.xlu1 %1991 }
0x1962   :  { %v1994_v39 = vmul.f32 %v6333_v5, %v1992_v22 }
0x1964   :  { %2007 = vrot.lane.b32.xlu0 %v1994_v39, %s6371_s11 }
0x19d6   :  { %v2008_v55 = vpop.permute.xlu0 %2007 }
0x19d7   :  { %5795 = vmatmul.mubr.msk.f32.vlgmr.msra.gmra.mxu0 %vm1189_vm3, %v2008_v55 }
0x1a97   :  { %v2077_v8 = vpop.f32.mrf.mxu0 }
0x1a98   :  { %v2078_v20 = vadd.f32 %v4845_v19, %v2077_v8 }
0x1a99   :  { %v5796_v23 = vpop.f32.mrf.mxu0 }
0x1a9a   :  { %v2082_v7 = vsel %vm2081_vm4, %v2078_v20, -inf }
0x1a9b   :  { %2083 = vmax.xlane.f32.xlu1 %v2082_v7 }
0x1b24   :  { %v2084_v24 = vpop.xlane.xlu1 %2083 }
0x1b25   :  { %v2085_v51 = vsub.f32 %v2078_v20, %v2084_v24 }
0x1b27   :  { %v2086_v35 = vmul.f32 1.442695, %v2085_v51 }
0x1b29   :  { %6336 = vpow2.f32 %v2086_v35 }
0x1b36   :  { %v6337_v5 = vpop.eup %6336 }
0x1b37   :  { %v2088_v53 = vsel %vm2081_vm4, %v6337_v5, 0.0 }
0x1b38   :  { %2089 = vadd.xlane.f32.xlu0 %v2088_v53 }
0x1bc1   :  { %v2090_v3 = vpop.xlane.xlu0 %2089 }
0x1bc2   :  { %6338 = vrcp.f32 %v2090_v3 }
0x1bcf   :  { %v6339_v37 = vpop.eup %6338 }
0x1bd0   :  { %v8113_v38 = vmul.f32 %v6339_v37, %v6337_v5 }
0x1bd2   :  { %9676 = vst [vmem:[#allocation197_spill] sm:$0xff] %v8113_v38 }
0x1bd3   :  { %6361 = dma.done.wait [#allocation5], 12544 }
0x1bd4   :  { %6362 = vsyncadd [#allocation5], 4294954752  ;;  %5103 = vmatprep.subr.mxu1 %v6934_v2  ;;  %5156 = vmatprep.subr.mxu0 %v7094_v34 }
0x1bd5   :  { %6363 = dma.done.wait [#allocation5 + $0x1], 28672 }
0x1bd6   :  { %6364 = vsyncadd [#allocation5 + $0x1], 4294938624  ;;  %5104 = vmatpush3.msra.mxu1 %v6854_v50  ;;  %5157 = vmatpush3.msra.mxu0 %v7014_v18  ;;  %v9686_v50 = vld [vmem:[#allocation17_spill] sm:$0xff]  ;;  %v9695_v2 = vld [vmem:[#allocation20_spill] sm:$0xff]  ;;  %s6373_s9 = smov [#allocation7]  }
0x1bd7   :  { %5105 = vmatprep.subr.mxu1 %v6929_v1  ;;  %5158 = vmatprep.subr.mxu0 %v7089_v33  ;;  %v2100_v1 = vld [vmem:[#allocation2 + $0x2b0] sm:$0xff]  ;;  %v9710_v33 = vld [vmem:[#allocation65_spill] sm:$0xff]  ;;  %v9711_v36 = vld [vmem:[#allocation98_spill] sm:$0xff] }
0x1bd8   :  { %5106 = vmatpush3.msra.mxu1 %v6849_v49  ;;  %5159 = vmatpush3.msra.mxu0 %v7009_v17  ;;  %v9684_v49 = vld [vmem:[#allocation23_spill] sm:$0xff]  ;;  %v9703_v18 = vld [vmem:[#allocation100_spill] sm:$0xff]  ;;  %v9712_v21 = vld [vmem:[#allocation49_spill] sm:$0xff] }
0x1bd9   :  { %5107 = vmatprep.subr.mxu1 %v6924_v0  ;;  %5160 = vmatprep.subr.mxu0 %v7084_v32  ;;  %v9694_v0 = vld [vmem:[#allocation15_spill] sm:$0xff]  ;;  %v2117_v34 = vld [vmem:[#allocation2 + $0x2b8] sm:$0xff]  ;;  %v9713_v4 = vld [vmem:[#allocation82_spill] sm:$0xff] }
0x1bda   :  { %5108 = vmatpush3.msra.mxu1 %v6844_v48  ;;  %5161 = vmatpush3.msra.mxu0 %v7004_v16  ;;  %v9683_v48 = vld [vmem:[#allocation29_spill] sm:$0xff]  ;;  %v9701_v16 = vld [vmem:[#allocation52_spill] sm:$0xff]  ;;  %v9702_v17 = vld [vmem:[#allocation67_spill] sm:$0xff] }
0x1bdb   :  { %5109 = vmatprep.subr.mxu1 %v6919_v63  ;;  %5162 = vmatprep.subr.mxu0 %v7079_v31  ;;  %v9693_v63 = vld [vmem:[#allocation32_spill] sm:$0xff]  ;;  %v9708_v31 = vld [vmem:[#allocation50_spill] sm:$0xff]  ;;  %v9709_v32 = vld [vmem:[#allocation83_spill] sm:$0xff] }
0x1bdc   :  { %5110 = vmatpush3.msra.mxu1 %v6839_v47  ;;  %5163 = vmatpush3.msra.mxu0 %v6999_v15  ;;  %v9682_v47 = vld [vmem:[#allocation18_spill] sm:$0xff]  ;;  %v9700_v15 = vld [vmem:[#allocation25_spill] sm:$0xff]  ;;  %v9714_v40 = vld [vmem:[#allocation64_spill] sm:$0xff] }
0x1bdd   :  { %5111 = vmatprep.subr.mxu1 %v6914_v62  ;;  %5164 = vmatprep.subr.mxu0 %v7074_v30  ;;  %v9692_v62 = vld [vmem:[#allocation21_spill] sm:$0xff]  ;;  %v2114_v30 = vld [vmem:[#allocation2 + $0x170] sm:$0xff]  ;;  %v2131_v20 = vld [vmem:[#allocation2 + $0x2e8] sm:$0xff] }
0x1bde   :  { %5112 = vmatpush3.msra.mxu1 %v6834_v46  ;;  %5165 = vmatpush3.msra.mxu0 %v6994_v14  ;;  %v9680_v46 = vld [vmem:[#allocation24_spill] sm:$0xff]  ;;  %v2129_v54 = vld [vmem:[#allocation2 + $0x160] sm:$0xff]  ;;  %v9718_v8 = vld [vmem:[#allocation63_spill] sm:$0xff] }
0x1bdf   :  { %5113 = vmatprep.subr.mxu1 %v6909_v61  ;;  %5166 = vmatprep.subr.mxu0 %v7069_v29  ;;  %v9691_v61 = vld [vmem:[#allocation27_spill] sm:$0xff]  ;;  %v9699_v14 = vld [vmem:[#allocation68_spill] sm:$0xff]  ;;  %v9715_v22 = vld [vmem:[#allocation97_spill] sm:$0xff] }
0x1be0   :  { %5114 = vmatpush3.msra.mxu1 %v6829_v45  ;;  %5167 = vmatpush3.msra.mxu0 %v6989_v13  ;;  %v9679_v45 = vld [vmem:[#allocation30_spill] sm:$0xff]  ;;  %v2102_v13 = vld [vmem:[#allocation2 + $0x10] sm:$0xff]  ;;  %v2116_v52 = vld [vmem:[#allocation2 + $0x18] sm:$0xff] }
0x1be1   :  { %5115 = vmatprep.subr.mxu1 %v6904_v60  ;;  %5168 = vmatprep.subr.mxu0 %v7064_v28  ;;  %v9690_v60 = vld [vmem:[#allocation16_spill] sm:$0xff]  ;;  %v9706_v28 = vld [vmem:[#allocation66_spill] sm:$0xff]  ;;  %v9707_v29 = vld [vmem:[#allocation99_spill] sm:$0xff] }
0x1be2   :  { %5116 = vmatpush3.msra.mxu1 %v6824_v44  ;;  %5169 = vmatpush3.msra.mxu0 %v6984_v12  ;;  %v9678_v44 = vld [vmem:[#allocation19_spill] sm:$0xff]  ;;  %v2128_v39 = vld [vmem:[#allocation2 + $0x138] sm:$0xff]  ;;  %v2130_v7 = vld [vmem:[#allocation2 + $0xa0] sm:$0xff] }
0x1be3   :  { %5117 = vmatprep.subr.mxu1 %v6899_v59  ;;  %5170 = vmatprep.subr.mxu0 %v7059_v27  ;;  %v2101_v59 = vld [vmem:[#allocation2 + $0xd0] sm:$0xff]  ;;  %v2115_v27 = vld [vmem:[#allocation2 + $0x180] sm:$0xff]  ;;  %v2143_v5 = vld [vmem:[#allocation2 + $0x108] sm:$0xff] }
0x1be4   :  { %5118 = vmatpush3.msra.mxu1 %v6819_v43  ;;  %5171 = vmatpush3.msra.mxu0 %v6979_v11  ;;  %v9677_v43 = vld [vmem:[#allocation36_spill] sm:$0xff]  ;;  %v9697_v11 = vld [vmem:[#allocation14_spill] sm:$0xff]  ;;  %v9698_v12 = vld [vmem:[#allocation31_spill] sm:$0xff] }
0x1be5   :  { %5119 = vmatprep.subr.mxu1 %v6894_v58  ;;  %5172 = vmatprep.subr.mxu0 %v7054_v26  ;;  %v9689_v58 = vld [vmem:[#allocation33_spill] sm:$0xff]  ;;  %v9705_v26 = vld [vmem:[#allocation84_spill] sm:$0xff]  ;;  %v9720_v24 = vld [vmem:[#allocation47_spill] sm:$0xff] }
0x1be6   :  { %5120 = vmatpush3.msra.mxu1 %v6814_v42  ;;  %5173 = vmatpush3.msra.mxu0 %v6974_v10  ;;  %v9681_v42 = vld [vmem:[#allocation35_spill] sm:$0xff]  ;;  %v9716_v55 = vld [vmem:[#allocation48_spill] sm:$0xff]  ;;  %v9717_v19 = vld [vmem:[#allocation81_spill] sm:$0xff] }
0x1be7   :  { %5121 = vmatprep.subr.mxu1 %v6889_v57  ;;  %5174 = vmatprep.subr.mxu0 %v7049_v25  ;;  %v9688_v57 = vld [vmem:[#allocation22_spill] sm:$0xff]  ;;  %v9704_v25 = vld [vmem:[#allocation51_spill] sm:$0xff]  ;;  %v9719_v23 = vld [vmem:[#allocation96_spill] sm:$0xff] }
0x1be8   :  { %5122 = vmatpush3.msra.mxu1 %v6809_v41  ;;  %5175 = vmatpush3.msra.mxu0 %v6969_v9  ;;  %v9685_v41 = vld [vmem:[#allocation34_spill] sm:$0xff]  ;;  %v9721_v51 = vld [vmem:[#allocation80_spill] sm:$0xff]  ;;  %v9723_v53 = vld [vmem:[#allocation95_spill] sm:$0xff] }
0x1be9   :  { %5123 = vmatprep.subr.mxu1 %v6884_v56  ;;  %5176 = vmatprep.subr.mxu0 %v9677_v43  ;;  %v9687_v56 = vld [vmem:[#allocation28_spill] sm:$0xff]  ;;  %v9696_v9 = vld [vmem:[#allocation26_spill] sm:$0xff]  ;;  %v9725_v43 = vld [vmem:[#allocation79_spill] sm:$0xff] }
0x1bea   :  { %5124 = vmatpush3.msra.mxu1 %v9678_v44  ;;  %5177 = vmatpush3.msra.mxu0 %v9679_v45  ;;  %v2103_v10 = vld [vmem:[#allocation2 + $0x48] sm:$0xff]  ;;  %v9726_v44 = vld [vmem:[#allocation61_spill] sm:$0xff]  ;;  %v2145_v45 = vld [vmem:[#allocation2 + $0x290] sm:$0xff] }
0x1beb   :  { %5125 = vmatprep.subr.mxu1 %v9680_v46  ;;  %5178 = vmatprep.subr.mxu0 %v9681_v42  ;;  %v9722_v35 = vld [vmem:[#allocation62_spill] sm:$0xff] }
0x1bec   :  { %5126 = vmatpush3.msra.mxu1 %v9682_v47  ;;  %5179 = vmatpush3.msra.mxu0 %v9683_v48  ;;  %v2142_v3 = vld [vmem:[#allocation2 + $0x288] sm:$0xff]  ;;  %v2144_v42 = vld [vmem:[#allocation2 + $0xc0] sm:$0xff] }
0x1bed   :  { %5127 = vmatprep.subr.mxu1 %v9684_v49  ;;  %5180 = vmatprep.subr.mxu0 %v9685_v41  ;;  %v9724_v37 = vld [vmem:[#allocation46_spill] sm:$0xff]  ;;  %v9728_v47 = vld [vmem:[#allocation45_spill] sm:$0xff]  ;;  %v9730_v49 = vld [vmem:[#allocation60_spill] sm:$0xff] }
0x1bee   :  { %5128 = vmatpush3.msra.mxu1 %v9686_v50  ;;  %5181 = vmatpush3.msra.mxu0 %v9687_v56  ;;  %v9727_v46 = vld [vmem:[#allocation94_spill] sm:$0xff]  ;;  %v9731_v50 = vld [vmem:[#allocation93_spill] sm:$0xff] }
0x1bef   :  { %5129 = vmatprep.subr.mxu1 %v9688_v57  ;;  %5182 = vmatprep.subr.mxu0 %v9689_v58  ;;  %v9729_v48 = vld [vmem:[#allocation78_spill] sm:$0xff]  ;;  %v9732_v57 = vld [vmem:[#allocation44_spill] sm:$0xff]  ;;  %v9733_v58 = vld [vmem:[#allocation77_spill] sm:$0xff] }
0x1bf0   :  { %5130 = vmatpush3.msra.mxu1 %v9690_v60  ;;  %5183 = vmatpush3.msra.mxu0 %v9691_v61  ;;  %v2157_v41 = vld [vmem:[#allocation2 + $0x148] sm:$0xff]  ;;  %v9735_v61 = vld [vmem:[#allocation92_spill] sm:$0xff] }
0x1bf1   :  { %5131 = vmatprep.subr.mxu1 %v9692_v62  ;;  %5184 = vmatprep.subr.mxu0 %v9693_v63  ;;  %v2156_v56 = vld [vmem:[#allocation2 + $0x2c8] sm:$0xff] }
0x1bf2   :  { %5132 = vmatpush3.msra.mxu1 %v9694_v0  ;;  %2496 = vmatprep.mubr.f32.mxu1 %v2101_v59  ;;  %v9734_v59 = vld [vmem:[#allocation59_spill] sm:$0xff]  ;;  %v9737_v0 = vld [vmem:[#allocation76_spill] sm:$0xff] }
0x1bf3   :  { %5133 = vmatprep.subr.mxu1 %v9695_v2  ;;  %5185 = vmatpush3.msra.mxu0 %v9696_v9  ;;  %v2159_v60 = vld [vmem:[#allocation2 + $0x188] sm:$0xff]  ;;  %v2171_v2 = vld [vmem:[#allocation2 + $0x2a0] sm:$0xff] }
0x1bf4   :  { %5134 = vmatpush3.msra.mxu1 %v9697_v11  ;;  %5186 = vmatprep.subr.mxu0 %v9698_v12  ;;  %v2158_v62 = vld [vmem:[#allocation2 + $0x68] sm:$0xff] }
0x1bf5   :  { %2497 = vmatmul.mubr.f32.vlgmr.msra.gmra.mxu1 %v2100_v1  ;;  %5209 = vmatprep.subr.mxu1 %v9699_v14  ;;  %v9736_v63 = vld [vmem:[#allocation43_spill] sm:$0xff]  ;;  %v9738_v1 = vld [vmem:[#allocation58_spill] sm:$0xff]  ;;  %v2173_v14 = vld [vmem:[#allocation2 + $0x58] sm:$0xff] }
0x1bf6   :  { %5187 = vmatpush3.msra.mxu0 %v9700_v15  ;;  %2596 = vmatprep.mubr.f32.mxu0 %v2103_v10  ;;  %v9739_v9 = vld [vmem:[#allocation91_spill] sm:$0xff]  ;;  %v2170_v10 = vld [vmem:[#allocation2 + $0x280] sm:$0xff] }
0x1bf7   :  { %5210 = vmatpush3.msra.mxu1 %v9701_v16  ;;  %2597 = vmatmul.mubr.f32.vlgmr.msra.gmra.mxu0 %v2102_v13  ;;  %v9740_v11 = vld [vmem:[#allocation42_spill] sm:$0xff]  ;;  %v9741_v12 = vld [vmem:[#allocation75_spill] sm:$0xff]  ;;  %v9742_v13 = vld [vmem:[#allocation57_spill] sm:$0xff] }
0x1bf8   :  { %5211 = vmatprep.subr.mxu1 %v9702_v17  ;;  %5262 = vmatprep.subr.mxu0 %v9703_v18  ;;  %v9743_v15 = vld [vmem:[#allocation90_spill] sm:$0xff]  ;;  %v2172_v16 = vld [vmem:[#allocation2 + $0x110] sm:$0xff]  ;;  %v9744_v17 = vld [vmem:[#allocation41_spill] sm:$0xff] }
0x1bf9   :  { %5212 = vmatpush3.msra.mxu1 %v9704_v25  ;;  %5263 = vmatpush3.msra.mxu0 %v9705_v26  ;;  %v9745_v18 = vld [vmem:[#allocation74_spill] sm:$0xff]  ;;  %v9746_v25 = vld [vmem:[#allocation56_spill] sm:$0xff]  ;;  %v2185_v26 = vld [vmem:[#allocation2 + $0x50] sm:$0x3] }
0x1bfa   :  { %5213 = vmatprep.subr.mxu1 %v9706_v28  ;;  %5264 = vmatprep.subr.mxu0 %v9707_v29  ;;  %v2184_v28 = vld [vmem:[#allocation2 + $0x178] sm:$0x3] }
0x1bfb   :  { %5214 = vmatpush3.msra.mxu1 %v9708_v31  ;;  %5265 = vmatpush3.msra.mxu0 %v9709_v32  ;;  %v9748_v29 = vld [vmem:[#allocation40_spill] sm:$0xff]  ;;  %v9750_v31 = vld [vmem:[#allocation55_spill] sm:$0xff]  ;;  %v2187_v32 = vld [vmem:[#allocation2 + $0xc8] sm:$0x3] }
0x1bfc   :  { %2501 = vmatprep.mubr.f32.mxu1 %v2115_v27  ;;  %5215 = vmatprep.subr.mxu1 %v9710_v33  ;;  %v9747_v27 = vld [vmem:[#allocation89_spill] sm:$0xff]  ;;  %v9751_v33 = vld [vmem:[#allocation88_spill] sm:$0xff] }
0x1bfd   :  { %5266 = vmatprep.subr.mxu0 %v9711_v36  ;;  %2502 = vmatmul.mubr.f32.gmra.mxu1 %v2114_v30  ;;  %v9749_v30 = vld [vmem:[#allocation73_spill] sm:$0xff]  ;;  %v9752_v36 = vld [vmem:[#allocation39_spill] sm:$0xff] }
0x1bfe   :  { %5216 = vmatpush3.msra.mxu1 %v9712_v21  ;;  %5267 = vmatpush3.msra.mxu0 %v9713_v4  ;;  %v9754_v21 = vld [vmem:[#allocation54_spill] sm:$0xff]  ;;  %v9755_v4 = vld [vmem:[#allocation87_spill] sm:$0xff] }
0x1bff   :  { %2601 = vmatprep.mubr.f32.mxu0 %v2117_v34  ;;  %5217 = vmatprep.subr.mxu1 %v9714_v40  ;;  %v2186_v34 = vld [vmem:[#allocation2 + $0x120] sm:$0x3]  ;;  %v2105_v40 = vld [vmem:[#allocation2 + $0xf0] sm:$0xff] }
0x1c00   :  { %5268 = vmatprep.subr.mxu0 %v9715_v22  ;;  %2602 = vmatmul.mubr.f32.gmra.mxu0 %v2116_v52  ;;  %v9753_v52 = vld [vmem:[#allocation72_spill] sm:$0xff]  ;;  %v9757_v22 = vld [vmem:[#allocation71_spill] sm:$0xff] }
0x1c01   :  { %5218 = vmatpush3.msra.mxu1 %v9716_v55  ;;  %5269 = vmatpush3.msra.mxu0 %v9717_v19  ;;  %v9758_v55 = vld [vmem:[#allocation53_spill] sm:$0xff]  ;;  %v9759_v19 = vld [vmem:[#allocation86_spill] sm:$0xff] }
0x1c02   :  { %2506 = vmatprep.mubr.f32.mxu1 %v2129_v54  ;;  %5219 = vmatprep.subr.mxu1 %v9718_v8  ;;  %v9756_v54 = vld [vmem:[#allocation38_spill] sm:$0xff]  ;;  %v9760_v8 = vld [vmem:[#allocation37_spill] sm:$0xff] }
0x1c03   :  { %5270 = vmatprep.subr.mxu0 %v9719_v23  ;;  %2507 = vmatmul.mubr.f32.gmra.mxu1 %v2128_v39  ;;  %v2104_v39 = vld [vmem:[#allocation2 + $0x30] sm:$0xff]  ;;  %v9761_v23 = vld [vmem:[#allocation70_spill] sm:$0xff] }
0x1c04   :  { %5220 = vmatpush3.msra.mxu1 %v9720_v24  ;;  %5271 = vmatpush3.msra.mxu0 %v9721_v51  ;;  %v9762_v24 = vld [vmem:[#allocation85_spill] sm:$0xff]  ;;  %v9763_v51 = vld [vmem:[#allocation132_spill] sm:$0xff] }
0x1c05   :  { %2606 = vmatprep.mubr.f32.mxu0 %v2131_v20  ;;  %5221 = vmatprep.subr.mxu1 %v9722_v35  ;;  %v2107_v20 = vld [vmem:[#allocation2 + $0x78] sm:$0xff] }
0x1c06   :  { %5272 = vmatprep.subr.mxu0 %v9723_v53  ;;  %2607 = vmatmul.mubr.f32.gmra.mxu0 %v2130_v7  ;;  %v2106_v7 = vld [vmem:[#allocation2 + $0xf8] sm:$0xff] }
0x1c07   :  { %5222 = vmatpush3.msra.mxu1 %v9724_v37  ;;  %5273 = vmatpush3.msra.mxu0 %v9725_v43  ;;  %v9764_v35 = vld [vmem:[#allocation69_spill] sm:$0xff]  ;;  %v9765_v53 = vld [vmem:[#allocation116_spill] sm:$0xff]  ;;  %v9766_v37 = vld [vmem:[#allocation131_spill] sm:$0xff] }
0x1c08   :  { %2511 = vmatprep.mubr.f32.mxu1 %v2143_v5  ;;  %5223 = vmatprep.subr.mxu1 %v9726_v44  ;;  %v2119_v5 = vld [vmem:[#allocation2 + $0x28] sm:$0xff]  ;;  %v9767_v43 = vld [vmem:[#allocation164_spill] sm:$0xff] }
0x1c09   :  { %5274 = vmatprep.subr.mxu0 %v9727_v46  ;;  %2512 = vmatmul.mubr.f32.gmra.mxu1 %v2142_v3  ;;  %v2118_v3 = vld [vmem:[#allocation2 + $0x250] sm:$0xff] }
0x1c0a   :  { %5224 = vmatpush3.msra.mxu1 %v9728_v47  ;;  %5275 = vmatpush3.msra.mxu0 %v9729_v48  ;;  %v9768_v44 = vld [vmem:[#allocation115_spill] sm:$0xff]  ;;  %v9769_v46 = vld [vmem:[#allocation148_spill] sm:$0xff] }
0x1c0b   :  { %2611 = vmatprep.mubr.f32.mxu0 %v2145_v45  ;;  %5225 = vmatprep.subr.mxu1 %v9730_v49  ;;  %v2121_v45 = vld [vmem:[#allocation2 + $0x230] sm:$0xff]  ;;  %v9772_v49 = vld [vmem:[#allocation114_spill] sm:$0xff] }
0x1c0c   :  { %5276 = vmatprep.subr.mxu0 %v9731_v50  ;;  %2612 = vmatmul.mubr.f32.gmra.mxu0 %v2144_v42  ;;  %v9770_v42 = vld [vmem:[#allocation130_spill] sm:$0xff]  ;;  %v9771_v47 = vld [vmem:[#allocation163_spill] sm:$0xff] }
0x1c0d   :  { %5226 = vmatpush3.msra.mxu1 %v9732_v57  ;;  %5277 = vmatpush3.msra.mxu0 %v9733_v58  ;;  %v2120_v48 = vld [vmem:[#allocation2 + $0x70] sm:$0xff]  ;;  %v9775_v58 = vld [vmem:[#allocation162_spill] sm:$0xff] }
0x1c0e   :  { %2516 = vmatprep.mubr.f32.mxu1 %v2157_v41  ;;  %5227 = vmatprep.subr.mxu1 %v9734_v59  ;;  %v2133_v41 = vld [vmem:[#allocation2 + $0x1c0] sm:$0xff]  ;;  %v9773_v50 = vld [vmem:[#allocation147_spill] sm:$0xff] }
0x1c0f   :  { %5278 = vmatprep.subr.mxu0 %v9735_v61  ;;  %2517 = vmatmul.mubr.f32.gmra.mxu1 %v2156_v56  ;;  %v9774_v56 = vld [vmem:[#allocation129_spill] sm:$0xff]  ;;  %v2132_v57 = vld [vmem:[#allocation2 + $0x1b0] sm:$0xff]  ;;  %v9777_v61 = vld [vmem:[#allocation146_spill] sm:$0xff] }
0x1c10   :  { %5228 = vmatpush3.msra.mxu1 %v9736_v63  ;;  %5279 = vmatpush3.msra.mxu0 %v9737_v0  ;;  %v9776_v59 = vld [vmem:[#allocation113_spill] sm:$0xff]  ;;  %v2134_v0 = vld [vmem:[#allocation2 + $0x88] sm:$0xff] }
0x1c11   :  { %2616 = vmatprep.mubr.f32.mxu0 %v2159_v60  ;;  %5229 = vmatprep.subr.mxu1 %v9738_v1  ;;  %v2135_v60 = vld [vmem:[#allocation2 + $0x190] sm:$0xff]  ;;  %v9779_v63 = vld [vmem:[#allocation161_spill] sm:$0xff] }
0x1c12   :  { %5280 = vmatprep.subr.mxu0 %v9739_v9  ;;  %2617 = vmatmul.mubr.f32.gmra.mxu0 %v2158_v62  ;;  %v9778_v62 = vld [vmem:[#allocation128_spill] sm:$0xff]  ;;  %v9781_v9 = vld [vmem:[#allocation145_spill] sm:$0xff] }
0x1c13   :  { %5230 = vmatpush3.msra.mxu1 %v9740_v11  ;;  %5281 = vmatpush3.msra.mxu0 %v9741_v12  ;;  %v9780_v1 = vld [vmem:[#allocation112_spill] sm:$0xff]  ;;  %v2146_v11 = vld [vmem:[#allocation2 + $0x308] sm:$0xff] }
0x1c14   :  { %2521 = vmatprep.mubr.f32.mxu1 %v2171_v2  ;;  %5231 = vmatprep.subr.mxu1 %v9742_v13  ;;  %v2147_v2 = vld [vmem:[#allocation2] sm:$0xff]  ;;  %v9783_v12 = vld [vmem:[#allocation160_spill] sm:$0xff]  ;;  %v9784_v13 = vld [vmem:[#allocation111_spill] sm:$0xff] }
0x1c15   :  { %5282 = vmatprep.subr.mxu0 %v9743_v15  ;;  %2522 = vmatmul.mubr.f32.gmra.mxu1 %v2170_v10  ;;  %v9782_v10 = vld [vmem:[#allocation127_spill] sm:$0xff]  ;;  %v9785_v15 = vld [vmem:[#allocation144_spill] sm:$0xff] }
0x1c16   :  { %5232 = vmatpush3.msra.mxu1 %v9744_v17  ;;  %5283 = vmatpush3.msra.mxu0 %v9745_v18  ;;  %v9787_v17 = vld [vmem:[#allocation159_spill] sm:$0xff]  ;;  %v2148_v18 = vld [vmem:[#allocation2 + $0xe0] sm:$0xff] }
0x1c17   :  { %2621 = vmatprep.mubr.f32.mxu0 %v2173_v14  ;;  %5233 = vmatprep.subr.mxu1 %v9746_v25  ;;  %v2149_v14 = vld [vmem:[#allocation2 + $0x98] sm:$0xff]  ;;  %v9788_v25 = vld [vmem:[#allocation110_spill] sm:$0xff] }
0x1c18   :  { %5284 = vmatprep.subr.mxu0 %v9747_v27  ;;  %2622 = vmatmul.mubr.f32.gmra.mxu0 %v2172_v16  ;;  %v9786_v16 = vld [vmem:[#allocation126_spill] sm:$0xff]  ;;  %v9789_v27 = vld [vmem:[#allocation143_spill] sm:$0xff] }
0x1c19   :  { %5234 = vmatpush3.msra.mxu1 %v9748_v29  ;;  %5285 = vmatpush3.msra.mxu0 %v9749_v30  ;;  %v2160_v29 = vld [vmem:[#allocation2 + $0x158] sm:$0xff]  ;;  %v9791_v30 = vld [vmem:[#allocation158_spill] sm:$0xff] }
0x1c1a   :  { %2526 = vmatprep.mubr.f32.mxu1 %v2185_v26  ;;  %5235 = vmatprep.subr.mxu1 %v9750_v31  ;;  %v2161_v26 = vld [vmem:[#allocation2 + $0x1a0] sm:$0xff] }
0x1c1b   :  { %5286 = vmatprep.subr.mxu0 %v9751_v33  ;;  %2527 = vmatmul.mubr.f32.gmra.mxu1 %v2184_v28  ;;  %v9790_v28 = vld [vmem:[#allocation125_spill] sm:$0xff]  ;;  %v9793_v33 = vld [vmem:[#allocation142_spill] sm:$0xff] }
0x1c1c   :  { %5236 = vmatpush3.msra.mxu1 %v9752_v36  ;;  %5287 = vmatpush3.msra.mxu0 %v9753_v52  ;;  %v9792_v31 = vld [vmem:[#allocation109_spill] sm:$0xff]  ;;  %v2162_v52 = vld [vmem:[#allocation2 + $0x90] sm:$0xff] }
0x1c1d   :  { %2626 = vmatprep.mubr.f32.mxu0 %v2187_v32  ;;  %5237 = vmatprep.subr.mxu1 %v9754_v21  ;;  %v2163_v32 = vld [vmem:[#allocation2 + $0x118] sm:$0xff] }
0x1c1e   :  { %5288 = vmatprep.subr.mxu0 %v9755_v4  ;;  %2627 = vmatmul.mubr.f32.gmra.mxu0 %v2186_v34  ;;  %v9794_v34 = vld [vmem:[#allocation124_spill] sm:$0xff]  ;;  %v9795_v36 = vld [vmem:[#allocation157_spill] sm:$0xff]  ;;  %v2175_v4 = vld [vmem:[#allocation2 + $0x1c8] sm:$0xff] }
0x1c1f   :  { %5238 = vmatpush3.msra.mxu1 %v9756_v54  ;;  %5289 = vmatpush3.msra.mxu0 %v9757_v22  ;;  %v9796_v21 = vld [vmem:[#allocation108_spill] sm:$0xff]  ;;  %v9798_v54 = vld [vmem:[#allocation123_spill] sm:$0xff] }
0x1c20   :  { %5239 = vmatprep.subr.mxu1 %v9758_v55  ;;  %5290 = vmatprep.subr.mxu0 %v9759_v19  ;;  %v2174_v22 = vld [vmem:[#allocation2 + $0x1f0] sm:$0xff]  ;;  %v2177_v19 = vld [vmem:[#allocation2 + $0x1e0] sm:$0xff] }
0x1c21   :  { %5240 = vmatpush3.msra.mxu1 %v9760_v8  ;;  %2696 = vmatprep.mubr.f32.mxu1 %v2105_v40  ;;  %v9797_v40 = vld [vmem:[#allocation141_spill] sm:$0xff]  ;;  %v9800_v55 = vld [vmem:[#allocation107_spill] sm:$0xff]  ;;  %v9801_v8 = vld [vmem:[#allocation140_spill] sm:$0xff] }
0x1c22   :  { %5291 = vmatpush3.msra.mxu0 %v9761_v23  ;;  %2697 = vmatmul.mubr.f32.vlgmr.msra.gmra.mxu1 %v2104_v39  ;;  %v9799_v39 = vld [vmem:[#allocation156_spill] sm:$0xff]  ;;  %v9803_v23 = vld [vmem:[#allocation155_spill] sm:$0xff] }
0x1c23   :  { %5292 = vmatprep.subr.mxu0 %v9762_v24  ;;  %5315 = vmatprep.subr.mxu1 %v9763_v51  ;;  %v9804_v24 = vld [vmem:[#allocation106_spill] sm:$0xff]  ;;  %v2189_v51 = vld [vmem:[#allocation2 + $0x2f8] sm:$0x3] }
0x1c24   :  { %5293 = vmatpush3.msra.mxu0 %v9764_v35  ;;  %2796 = vmatprep.mubr.f32.mxu0 %v2107_v20  ;;  %v9802_v20 = vld [vmem:[#allocation122_spill] sm:$0xff]  ;;  %v9805_v35 = vld [vmem:[#allocation139_spill] sm:$0xff] }
0x1c25   :  { %5316 = vmatpush3.msra.mxu1 %v9765_v53  ;;  %2797 = vmatmul.mubr.f32.vlgmr.msra.gmra.mxu0 %v2106_v7  ;;  %v2176_v7 = vld [vmem:[#allocation2 + $0x2d8] sm:$0xff]  ;;  %v2188_v53 = vld [vmem:[#allocation2 + $0x1e8] sm:$0x3] }
0x1c26   :  { %5317 = vmatprep.subr.mxu1 %v9766_v37  ;;  %5368 = vmatprep.subr.mxu0 %v9767_v43  ;;  %v9808_v37 = vld [vmem:[#allocation105_spill] sm:$0xff]  ;;  %v2191_v43 = vld [vmem:[#allocation2 + $0x278] sm:$0x3] }
0x1c27   :  { %2701 = vmatprep.mubr.f32.mxu1 %v2119_v5  ;;  %5318 = vmatpush3.msra.mxu1 %v9768_v44  ;;  %v9806_v5 = vld [vmem:[#allocation121_spill] sm:$0xff]  ;;  %v9809_v44 = vld [vmem:[#allocation138_spill] sm:$0xff] }
0x1c28   :  { %5369 = vmatpush3.msra.mxu0 %v9769_v46  ;;  %2702 = vmatmul.mubr.f32.gmra.mxu1 %v2118_v3  ;;  %v9807_v3 = vld [vmem:[#allocation154_spill] sm:$0xff]  ;;  %v9811_v46 = vld [vmem:[#allocation153_spill] sm:$0xff] }
0x1c29   :  { %5319 = vmatprep.subr.mxu1 %v9770_v42  ;;  %5370 = vmatprep.subr.mxu0 %v9771_v47  ;;  %v2190_v42 = vld [vmem:[#allocation2 + $0x270] sm:$0x3]  ;;  %v9812_v47 = vld [vmem:[#allocation104_spill] sm:$0xff] }
0x1c2a   :  { %2801 = vmatprep.mubr.f32.mxu0 %v2121_v45  ;;  %5320 = vmatpush3.msra.mxu1 %v9772_v49  ;;  %v9810_v45 = vld [vmem:[#allocation120_spill] sm:$0xff]  ;;  %v9814_v49 = vld [vmem:[#allocation119_spill] sm:$0xff] }
0x1c2b   :  { %5371 = vmatpush3.msra.mxu0 %v9773_v50  ;;  %5321 = vmatprep.subr.mxu1 %v9774_v56  ;;  %v9816_v50 = vld [vmem:[#allocation103_spill] sm:$0xff]  ;;  %v9817_v56 = vld [vmem:[#allocation136_spill] sm:$0xff] }
0x1c2c   :  { %2802 = vmatmul.mubr.f32.gmra.mxu0 %v2120_v48  ;;  %5372 = vmatprep.subr.mxu0 %v9775_v58  ;;  %v9813_v48 = vld [vmem:[#allocation137_spill] sm:$0xff]  ;;  %v9819_v58 = vld [vmem:[#allocation151_spill] sm:$0xff] }
0x1c2d   :  { %2706 = vmatprep.mubr.f32.mxu1 %v2133_v41  ;;  %5322 = vmatpush3.msra.mxu1 %v9776_v59  ;;  %v9815_v41 = vld [vmem:[#allocation152_spill] sm:$0xff] }
0x1c2e   :  { %5373 = vmatpush3.msra.mxu0 %v9777_v61  ;;  %2707 = vmatmul.mubr.f32.gmra.mxu1 %v2132_v57  ;;  %v9818_v57 = vld [vmem:[#allocation118_spill] sm:$0xff]  ;;  %v2109_v59 = vld [vmem:[#allocation2 + $0x130] sm:$0xff] }
0x1c2f   :  { %5323 = vmatprep.subr.mxu1 %v9778_v62  ;;  %5374 = vmatprep.subr.mxu0 %v9779_v63  ;;  %v9821_v61 = vld [vmem:[#allocation135_spill] sm:$0xff]  ;;  %v2108_v62 = vld [vmem:[#allocation2 + $0x300] sm:$0xff] }
0x1c30   :  { %2806 = vmatprep.mubr.f32.mxu0 %v2135_v60  ;;  %5324 = vmatpush3.msra.mxu1 %v9780_v1  ;;  %v9820_v60 = vld [vmem:[#allocation102_spill] sm:$0xff]  ;;  %v9822_v63 = vld [vmem:[#allocation117_spill] sm:$0xff] }
0x1c31   :  { %5375 = vmatpush3.msra.mxu0 %v9781_v9  ;;  %5325 = vmatprep.subr.mxu1 %v9782_v10  ;;  %v9824_v1 = vld [vmem:[#allocation101_spill] sm:$0xff]  ;;  %v9825_v9 = vld [vmem:[#allocation134_spill] sm:$0xff] }
0x1c32   :  { %2807 = vmatmul.mubr.f32.gmra.mxu0 %v2134_v0  ;;  %5376 = vmatprep.subr.mxu0 %v9783_v12  ;;  %v9823_v0 = vld [vmem:[#allocation150_spill] sm:$0xff]  ;;  %v9827_v12 = vld [vmem:[#allocation196_spill] sm:$0xff] }
0x1c33   :  { %2711 = vmatprep.mubr.f32.mxu1 %v2147_v2  ;;  %5326 = vmatpush3.msra.mxu1 %v9784_v13  ;;  %v2111_v2 = vld [vmem:[#allocation2 + $0x40] sm:$0xff]  ;;  %v2110_v10 = vld [vmem:[#allocation2 + $0xe8] sm:$0xff] }
0x1c34   :  { %5377 = vmatpush3.msra.mxu0 %v9785_v15  ;;  %2712 = vmatmul.mubr.f32.gmra.mxu1 %v2146_v11  ;;  %v9826_v11 = vld [vmem:[#allocation149_spill] sm:$0xff]  ;;  %v2125_v15 = vld [vmem:[#allocation2 + $0x228] sm:$0xff] }
0x1c35   :  { %5327 = vmatprep.subr.mxu1 %v9786_v16  ;;  %5378 = vmatprep.subr.mxu0 %v9787_v17  ;;  %v2123_v13 = vld [vmem:[#allocation2 + $0x100] sm:$0xff]  ;;  %v9829_v16 = vld [vmem:[#allocation180_spill] sm:$0xff] }
0x1c36   :  { %2811 = vmatprep.mubr.f32.mxu0 %v2149_v14  ;;  %5328 = vmatpush3.msra.mxu1 %v9788_v25  ;;  %v9828_v14 = vld [vmem:[#allocation133_spill] sm:$0xff]  ;;  %v2122_v17 = vld [vmem:[#allocation2 + $0xb0] sm:$0xff] }
0x1c37   :  { %5379 = vmatpush3.msra.mxu0 %v9789_v27  ;;  %5329 = vmatprep.subr.mxu1 %v9790_v28  ;;  %v2124_v25 = vld [vmem:[#allocation2 + $0x1b8] sm:$0xff]  ;;  %v2137_v27 = vld [vmem:[#allocation2 + $0x80] sm:$0xff] }
0x1c38   :  { %2812 = vmatmul.mubr.f32.gmra.mxu0 %v2148_v18  ;;  %5380 = vmatprep.subr.mxu0 %v9791_v30  ;;  %v9830_v18 = vld [vmem:[#allocation195_spill] sm:$0xff]  ;;  %v9832_v28 = vld [vmem:[#allocation194_spill] sm:$0xff] }
0x1c39   :  { %2716 = vmatprep.mubr.f32.mxu1 %v2161_v26  ;;  %5330 = vmatpush3.msra.mxu1 %v9792_v31  ;;  %v9831_v26 = vld [vmem:[#allocation179_spill] sm:$0xff]  ;;  %v9834_v31 = vld [vmem:[#allocation193_spill] sm:$0xff] }
0x1c3a   :  { %5381 = vmatpush3.msra.mxu0 %v9793_v33  ;;  %2717 = vmatmul.mubr.f32.gmra.mxu1 %v2160_v29  ;;  %v9833_v29 = vld [vmem:[#allocation178_spill] sm:$0xff]  ;;  %v2136_v30 = vld [vmem:[#allocation2 + $0x210] sm:$0xff] }
0x1c3b   :  { %5331 = vmatprep.subr.mxu1 %v9794_v34  ;;  %5382 = vmatprep.subr.mxu0 %v9795_v36  ;;  %v2139_v33 = vld [vmem:[#allocation2 + $0x220] sm:$0xff]  ;;  %v9836_v36 = vmov 0  }
0x1c3c   :  { %2816 = vmatprep.mubr.f32.mxu0 %v2163_v32  ;;  %5332 = vmatpush3.msra.mxu1 %v9796_v21  ;;  %v4847_v32 = vld [vmem:[#allocation6] ss:$0 sm:$0xff]  ;;  %v9837_v21 = vld [vmem:[#allocation192_spill] sm:$0xff] }
0x1c3d   :  { %5383 = vmatpush3.msra.mxu0 %v9797_v40  ;;  %5333 = vmatprep.subr.mxu1 %v9798_v54  ;;  %v9835_v34 = vld [vmem:[#allocation177_spill] sm:$0xff]  ;;  %v2153_v40 = vld [vmem:[#allocation2 + $0x2f0] sm:$0xff] }
0x1c3e   :  { %2817 = vmatmul.mubr.f32.gmra.mxu0 %v2162_v52  ;;  %5384 = vmatprep.subr.mxu0 %v9799_v39  ;;  %v2138_v52 = vld [vmem:[#allocation2 + $0x198] sm:$0xff]  ;;  %v9839_v39 = vld [vmem:[#allocation191_spill] sm:$0xff] }
0x1c3f   :  { %2721 = vmatprep.mubr.f32.mxu1 %v2175_v4  ;;  %5334 = vmatpush3.msra.mxu1 %v9800_v55  ;;  %v2151_v4 = vld [vmem:[#allocation2 + $0x2e0] sm:$0xff]  ;;  %v9838_v54 = vld [vmem:[#allocation176_spill] sm:$0xff] }
0x1c40   :  { %5385 = vmatpush3.msra.mxu0 %v9801_v8  ;;  %2722 = vmatmul.mubr.f32.gmra.mxu1 %v2174_v22  ;;  %v2150_v22 = vld [vmem:[#allocation2 + $0x1f8] sm:$0xff]  ;;  %v2152_v55 = vld [vmem:[#allocation2 + $0x200] sm:$0xff] }
0x1c41   :  { %5335 = vmatprep.subr.mxu1 %v9802_v20  ;;  %5386 = vmatprep.subr.mxu0 %v9803_v23  ;;  %v2165_v8 = vld [vmem:[#allocation2 + $0xb8] sm:$0xff]  ;;  %v9841_v20 = vld [vmem:[#allocation190_spill] sm:$0xff]  ;;  %v2167_v23 = vld [vmem:[#allocation2 + $0x150] sm:$0xff] }
0x1c42   :  { %2821 = vmatprep.mubr.f32.mxu0 %v2177_v19  ;;  %5336 = vmatpush3.msra.mxu1 %v9804_v24  ;;  %v9840_v19 = vld [vmem:[#allocation175_spill] sm:$0xff] }
0x1c43   :  { %5387 = vmatpush3.msra.mxu0 %v9805_v35  ;;  %5337 = vmatprep.subr.mxu1 %v9806_v5  ;;  %v2164_v24 = vld [vmem:[#allocation2 + $0x208] sm:$0xff]  ;;  %v2166_v35 = vld [vmem:[#allocation2 + $0x238] sm:$0xff] }
0x1c44   :  { %2822 = vmatmul.mubr.f32.gmra.mxu0 %v2176_v7  ;;  %5388 = vmatprep.subr.mxu0 %v9807_v3  ;;  %v9842_v7 = vld [vmem:[#allocation174_spill] sm:$0xff]  ;;  %v9844_v5 = vld [vmem:[#allocation173_spill] sm:$0xff]  ;;  %v9845_v3 = vld [vmem:[#allocation188_spill] sm:$0xff] }
0x1c45   :  { %2726 = vmatprep.mubr.f32.mxu1 %v2189_v51  ;;  %5338 = vmatpush3.msra.mxu1 %v9808_v37  ;;  %v9843_v51 = vld [vmem:[#allocation189_spill] sm:$0xff] }
0x1c46   :  { %5389 = vmatpush3.msra.mxu0 %v9809_v44  ;;  %2727 = vmatmul.mubr.f32.gmra.mxu1 %v2188_v53  ;;  %v2179_v53 = vld [vmem:[#allocation2 + $0xd8] sm:$0xff]  ;;  %v2181_v37 = vld [vmem:[#allocation2 + $0x20] sm:$0xff] }
0x1c47   :  { %5339 = vmatprep.subr.mxu1 %v9810_v45  ;;  %5390 = vmatprep.subr.mxu0 %v9811_v46  ;;  %v2178_v44 = vld [vmem:[#allocation2 + $0x1d8] sm:$0xff]  ;;  %v9847_v45 = vld [vmem:[#allocation187_spill] sm:$0xff] }
0x1c48   :  { %2826 = vmatprep.mubr.f32.mxu0 %v2191_v43  ;;  %5340 = vmatpush3.msra.mxu1 %v9812_v47  ;;  %v9846_v43 = vld [vmem:[#allocation172_spill] sm:$0xff]  ;;  %v2193_v47 = vld [vmem:[#allocation2 + $0x128] sm:$0x3] }
0x1c49   :  { %5391 = vmatpush3.msra.mxu0 %v9813_v48  ;;  %5341 = vmatprep.subr.mxu1 %v9814_v49  ;;  %v2180_v46 = vld [vmem:[#allocation2 + $0x298] sm:$0xff]  ;;  %v9849_v48 = vld [vmem:[#allocation186_spill] sm:$0xff] }
0x1c4a   :  { %2827 = vmatmul.mubr.f32.gmra.mxu0 %v2190_v42  ;;  %5392 = vmatprep.subr.mxu0 %v9815_v41  ;;  %v9848_v42 = vld [vmem:[#allocation171_spill] sm:$0xff]  ;;  %v2195_v49 = vld [vmem:[#allocation2 + $0x1a8] sm:$0x3] }
0x1c4b   :  { %5342 = vmatpush3.msra.mxu1 %v9816_v50  ;;  %5393 = vmatpush3.msra.mxu0 %v9817_v56  ;;  %v9850_v41 = vld [vmem:[#allocation170_spill] sm:$0xff]  ;;  %v2192_v50 = vld [vmem:[#allocation2 + $0x140] sm:$0x3] }
0x1c4c   :  { %5343 = vmatprep.subr.mxu1 %v9818_v57  ;;  %5394 = vmatprep.subr.mxu0 %v9819_v58  ;;  %v9851_v56 = vld [vmem:[#allocation185_spill] sm:$0xff] }
0x1c4d   :  { %5344 = vmatpush3.msra.mxu1 %v9820_v60  ;;  %5395 = vmatpush3.msra.mxu0 %v9821_v61  ;;  %v2194_v57 = vld [vmem:[#allocation2 + $0x60] sm:$0x3]  ;;  %v9853_v60 = vld [vmem:[#allocation184_spill] sm:$0xff] }
0x1c4e   :  { %5345 = vmatprep.subr.mxu1 %v9822_v63  ;;  %5396 = vmatprep.subr.mxu0 %v9823_v0  ;;  %v9852_v58 = vld [vmem:[#allocation169_spill] sm:$0xff]  ;;  %v9854_v61 = vld [vmem:[#allocation168_spill] sm:$0xff]  ;;  %v9856_v63 = vld [vmem:[#allocation167_spill] sm:$0xff] }
0x1c4f   :  { %5346 = vmatpush3.msra.mxu1 %v9824_v1  ;;  %2896 = vmatprep.mubr.f32.mxu1 %v2109_v59  ;;  %v2113_v59 = vld [vmem:[#allocation2 + $0x2a8] sm:$0xff] }
0x1c50   :  { %5397 = vmatpush3.msra.mxu0 %v9825_v9  ;;  %2897 = vmatmul.mubr.f32.vlgmr.msra.gmra.mxu1 %v2108_v62  ;;  %v9855_v62 = vld [vmem:[#allocation183_spill] sm:$0xff]  ;;  %v9857_v0 = vld [vmem:[#allocation182_spill] sm:$0xff]  ;;  %v9859_v9 = vld [vmem:[#allocation181_spill] sm:$0xff] }
0x1c51   :  { %5398 = vmatprep.subr.mxu0 %v9826_v11  ;;  %5421 = vmatprep.subr.mxu1 %v9827_v12  ;;  %v9858_v1 = vld [vmem:[#allocation166_spill] sm:$0xff]  ;;  %v9860_v11 = vld [vmem:[#allocation165_spill] sm:$0xff] }
0x1c52   :  { %5399 = vmatpush3.msra.mxu0 %v9828_v14  ;;  %2996 = vmatprep.mubr.f32.mxu0 %v2111_v2  ;;  %v2112_v2 = vld [vmem:[#allocation2 + $0x2c0] sm:$0xff]  ;;  %v2140_v14 = vld [vmem:[#allocation2 + $0x258] sm:$0xff] }
0x1c53   :  { %5422 = vmatpush3.msra.mxu1 %v9829_v16  ;;  %2997 = vmatmul.mubr.f32.vlgmr.msra.gmra.mxu0 %v2110_v10  ;;  %v2127_v10 = vld [vmem:[#allocation2 + $0x240] sm:$0xff]  ;;  %v2154_v16 = vld [vmem:[#allocation2 + $0x8] sm:$0xff] }
0x1c54   :  { %5423 = vmatprep.subr.mxu1 %v9830_v18  ;;  %2901 = vmatprep.mubr.f32.mxu1 %v2123_v13  ;;  %v2126_v12 = vld [vmem:[#allocation2 + $0x260] sm:$0xff]  ;;  %v2141_v13 = vld [vmem:[#allocation2 + $0x1d0] sm:$0xff]  ;;  %v2168_v18 = vld [vmem:[#allocation2 + $0x248] sm:$0xff] }
0x1c55   :  { %5424 = vmatpush3.msra.mxu1 %v9831_v26  ;;  %3001 = vmatprep.mubr.f32.mxu0 %v2125_v15  ;;  %v2155_v15 = vld [vmem:[#allocation2 + $0x268] sm:$0xff] }
0x1c56   :  { %2902 = vmatmul.mubr.f32.gmra.mxu1 %v2122_v17  ;;  %5425 = vmatprep.subr.mxu1 %v9832_v28  ;;  %v2169_v17 = vld [vmem:[#allocation2 + $0x2d0] sm:$0xff]  ;;  %v2182_v26 = vld [vmem:[#allocation2 + $0xa8] sm:$0xff] }
0x1c57   :  { %5426 = vmatpush3.msra.mxu1 %v9833_v29  ;;  %3002 = vmatmul.mubr.f32.gmra.mxu0 %v2124_v25  ;;  %v2183_v25 = vld [vmem:[#allocation2 + $0x38] sm:$0xff]  ;;  %v2196_v28 = vld [vmem:[#allocation2 + $0x168] sm:$0x3]  ;;  %v3132_v29 = vlaneseq }
0x1c58   :  { %5427 = vmatprep.subr.mxu1 %v9834_v31  ;;  %2906 = vmatprep.mubr.f32.mxu1 %v2137_v27  ;;  %v2197_v27 = vld [vmem:[#allocation2 + $0x218] sm:$0x3] }
0x1c59   :  { %5428 = vmatpush3.msra.mxu1 %v9835_v34  ;;  %6340 = vset.pattern.permute.xlu0 %v9836_v36  ;;  %v8348_v31 = vand.u32 127, %v3132_v29 }
0x1c5a   :  { %2907 = vmatmul.mubr.f32.gmra.mxu1 %v2136_v30  ;;  %5429 = vmatprep.subr.mxu1 %v9837_v21  ;;  %v8346_v30 = vshrl.u32 %v3132_v29, 7 }
0x1c5b   :  { %2429 = vperm.xlu0 %6340, %v4847_v32   ;;  %3006 = vmatprep.mubr.f32.mxu0 %v2139_v33  ;;  %v8354_v33 = vadd.s32 1, %v8348_v31  ;;  %v8357_v34 = vadd.s32 2, %v8348_v31 }
0x1c5c   :  { %5430 = vmatpush3.msra.mxu1 %v9838_v54  ;;  %3007 = vmatmul.mubr.f32.gmra.mxu0 %v2138_v52  ;;  %9861 = vst [vmem:[#allocation36_spill] sm:$0xff] %v8346_v30  ;;  %v8351_v32 = vadd.s32 120, %v8346_v30  ;;  %v8364_v36 = vadd.s32 112, %v8346_v30  ;;  %v9457_v52 = vmov 1.0   ;;  %v8375_v21 = vadd.s32 104, %v8346_v30 }
0x1c5d   :  { %5431 = vmatprep.subr.mxu1 %v9839_v39  ;;  %2911 = vmatprep.mubr.f32.mxu1 %v2151_v4  ;;  %v8386_v4 = vadd.s32 96, %v8346_v30  ;;  %v8408_v54 = vadd.s32 80, %v8346_v30  ;;  %v8430_v39 = vadd.s32 64, %v8346_v30 }
0x1c5e   :  { %5432 = vmatpush3.msra.mxu1 %v9840_v19  ;;  %3011 = vmatprep.mubr.f32.mxu0 %v2153_v40  ;;  %vm3167_vm5 = vcmp.eq.s32.totalorder %v8351_v32, %v8354_v33  ;;  %vm3323_vm6 = vcmp.eq.s32.totalorder %v8351_v32, %v8357_v34  ;;  %vm3166_vm7 = vcmp.eq.s32.totalorder %v8364_v36, %v8354_v33  ;;  %v8397_v40 = vadd.s32 88, %v8346_v30 }
0x1c5f   :  { %2912 = vmatmul.mubr.f32.gmra.mxu1 %v2150_v22  ;;  %5433 = vmatprep.subr.mxu1 %v9841_v20  ;;  %vm3322_vm8 = vcmp.eq.s32.totalorder %v8364_v36, %v8357_v34  ;;  %vm3165_vm9 = vcmp.eq.s32.totalorder %v8375_v21, %v8354_v33  ;;  %vm3321_vm10 = vcmp.eq.s32.totalorder %v8375_v21, %v8357_v34  ;;  %v8419_v22 = vadd.s32 72, %v8346_v30 }
0x1c60   :  { %5434 = vmatpush3.msra.mxu1 %v9842_v7  ;;  %3012 = vmatmul.mubr.f32.gmra.mxu0 %v2152_v55  ;;  %vm3164_vm11 = vcmp.eq.s32.totalorder %v8386_v4, %v8354_v33  ;;  %vm3320_vm12 = vcmp.eq.s32.totalorder %v8386_v4, %v8357_v34  ;;  %9862 = vst [vmem:[#allocation19_spill] sm:$0xff] %v8397_v40  ;;  %9863 = vst [vmem:[#allocation30_spill] sm:$0xff] %v8408_v54  ;;  %v8441_v55 = vadd.s32 56, %v8346_v30 }
0x1c61   :  { %5435 = vmatprep.subr.mxu1 %v9843_v51  ;;  %2916 = vmatprep.mubr.f32.mxu1 %v2165_v8  ;;  %vm3163_vm13 = vcmp.eq.s32.totalorder %v8397_v40, %v8354_v33  ;;  %vm3319_vm14 = vcmp.eq.s32.totalorder %v8397_v40, %v8357_v34  ;;  %vm3162_vm15 = vcmp.eq.s32.totalorder %v8408_v54, %v8354_v33  ;;  %v8452_v19 = vadd.s32 48, %v8346_v30 }
0x1c62   :  { %5436 = vmatpush3.msra.mxu1 %v9844_v5  ;;  %3016 = vmatprep.mubr.f32.mxu0 %v2167_v23  ;;  %vm3318_vm0 = vcmp.eq.s32.totalorder %v8408_v54, %v8357_v34  ;;  %9864 = vst [vmem:[#allocation24_spill] sm:$0xff] %v8419_v22  ;;  %vm3161_vm1 = vcmp.eq.s32.totalorder %v8419_v22, %v8354_v33  ;;  %9865 = vst [vmem:[#allocation35_spill] sm:$0xff] %v8430_v39  ;;  %v8463_v8 = vadd.s32 40, %v8346_v30 }
0x1c63   :  { %2917 = vmatmul.mubr.f32.gmra.mxu1 %v2164_v24  ;;  %5437 = vmatprep.subr.mxu1 %v9845_v3  ;;  %vm3317_vm3 = vcmp.eq.s32.totalorder %v8419_v22, %v8357_v34  ;;  %9866 = vst [vmem:[#allocation18_spill] sm:$0xff] %v8441_v55  ;;  %9867 = vst [vmem:[#allocation29_spill] sm:$0xff] %v8452_v19  ;;  %v8474_v20 = vadd.s32 32, %v8346_v30  ;;  %v8485_v23 = vadd.s32 24, %v8346_v30  ;;  %v8496_v7 = vadd.s32 16, %v8346_v30 }
0x1c64   :  { %5438 = vmatpush3.msra.mxu1 %v9846_v43  ;;  %3017 = vmatmul.mubr.f32.gmra.mxu0 %v2166_v35  ;;  %9868 = vst [vmem:[#allocation23_spill] sm:$0xff] %v8463_v8  ;;  %v8507_v24 = vadd.s32 8, %v8346_v30 }
0x1c65   :  { %5439 = vmatprep.subr.mxu1 %v9847_v45  ;;  %2921 = vmatprep.mubr.f32.mxu1 %v2179_v53  ;;  %9869 = vst [vmem:[#allocation34_spill] sm:$0xff] %v8474_v20  ;;  %9870 = vst [vmem:[#allocation17_spill] sm:$0xff] %v8485_v23 }
0x1c66   :  { %5440 = vmatpush3.msra.mxu1 %v9848_v42  ;;  %3021 = vmatprep.mubr.f32.mxu0 %v2181_v37  ;;  %9871 = vst [vmem:[#allocation28_spill] sm:$0xff] %v8496_v7  ;;  %9872 = vst [vmem:[#allocation22_spill] sm:$0xff] %v8507_v24 }
0x1c67   :  { %2922 = vmatmul.mubr.f32.gmra.mxu1 %v2178_v44  ;;  %5441 = vmatprep.subr.mxu1 %v9849_v48 }
0x1c68   :  { %5442 = vmatpush3.msra.mxu1 %v9850_v41  ;;  %3022 = vmatmul.mubr.f32.gmra.mxu0 %v2180_v46 }
0x1c69   :  { %5443 = vmatprep.subr.mxu1 %v9851_v56  ;;  %2926 = vmatprep.mubr.f32.mxu1 %v2193_v47 }
0x1c6a   :  { %5444 = vmatpush3.msra.mxu1 %v9852_v58  ;;  %3026 = vmatprep.mubr.f32.mxu0 %v2195_v49 }
0x1c6b   :  { %2927 = vmatmul.mubr.f32.gmra.mxu1 %v2192_v50  ;;  %5445 = vmatprep.subr.mxu1 %v9853_v60 }
0x1c6c   :  { %5446 = vmatpush3.msra.mxu1 %v9854_v61  ;;  %3027 = vmatmul.mubr.f32.gmra.mxu0 %v2194_v57 }
0x1c6d   :  { %5447 = vmatprep.subr.mxu1 %v9855_v62  ;;  %3096 = vmatprep.mubr.f32.mxu1 %v2113_v59 }
0x1c6e   :  { %5448 = vmatpush3.msra.mxu1 %v9856_v63  ;;  %5797 = vmatprep.subr.mxu0 %v9455_v6 }
0x1c6f   :  { %5449 = vmatprep.subr.mxu1 %v9857_v0  ;;  %5829 = vmatprep.mubr.msk.f32.mxu0 %vm6369_vm2, %v9455_v6 }
0x1c70   :  { %5450 = vmatpush3.msra.mxu1 %v9858_v1  ;;  %5798 = vmatpush3.msk.msra.mxu0 %vm3167_vm5, %v9457_v52  ;;  %vm3160_vm5 = vcmp.eq.s32.totalorder %v8430_v39, %v8354_v33 }
0x1c71   :  { %5451 = vmatprep.subr.mxu1 %v9859_v9  ;;  %5799 = vmatprep.subr.mxu0 %v9455_v6 }
0x1c72   :  { %5452 = vmatpush3.msra.mxu1 %v9860_v11  ;;  %5800 = vmatpush3.msk.msra.mxu0 %vm3166_vm7, %v9457_v52  ;;  %vm3159_vm7 = vcmp.eq.s32.totalorder %v8441_v55, %v8354_v33 }
0x1c73   :  { %3097 = vmatmul.mubr.f32.vlgmr.msra.gmra.mxu1 %v2112_v2  ;;  %5850 = vmatprep.subr.mxu1 %v9455_v6 }
0x1c74   :  { %3101 = vmatprep.mubr.f32.mxu1 %v2127_v10  ;;  %5851 = vmatpush3.msk.msra.mxu1 %vm3323_vm6, %v9457_v52  ;;  %vm3316_vm6 = vcmp.eq.s32.totalorder %v8430_v39, %v8357_v34 }
0x1c75   :  { %5852 = vmatprep.subr.mxu1 %v9455_v6  ;;  %5801 = vmatprep.subr.mxu0 %v9455_v6 }
0x1c76   :  { %5853 = vmatpush3.msk.msra.mxu1 %vm3322_vm8, %v9457_v52  ;;  %5802 = vmatpush3.msk.msra.mxu0 %vm3165_vm9, %v9457_v52  ;;  %vm3315_vm8 = vcmp.eq.s32.totalorder %v8441_v55, %v8357_v34  ;;  %vm3158_vm9 = vcmp.eq.s32.totalorder %v8452_v19, %v8354_v33 }
0x1c77   :  { %3102 = vmatmul.mubr.f32.gmra.mxu1 %v2126_v12  ;;  %5854 = vmatprep.subr.mxu1 %v9455_v6 }
0x1c78   :  { %3106 = vmatprep.mubr.f32.mxu1 %v2141_v13  ;;  %5855 = vmatpush3.msk.msra.mxu1 %vm3321_vm10, %v9457_v52  ;;  %vm3314_vm10 = vcmp.eq.s32.totalorder %v8452_v19, %v8357_v34 }
0x1c79   :  { %5803 = vmatprep.subr.mxu0 %v9455_v6  ;;  %5856 = vmatprep.subr.mxu1 %v9455_v6 }
0x1c7a   :  { %5804 = vmatpush3.msk.msra.mxu0 %vm3164_vm11, %v9457_v52  ;;  %5857 = vmatpush3.msk.msra.mxu1 %vm3320_vm12, %v9457_v52  ;;  %vm3157_vm11 = vcmp.eq.s32.totalorder %v8463_v8, %v8354_v33  ;;  %vm3313_vm12 = vcmp.eq.s32.totalorder %v8463_v8, %v8357_v34 }
0x1c7b   :  { %3107 = vmatmul.mubr.f32.gmra.mxu1 %v2140_v14  ;;  %5805 = vmatprep.subr.mxu0 %v9455_v6 }
0x1c7c   :  { %3111 = vmatprep.mubr.f32.mxu1 %v2155_v15  ;;  %5858 = vmatprep.subr.mxu1 %v9455_v6 }
0x1c7d   :  { %5806 = vmatpush3.msk.msra.mxu0 %vm3163_vm13, %v9457_v52  ;;  %5859 = vmatpush3.msk.msra.mxu1 %vm3319_vm14, %v9457_v52  ;;  %vm3156_vm13 = vcmp.eq.s32.totalorder %v8474_v20, %v8354_v33  ;;  %vm3312_vm14 = vcmp.eq.s32.totalorder %v8474_v20, %v8357_v34 }
0x1c7e   :  { %5807 = vmatprep.subr.mxu0 %v9455_v6  ;;  %5860 = vmatprep.subr.mxu1 %v9455_v6 }
0x1c7f   :  { %3112 = vmatmul.mubr.f32.gmra.mxu1 %v2154_v16  ;;  %5808 = vmatpush3.msk.msra.mxu0 %vm3162_vm15, %v9457_v52  ;;  %vm3155_vm15 = vcmp.eq.s32.totalorder %v8485_v23, %v8354_v33 }
0x1c80   :  { %3116 = vmatprep.mubr.f32.mxu1 %v2169_v17  ;;  %5861 = vmatpush3.msk.msra.mxu1 %vm3318_vm0, %v9457_v52  ;;  %vm3311_vm0 = vcmp.eq.s32.totalorder %v8485_v23, %v8357_v34 }
0x1c81   :  { %5809 = vmatprep.subr.mxu0 %v9455_v6  ;;  %5862 = vmatprep.subr.mxu1 %v9455_v6 }
0x1c82   :  { %5810 = vmatpush3.msk.msra.mxu0 %vm3161_vm1, %v9457_v52  ;;  %5863 = vmatpush3.msk.msra.mxu1 %vm3317_vm3, %v9457_v52  ;;  %vm3154_vm1 = vcmp.eq.s32.totalorder %v8496_v7, %v8354_v33  ;;  %vm3310_vm3 = vcmp.eq.s32.totalorder %v8496_v7, %v8357_v34 }
0x1c83   :  { %3117 = vmatmul.mubr.f32.gmra.mxu1 %v2168_v18  ;;  %5811 = vmatprep.subr.mxu0 %v9455_v6 }
0x1c84   :  { %3121 = vmatprep.mubr.f32.mxu1 %v2183_v25  ;;  %5864 = vmatprep.subr.mxu1 %v9455_v6 }
0x1c85   :  { %5812 = vmatpush3.msk.msra.mxu0 %vm3160_vm5, %v9457_v52  ;;  %5865 = vmatpush3.msk.msra.mxu1 %vm3316_vm6, %v9457_v52  ;;  %vm3153_vm5 = vcmp.eq.s32.totalorder %v8507_v24, %v8354_v33  ;;  %vm3309_vm6 = vcmp.eq.s32.totalorder %v8507_v24, %v8357_v34 }
0x1c86   :  { %5813 = vmatprep.subr.mxu0 %v9455_v6  ;;  %5866 = vmatprep.subr.mxu1 %v9455_v6 }
0x1c87   :  { %3122 = vmatmul.mubr.f32.gmra.mxu1 %v2182_v26  ;;  %5814 = vmatpush3.msk.msra.mxu0 %vm3159_vm7, %v9457_v52  ;;  %vm3152_vm7 = vcmp.eq.s32.totalorder %v8346_v30, %v8354_v33 }
0x1c88   :  { %3126 = vmatprep.mubr.f32.mxu1 %v2197_v27  ;;  %5867 = vmatpush3.msk.msra.mxu1 %vm3315_vm8, %v9457_v52  ;;  %vm3308_vm8 = vcmp.eq.s32.totalorder %v8346_v30, %v8357_v34 }
0x1c89   :  { %5815 = vmatprep.subr.mxu0 %v9455_v6  ;;  %5868 = vmatprep.subr.mxu1 %v9455_v6 }
0x1c8a   :  { %5816 = vmatpush3.msk.msra.mxu0 %vm3158_vm9, %v9457_v52  ;;  %5869 = vmatpush3.msk.msra.mxu1 %vm3314_vm10, %v9457_v52 }
0x1c8b   :  { %3127 = vmatmul.mubr.f32.gmra.mxu1 %v2196_v28  ;;  %5817 = vmatprep.subr.mxu0 %v9455_v6 }
0x1c8c   :  { %5882 = vmatprep.mubr.msk.f32.mxu1 %vm6369_vm2, %v9455_v6  ;;  %5870 = vmatprep.subr.mxu1 %v9455_v6 }
0x1c8d   :  { %5818 = vmatpush3.msk.msra.mxu0 %vm3157_vm11, %v9457_v52  ;;  %5871 = vmatpush3.msk.msra.mxu1 %vm3313_vm12, %v9457_v52 }
0x1c8e   :  { %5819 = vmatprep.subr.mxu0 %v9455_v6  ;;  %5872 = vmatprep.subr.mxu1 %v9455_v6 }
0x1c8f   :  { %5820 = vmatpush3.msk.msra.mxu0 %vm3156_vm13, %v9457_v52  ;;  %5873 = vmatpush3.msk.msra.mxu1 %vm3312_vm14, %v9457_v52 }
0x1c90   :  { %5821 = vmatprep.subr.mxu0 %v9455_v6  ;;  %5874 = vmatprep.subr.mxu1 %v9455_v6 }
0x1c91   :  { %5822 = vmatpush3.msk.msra.mxu0 %vm3155_vm15, %v9457_v52  ;;  %5875 = vmatpush3.msk.msra.mxu1 %vm3311_vm0, %v9457_v52 }
0x1c92   :  { %5823 = vmatprep.subr.mxu0 %v9455_v6  ;;  %5876 = vmatprep.subr.mxu1 %v9455_v6 }
0x1c93   :  { %5824 = vmatpush3.msk.msra.mxu0 %vm3154_vm1, %v9457_v52  ;;  %5877 = vmatpush3.msk.msra.mxu1 %vm3310_vm3, %v9457_v52 }
0x1c94   :  { %5825 = vmatprep.subr.mxu0 %v9455_v6  ;;  %5878 = vmatprep.subr.mxu1 %v9455_v6 }
0x1c95   :  { %5826 = vmatpush3.msk.msra.mxu0 %vm3153_vm5, %v9457_v52  ;;  %5879 = vmatpush3.msk.msra.mxu1 %vm3309_vm6, %v9457_v52 }
0x1c96   :  { %5827 = vmatprep.subr.mxu0 %v9455_v6  ;;  %5880 = vmatprep.subr.mxu1 %v9455_v6 }
0x1c97   :  { %5828 = vmatpush3.msk.msra.mxu0 %vm3152_vm7, %v9457_v52  ;;  %5881 = vmatpush3.msk.msra.mxu1 %vm3308_vm8, %v9457_v52 }
0x1c98   :  { %5903 = vmatprep.subr.mxu0 %v9455_v6  ;;  %5956 = vmatprep.subr.mxu1 %v9455_v6 }
0x1cb5   :  { %v8519_v51 = vpop.f32.mrf.mxu1 }
0x1cb7   :  { %v8531_v35 = vpop.f32.mrf.mxu0  ;;  %v8533_v5 = vpop.f32.mrf.mxu1 }
0x1cb9   :  { %v8537_v3 = vpop.f32.mrf.mxu0 }
0x1cbd   :  { %v8535_v53 = vpop.f32.mrf.mxu1 }
0x1cbf   :  { %v8539_v37 = vpop.f32.mrf.mxu1 }
0x1cc0   :  { %v8541_v43 = vpop.f32.mrf.mxu0 }
0x1cc2   :  { %v8543_v44 = vpop.f32.mrf.mxu0 }
0x1cc3   :  { %v5141_v45 = vpop.f32.mrf.mxu1 }
0x1cc5   :  { %v5142_v46 = vpop.f32.mrf.mxu1 }
0x1cc6   :  { %v8545_v42 = vadd.f32 %v5142_v46, %v5141_v45  ;;  %v8547_v47 = vpop.f32.mrf.mxu0 }
0x1cc8   :  { %v8549_v48 = vpop.f32.mrf.mxu0 }
0x1cc9   :  { %v5144_v49 = vpop.f32.mrf.mxu1 }
0x1ccb   :  { %v5145_v41 = vpop.f32.mrf.mxu1 }
0x1ccc   :  { %v8551_v50 = vadd.f32 %v5145_v41, %v5144_v49  ;;  %v8553_v56 = vpop.f32.mrf.mxu0 }
0x1cce   :  { %v8555_v57 = vpop.f32.mrf.mxu0 }
0x1ccf   :  { %v5147_v58 = vpop.f32.mrf.mxu1 }
0x1cd1   :  { %v5148_v59 = vpop.f32.mrf.mxu1 }
0x1cd2   :  { %v8557_v60 = vadd.f32 %v5148_v59, %v5147_v58  ;;  %v8559_v61 = vpop.f32.mrf.mxu0 }
0x1cd4   :  { %v8561_v62 = vpop.f32.mrf.mxu0 }
0x1cd5   :  { %v5150_v63 = vpop.f32.mrf.mxu1 }
0x1cd7   :  { %v5151_v0 = vpop.f32.mrf.mxu1 }
0x1cd8   :  { %v8563_v1 = vadd.f32 %v5151_v0, %v5150_v63  ;;  %v8565_v2 = vpop.f32.mrf.mxu0 }
0x1cd9   :  { %9874 = vst [vmem:[#allocation16_spill] sm:$0xff] %v8565_v2 }
0x1cda   :  { %9873 = vst [vmem:[#allocation33_spill] sm:$0xff] %v8563_v1  ;;  %v8567_v10 = vpop.f32.mrf.mxu0 }
0x1cdb   :  { %v5153_v9 = vpop.f32.mrf.mxu1  ;;  %9875 = vst [vmem:[#allocation27_spill] sm:$0xff] %v8567_v10 }
0x1cdd   :  { %v5154_v11 = vpop.f32.mrf.mxu1 }
0x1cde   :  { %v8569_v12 = vadd.f32 %v5154_v11, %v5153_v9  ;;  %v8571_v13 = vpop.f32.mrf.mxu0 }
0x1cdf   :  { %9877 = vst [vmem:[#allocation32_spill] sm:$0xff] %v8571_v13 }
0x1ce0   :  { %9876 = vst [vmem:[#allocation21_spill] sm:$0xff] %v8569_v12  ;;  %v8573_v15 = vpop.f32.mrf.mxu0 }
0x1ce1   :  { %9878 = vst [vmem:[#allocation15_spill] sm:$0xff] %v8573_v15 }
0x1ce2   :  { %v5241_v14 = vpop.f32.mrf.mxu1 }
0x1ce4   :  { %v5242_v16 = vpop.f32.mrf.mxu1 }
0x1ce5   :  { %v5294_v17 = vpop.f32.mrf.mxu0 }
0x1ce7   :  { %v5295_v26 = vpop.f32.mrf.mxu0 }
0x1ce8   :  { %v5244_v18 = vpop.f32.mrf.mxu1 }
0x1cea   :  { %v5245_v25 = vpop.f32.mrf.mxu1 }
0x1ceb   :  { %v5246_v2 = vadd.f32 %v5245_v25, %v5244_v18 }
0x1cec   :  { %v5297_v28 = vpop.f32.mrf.mxu0 }
0x1cee   :  { %v5247_v27 = vpop.f32.mrf.mxu1  ;;  %v5298_v33 = vpop.f32.mrf.mxu0 }
0x1cf0   :  { %v5248_v29 = vpop.f32.mrf.mxu1 }
0x1cf2   :  { %v8579_v46 = vpop.f32.mrf.mxu0 }
0x1cf4   :  { %v8575_v34 = vpop.f32.mrf.mxu1  ;;  %v8583_v41 = vpop.f32.mrf.mxu0 }
0x1cf6   :  { %v8577_v45 = vpop.f32.mrf.mxu1 }
0x1cf8   :  { %v8587_v59 = vpop.f32.mrf.mxu0 }
0x1cfa   :  { %v8581_v49 = vpop.f32.mrf.mxu1  ;;  %v8591_v0 = vpop.f32.mrf.mxu0 }
0x1cfc   :  { %v8585_v58 = vpop.f32.mrf.mxu1 }
0x1cfe   :  { %v8595_v11 = vpop.f32.mrf.mxu0 }
0x1cff   :  { %9881 = vst [vmem:[#allocation14_spill] sm:$0xff] %v8595_v11 }
0x1d00   :  { %v8589_v63 = vpop.f32.mrf.mxu1  ;;  %v8599_v52 = vpop.f32.mrf.mxu0 }
0x1d01   :  { %9879 = vst [vmem:[#allocation20_spill] sm:$0xff] %v8589_v63  ;;  %9883 = vst [vmem:[#allocation68_spill] sm:$0xff] %v8599_v52  ;;  %v5243_v52 = vadd.f32 %v5242_v16, %v5241_v14  ;;  %v5196_v14 = vadd.f32 %v8549_v48, %v8547_v47  ;;  %v5299_v16 = vadd.f32 %v5298_v33, %v5297_v28 }
0x1d02   :  { %v8593_v9 = vpop.f32.mrf.mxu1  ;;  %v5302_v48 = vadd.f32 %v8583_v41, %v8579_v46 }
0x1d03   :  { %9880 = vst [vmem:[#allocation26_spill] sm:$0xff] %v8593_v9  ;;  %v5140_v9 = vadd.f32 %v8539_v37, %v8535_v53 }
0x1d04   :  { %v8603_v30 = vpop.f32.mrf.mxu0 }
0x1d05   :  { %9885 = vst [vmem:[#allocation52_spill] sm:$0xff] %v8603_v30  ;;  %v8617_v30 = vpop.permute.xlu0 %2429 }
0x1d06   :  { %v8597_v6 = vpop.f32.mrf.mxu1  ;;  %v8605_v23 = vpop.f32.mrf.mxu0  ;;  %v2509_v37 = vadd.f32 %v8545_v42, %v8617_v30  ;;  %v5199_v42 = vadd.f32 %v8555_v57, %v8553_v56  ;;  %v5202_v57 = vadd.f32 %v8561_v62, %v8559_v61  ;;  %v5305_v61 = vadd.f32 %v8591_v0, %v8587_v59 }
0x1d07   :  { %9882 = vst [vmem:[#allocation31_spill] sm:$0xff] %v8597_v6  ;;  %9886 = vst [vmem:[#allocation67_spill] sm:$0xff] %v8605_v23  ;;  %v9892_v62 = vmov 1.0   ;;  %v5255_v59 = vadd.f32 %v8585_v58, %v8581_v49 }
0x1d08   :  { %v8601_v38 = vpop.f32.mrf.mxu1  ;;  %v2609_v18 = vadd.f32 %v5196_v14, %v2509_v37 }
0x1d09   :  { %9884 = vst [vmem:[#allocation25_spill] sm:$0xff] %v8601_v38  ;;  %v5137_v38 = vadd.f32 %v8533_v5, %v8519_v51 }
0x1d0a   :  { %v8607_v8 = vpop.f32.mrf.mxu0 }
0x1d0b   :  { %9887 = vst [vmem:[#allocation100_spill] sm:$0xff] %v8607_v8  ;;  %v2499_v40 = vadd.f32 %v5137_v38, %v8617_v30  ;;  %v5296_v38 = vadd.f32 %v5295_v26, %v5294_v17  ;;  %v5252_v26 = vadd.f32 %v8577_v45, %v8575_v34  ;;  %v2519_v34 = vadd.f32 %v8557_v60, %v8617_v30 }
0x1d0c   :  { %v8609_v39 = vpop.f32.mrf.mxu0  ;;  %v9893_v60 = vmov 0.0  }
0x1d0d   :  { %9888 = vst [vmem:[#allocation51_spill] sm:$0xff] %v8609_v39  ;;  %v5190_v39 = vadd.f32 %v8537_v3, %v8531_v35  ;;  %v2619_v49 = vadd.f32 %v5202_v57, %v2519_v34  ;;  %v9907_v57 = vld [vmem:[#allocation15_spill] sm:$0xff] }
0x1d0f   :  { %v2599_v5 = vadd.f32 %v5190_v39, %v2499_v40  ;;  %v2719_v14 = vadd.f32 %v5255_v59, %v2619_v49 }
0x1d10   :  { %v5347_v24 = vpop.f32.mrf.mxu1 }
0x1d11   :  { %v2699_v10 = vadd.f32 %v5243_v52, %v2599_v5 }
0x1d12   :  { %v5348_v7 = vpop.f32.mrf.mxu1 }
0x1d13   :  { %v5400_v15 = vpop.f32.mrf.mxu0  ;;  %v5349_v53 = vadd.f32 %v5348_v7, %v5347_v24  ;;  %v2799_v40 = vadd.f32 %v5296_v38, %v2699_v10  ;;  %v8647_v7 = vadd.s32 4, %v8348_v31  ;;  %v2514_v24 = vadd.f32 %v8551_v50, %v8617_v30 }
0x1d15   :  { %v5401_v13 = vpop.f32.mrf.mxu0  ;;  %v2899_v52 = vadd.f32 %v5349_v53, %v2799_v40  ;;  %vm3635_vm10 = vcmp.eq.s32.totalorder %v8351_v32, %v8647_v7  ;;  %v2614_v56 = vadd.f32 %v5199_v42, %v2514_v24  ;;  %vm3634_vm12 = vcmp.eq.s32.totalorder %v8364_v36, %v8647_v7  ;;  %v9896_v53 = vld [vmem:[#allocation27_spill] sm:$0xff]  ;;  %v9897_v40 = vld [vmem:[#allocation14_spill] sm:$0xff] }
0x1d16   :  { %v5350_v20 = vpop.f32.mrf.mxu1  ;;  %vm3633_vm14 = vcmp.eq.s32.totalorder %v8375_v21, %v8647_v7  ;;  %vm3632_vm0 = vcmp.eq.s32.totalorder %v8386_v4, %v8647_v7 }
0x1d17   :  { %v5403_v54 = vpop.f32.mrf.mxu0  ;;  %v2714_v45 = vadd.f32 %v5252_v26, %v2614_v56  ;;  %v9906_v56 = vld [vmem:[#allocation32_spill] sm:$0xff] }
0x1d18   :  { %v5351_v19 = vpop.f32.mrf.mxu1 }
0x1d19   :  { %v5404_v11 = vpop.f32.mrf.mxu0  ;;  %v5352_v17 = vadd.f32 %v5351_v19, %v5350_v20  ;;  %v2814_v58 = vadd.f32 %v5305_v61, %v2714_v45 }
0x1d1a   :  { %v5353_v55 = vpop.f32.mrf.mxu1 }
0x1d1c   :  { %v5354_v22 = vpop.f32.mrf.mxu1  ;;  %v5406_v1 = vpop.f32.mrf.mxu0 }
0x1d1d   :  { %v5355_v28 = vadd.f32 %v5354_v22, %v5353_v55 }
0x1d1f   :  { %v8611_v6 = vpop.f32.mrf.mxu1 }
0x1d21   :  { %v8613_v12 = vpop.f32.mrf.mxu1 }
0x1d23   :  { %v8619_v23 = vpop.f32.mrf.mxu1 }
0x1d24   :  { %9889 = vst [vmem:[#allocation84_spill] sm:$0xff] %v8619_v23  ;;  %v2504_v23 = vadd.f32 %v5140_v9, %v8617_v30  ;;  %v5249_v9 = vadd.f32 %v5248_v29, %v5247_v27 }
0x1d25   :  { %v8621_v8 = vpop.f32.mrf.mxu1 }
0x1d26   :  { %9890 = vst [vmem:[#allocation66_spill] sm:$0xff] %v8621_v8  ;;  %v5193_v8 = vadd.f32 %v8543_v44, %v8541_v43  ;;  %v5402_v44 = vadd.f32 %v5401_v13, %v5400_v15  ;;  %v2709_v47 = vadd.f32 %v5249_v9, %v2609_v18  ;;  %v5405_v13 = vadd.f32 %v5404_v11, %v5403_v54 }
0x1d27   :  { %v8628_v63 = vpop.f32.mrf.mxu1 }
0x1d28   :  { %v2604_v3 = vadd.f32 %v5193_v8, %v2504_v23  ;;  %v8644_v23 = vadd.s32 3, %v8348_v31  ;;  %v2809_v22 = vadd.f32 %v5302_v48, %v2709_v47 }
0x1d29   :  { %v8630_v51 = vpop.f32.mrf.mxu1 }
0x1d2a   :  { %9891 = vst [vmem:[#allocation99_spill] sm:$0xff] %v8630_v51  ;;  %v2704_v39 = vadd.f32 %v5246_v2, %v2604_v3  ;;  %v5407_v51 = vpop.f32.mrf.mxu0  ;;  %v2999_v2 = vadd.f32 %v5402_v44, %v2899_v52  ;;  %vm3479_vm9 = vcmp.eq.s32.totalorder %v8351_v32, %v8644_v23  ;;  %vm3478_vm11 = vcmp.eq.s32.totalorder %v8364_v36, %v8644_v23  ;;  %v9895_v3 = vld [vmem:[#allocation16_spill] sm:$0xff] }
0x1d2b   :  { %v8635_v35 = vpop.f32.mrf.mxu1  ;;  %v2909_v41 = vadd.f32 %v5355_v28, %v2809_v22  ;;  %v5408_v11 = vadd.f32 %v5407_v51, %v5406_v1  ;;  %vm3477_vm13 = vcmp.eq.s32.totalorder %v8375_v21, %v8644_v23  ;;  %v5358_v1 = vadd.f32 %v8613_v12, %v8611_v6  ;;  %v9894_v6 = vld [vmem:[#allocation33_spill] sm:$0xff]  ;;  %v9901_v21 = vld [vmem:[#allocation19_spill] sm:$0xff]  ;;  %v9902_v47 = vld [vmem:[#allocation84_spill] sm:$0xff] }
0x1d2c   :  { %v2804_v8 = vadd.f32 %v5299_v16, %v2704_v39  ;;  %v8655_v19 = vpop.f32.mrf.mxu0  ;;  %vm3476_vm15 = vcmp.eq.s32.totalorder %v8386_v4, %v8644_v23  ;;  %v2524_v12 = vadd.f32 %v9894_v6, %v8617_v30  ;;  %v5205_v37 = vadd.f32 %v9896_v53, %v9895_v3  ;;  %v9898_v39 = vld [vmem:[#allocation68_spill] sm:$0xff]  ;;  %v9916_v3 = vld [vmem:[#allocation51_spill] sm:$0xff] }
0x1d2d   :  { %v8641_v43 = vpop.f32.mrf.mxu1  ;;  %v3009_v38 = vadd.f32 %v5408_v11, %v2909_v41  ;;  %v5308_v16 = vadd.f32 %v9898_v39, %v9897_v40  ;;  %v2914_v44 = vadd.f32 %v5358_v1, %v2814_v58  ;;  %vm3475_vm1 = vcmp.eq.s32.totalorder %v9901_v21, %v8644_v23  ;;  %v9903_v48 = vld [vmem:[#allocation66_spill] sm:$0xff]  ;;  %v9908_v22 = vld [vmem:[#allocation52_spill] sm:$0xff]  ;;  %v9911_v41 = vld [vmem:[#allocation25_spill] sm:$0xff] }
0x1d2e   :  { %v2904_v10 = vadd.f32 %v5352_v17, %v2804_v8  ;;  %v5410_v29 = vpop.f32.mrf.mxu0  ;;  %v9900_v8 = vld [vmem:[#allocation26_spill] sm:$0xff]  ;;  %vm3631_vm3 = vcmp.eq.s32.totalorder %v9901_v21, %v8647_v7 }
0x1d2f   :  { %v5411_v17 = vadd.f32 %v5410_v29, %v8655_v19  ;;  %v5361_v19 = vadd.f32 %v9903_v48, %v9902_v47  ;;  %v5208_v29 = vadd.f32 %v9907_v57, %v9906_v56  ;;  %v9919_v48 = vld [vmem:[#allocation23_spill] sm:$0xff] }
0x1d30   :  { %v3004_v55 = vadd.f32 %v5405_v13, %v2904_v10  ;;  %v5412_v0 = vpop.f32.mrf.mxu0  ;;  %v9904_v10 = vld [vmem:[#allocation30_spill] sm:$0xff] }
0x1d31   :  { %vm3474_vm5 = vcmp.eq.s32.totalorder %v9904_v10, %v8644_v23  ;;  %vm3630_vm6 = vcmp.eq.s32.totalorder %v9904_v10, %v8647_v7  ;;  %v3014_v28 = vadd.f32 %v5411_v17, %v2914_v44  ;;  %v9922_v10 = vld [vmem:[#allocation28_spill] sm:$0xff] }
0x1d32   :  { %v5413_v9 = vpop.f32.mrf.mxu0 }
0x1d33   :  { %v5453_v25 = vpop.f32.mrf.mxu1  ;;  %v5414_v45 = vadd.f32 %v5413_v9, %v5412_v0  ;;  %v9912_v0 = vld [vmem:[#allocation24_spill] sm:$0xff] }
0x1d34   :  { %v5415_v4 = vpop.f32.mrf.mxu0  ;;  %vm3473_vm7 = vcmp.eq.s32.totalorder %v9912_v0, %v8644_v23  ;;  %vm3629_vm8 = vcmp.eq.s32.totalorder %v9912_v0, %v8647_v7 }
0x1d35   :  { %v5454_v20 = vpop.f32.mrf.mxu1 }
0x1d36   :  { %v5455_v15 = vadd.f32 %v5454_v20, %v5453_v25  ;;  %v9899_v25 = vld [vmem:[#allocation20_spill] sm:$0xff]  ;;  %v5416_v59 = vpop.f32.mrf.mxu0 }
0x1d37   :  { %v5456_v27 = vpop.f32.mrf.mxu1  ;;  %v5258_v24 = vadd.f32 %v9900_v8, %v9899_v25  ;;  %v5417_v40 = vadd.f32 %v5416_v59, %v5415_v4  ;;  %v9918_v25 = vld [vmem:[#allocation29_spill] sm:$0xff] }
0x1d38   :  { %v8659_v50 = vadd.f32 %v5455_v15, %v2999_v2  ;;  %v2624_v2 = vadd.f32 %v5205_v37, %v2524_v12  ;;  %v9905_v15 = vld [vmem:[#allocation21_spill] sm:$0xff]  ;;  %v5418_v37 = vpop.f32.mrf.mxu0 }
0x1d39   :  { %v5457_v54 = vpop.f32.mrf.mxu1  ;;  %v2529_v26 = vadd.f32 %v9905_v15, %v8617_v30  ;;  %v9921_v4 = vld [vmem:[#allocation17_spill] sm:$0xff]  ;;  %v9924_v15 = vld [vmem:[#allocation36_spill] sm:$0xff] }
0x1d3a   :  { %v5458_v33 = vadd.f32 %v5457_v54, %v5456_v27  ;;  %5830 = vmatmul.mubr.f32.vlgmr.msra.gmra.mxu0 %v8659_v50  ;;  %5883 = vmatmul.mubr.f32.vlgmr.msra.gmra.mxu1 %v8659_v50  ;;  %v2819_v27 = vadd.f32 %v5308_v16, %v2719_v14  ;;  %v2724_v54 = vadd.f32 %v5258_v24, %v2624_v2  ;;  %v9917_v16 = vld [vmem:[#allocation18_spill] sm:$0xff]  ;;  %v5419_v17 = vpop.f32.mrf.mxu0 }
0x1d3b   :  { %5904 = vmatpush3.msk.msra.mxu0 %vm3479_vm9, %v9892_v62  ;;  %5957 = vmatpush3.msk.msra.mxu1 %vm3635_vm10, %v9892_v62  ;;  %v5459_v46 = vpop.f32.mrf.mxu1  ;;  %v2629_v49 = vadd.f32 %v5208_v29, %v2529_v26  ;;  %v5420_v21 = vadd.f32 %v5419_v17, %v5418_v37 }
0x1d3c   :  { %v8685_v5 = vadd.f32 %v5458_v33, %v3004_v55  ;;  %5905 = vmatprep.subr.mxu0 %v9893_v60  ;;  %5958 = vmatprep.subr.mxu1 %v9893_v60  ;;  %v9909_v55 = vld [vmem:[#allocation67_spill] sm:$0xff]  ;;  %v2919_v34 = vadd.f32 %v5361_v19, %v2819_v27 }
0x1d3d   :  { %5906 = vmatpush3.msk.msra.mxu0 %vm3478_vm11, %v9892_v62  ;;  %5959 = vmatpush3.msk.msra.mxu1 %vm3634_vm12, %v9892_v62  ;;  %v5460_v32 = vpop.f32.mrf.mxu1  ;;  %v5311_v33 = vadd.f32 %v9909_v55, %v9908_v22  ;;  %vm3471_vm11 = vcmp.eq.s32.totalorder %v9917_v16, %v8644_v23  ;;  %vm3627_vm12 = vcmp.eq.s32.totalorder %v9917_v16, %v8647_v7 }
0x1d3e   :  { %v5461_v51 = vadd.f32 %v5460_v32, %v5459_v46  ;;  %5832 = vmatprep.mubr.msk.f32.mxu0 %vm6369_vm2, %v9893_v60  ;;  %5885 = vmatprep.mubr.msk.f32.mxu1 %vm6369_vm2, %v9893_v60  ;;  %v9910_v46 = vld [vmem:[#allocation31_spill] sm:$0xff]  ;;  %v3019_v12 = vadd.f32 %v5414_v45, %v2919_v34 }
0x1d3f   :  { %5907 = vmatprep.subr.mxu0 %v9893_v60  ;;  %5960 = vmatprep.subr.mxu1 %v9893_v60  ;;  %v5462_v36 = vpop.f32.mrf.mxu1  ;;  %v5261_v11 = vadd.f32 %v9911_v41, %v9910_v46  ;;  %v9913_v32 = vld [vmem:[#allocation99_spill] sm:$0xff] }
0x1d40   :  { %5833 = vmatmul.mubr.f32.gmra.mxu0 %v8685_v5  ;;  %5886 = vmatmul.mubr.f32.gmra.mxu1 %v8685_v5  ;;  %v8732_v18 = vadd.f32 %v5461_v51, %v3009_v38  ;;  %v5364_v1 = vadd.f32 %v9913_v32, %v8628_v63  ;;  %v2824_v63 = vadd.f32 %v5311_v33, %v2724_v54  ;;  %v9915_v38 = vld [vmem:[#allocation100_spill] sm:$0xff] }
0x1d41   :  { %5908 = vmatpush3.msk.msra.mxu0 %vm3477_vm13, %v9892_v62  ;;  %5961 = vmatpush3.msk.msra.mxu1 %vm3633_vm14, %v9892_v62  ;;  %v5463_v52 = vpop.f32.mrf.mxu1  ;;  %v2729_v58 = vadd.f32 %v5261_v11, %v2629_v49  ;;  %v5314_v53 = vadd.f32 %v9916_v3, %v9915_v38  ;;  %vm3470_vm13 = vcmp.eq.s32.totalorder %v9918_v25, %v8644_v23 }
0x1d42   :  { %5909 = vmatprep.subr.mxu0 %v9893_v60  ;;  %5962 = vmatprep.subr.mxu1 %v9893_v60  ;;  %v5464_v20 = vadd.f32 %v5463_v52, %v5462_v36  ;;  %v9914_v36 = vld [vmem:[#allocation35_spill] sm:$0xff]  ;;  %v2924_v14 = vadd.f32 %v5364_v1, %v2824_v63  ;;  %v5367_v52 = vadd.f32 %v8641_v43, %v8635_v35 }
0x1d43   :  { %5910 = vmatpush3.msk.msra.mxu0 %vm3476_vm15, %v9892_v62  ;;  %5963 = vmatpush3.msk.msra.mxu1 %vm3632_vm0, %v9892_v62  ;;  %v5465_v42 = vpop.f32.mrf.mxu1  ;;  %vm3472_vm9 = vcmp.eq.s32.totalorder %v9914_v36, %v8644_v23  ;;  %vm3628_vm10 = vcmp.eq.s32.totalorder %v9914_v36, %v8647_v7  ;;  %v2829_v8 = vadd.f32 %v5314_v53, %v2729_v58 }
0x1d44   :  { %5835 = vmatprep.mubr.msk.f32.mxu0 %vm6369_vm2, %v9893_v60  ;;  %5888 = vmatprep.mubr.msk.f32.mxu1 %vm6369_vm2, %v9893_v60  ;;  %v8778_v61 = vadd.f32 %v5464_v20, %v3014_v28  ;;  %v3024_v35 = vadd.f32 %v5417_v40, %v2924_v14  ;;  %vm3626_vm14 = vcmp.eq.s32.totalorder %v9918_v25, %v8647_v7  ;;  %v9920_v20 = vld [vmem:[#allocation34_spill] sm:$0xff] }
0x1d45   :  { %5911 = vmatprep.subr.mxu0 %v9893_v60  ;;  %5964 = vmatprep.subr.mxu1 %v9893_v60  ;;  %v5466_v13 = vpop.f32.mrf.mxu1  ;;  %v2929_v24 = vadd.f32 %v5367_v52, %v2829_v8  ;;  %vm3469_vm15 = vcmp.eq.s32.totalorder %v9919_v48, %v8644_v23  ;;  %vm3625_vm0 = vcmp.eq.s32.totalorder %v9919_v48, %v8647_v7 }
0x1d46   :  { %5836 = vmatmul.mubr.f32.gmra.mxu0 %v8732_v18  ;;  %5889 = vmatmul.mubr.f32.gmra.mxu1 %v8732_v18  ;;  %v5467_v51 = vadd.f32 %v5466_v13, %v5465_v42  ;;  %v9923_v13 = vld [vmem:[#allocation22_spill] sm:$0xff] }
0x1d47   :  { %5912 = vmatpush3.msk.msra.mxu0 %vm3475_vm1, %v9892_v62  ;;  %5965 = vmatpush3.msk.msra.mxu1 %vm3631_vm3, %v9892_v62  ;;  %v5468_v30 = vpop.f32.mrf.mxu1  ;;  %v3029_v19 = vadd.f32 %v5420_v21, %v2929_v24  ;;  %vm3468_vm1 = vcmp.eq.s32.totalorder %v9920_v20, %v8644_v23  ;;  %vm3624_vm3 = vcmp.eq.s32.totalorder %v9920_v20, %v8647_v7 }
0x1d48   :  { %5913 = vmatprep.subr.mxu0 %v9893_v60  ;;  %5966 = vmatprep.subr.mxu1 %v9893_v60  ;;  %v8817_v39 = vadd.f32 %v5467_v51, %v3019_v12 }
0x1d49   :  { %5914 = vmatpush3.msk.msra.mxu0 %vm3474_vm5, %v9892_v62  ;;  %5967 = vmatpush3.msk.msra.mxu1 %vm3630_vm6, %v9892_v62  ;;  %v5469_v6 = vpop.f32.mrf.mxu1  ;;  %vm3467_vm5 = vcmp.eq.s32.totalorder %v9921_v4, %v8644_v23  ;;  %vm3623_vm6 = vcmp.eq.s32.totalorder %v9921_v4, %v8647_v7 }
0x1d4a   :  { %5838 = vmatprep.mubr.msk.f32.mxu0 %vm6369_vm2, %v9893_v60  ;;  %5891 = vmatprep.mubr.msk.f32.mxu1 %vm6369_vm2, %v9893_v60  ;;  %v5470_v44 = vadd.f32 %v5469_v6, %v5468_v30 }
0x1d4b   :  { %5915 = vmatprep.subr.mxu0 %v9893_v60  ;;  %5968 = vmatprep.subr.mxu1 %v9893_v60  ;;  %v5471_v9 = vpop.f32.mrf.mxu1 }
0x1d4c   :  { %5839 = vmatmul.mubr.f32.gmra.mxu0 %v8778_v61  ;;  %5892 = vmatmul.mubr.f32.gmra.mxu1 %v8778_v61  ;;  %v8849_v42 = vadd.f32 %v5470_v44, %v3024_v35 }
0x1d4d   :  { %5916 = vmatpush3.msk.msra.mxu0 %vm3473_vm7, %v9892_v62  ;;  %5969 = vmatpush3.msk.msra.mxu1 %vm3629_vm8, %v9892_v62  ;;  %v5472_v43 = vpop.f32.mrf.mxu1  ;;  %vm3466_vm7 = vcmp.eq.s32.totalorder %v9922_v10, %v8644_v23  ;;  %vm3622_vm8 = vcmp.eq.s32.totalorder %v9922_v10, %v8647_v7 }
0x1d4e   :  { %5917 = vmatprep.subr.mxu0 %v9893_v60  ;;  %5970 = vmatprep.subr.mxu1 %v9893_v60  ;;  %v5473_v47 = vadd.f32 %v5472_v43, %v5471_v9 }
0x1d4f   :  { %5918 = vmatpush3.msk.msra.mxu0 %vm3472_vm9, %v9892_v62  ;;  %5971 = vmatpush3.msk.msra.mxu1 %vm3628_vm10, %v9892_v62  ;;  %vm3465_vm9 = vcmp.eq.s32.totalorder %v9923_v13, %v8644_v23  ;;  %vm3621_vm10 = vcmp.eq.s32.totalorder %v9923_v13, %v8647_v7 }
0x1d50   :  { %5841 = vmatprep.mubr.msk.f32.mxu0 %vm6369_vm2, %v9893_v60  ;;  %5894 = vmatprep.mubr.msk.f32.mxu1 %vm6369_vm2, %v9893_v60  ;;  %v8873_v2 = vadd.f32 %v5473_v47, %v3029_v19 }
0x1d51   :  { %5919 = vmatprep.subr.mxu0 %v9893_v60  ;;  %5972 = vmatprep.subr.mxu1 %v9893_v60 }
0x1d52   :  { %5842 = vmatmul.mubr.f32.gmra.mxu0 %v8817_v39  ;;  %5895 = vmatmul.mubr.f32.gmra.mxu1 %v8817_v39 }
0x1d53   :  { %5920 = vmatpush3.msk.msra.mxu0 %vm3471_vm11, %v9892_v62  ;;  %5973 = vmatpush3.msk.msra.mxu1 %vm3627_vm12, %v9892_v62  ;;  %vm3464_vm11 = vcmp.eq.s32.totalorder %v9924_v15, %v8644_v23  ;;  %vm3620_vm12 = vcmp.eq.s32.totalorder %v9924_v15, %v8647_v7 }
0x1d54   :  { %5921 = vmatprep.subr.mxu0 %v9893_v60  ;;  %5974 = vmatprep.subr.mxu1 %v9893_v60 }
0x1d55   :  { %5922 = vmatpush3.msk.msra.mxu0 %vm3470_vm13, %v9892_v62  ;;  %5975 = vmatpush3.msk.msra.mxu1 %vm3626_vm14, %v9892_v62  ;;  %vm3825_vm13 = vcmask 1041408  }
0x1d56   :  { %5844 = vmatprep.mubr.msk.f32.mxu0 %vm6369_vm2, %v9893_v60  ;;  %5897 = vmatprep.mubr.msk.f32.mxu1 %vm6369_vm2, %v9893_v60 }
0x1d57   :  { %5923 = vmatprep.subr.mxu0 %v9893_v60  ;;  %5976 = vmatprep.subr.mxu1 %v9893_v60 }
0x1d58   :  { %5845 = vmatmul.mubr.f32.gmra.mxu0 %v8849_v42  ;;  %5898 = vmatmul.mubr.f32.gmra.mxu1 %v8849_v42 }
0x1d59   :  { %5924 = vmatpush3.msk.msra.mxu0 %vm3469_vm15, %v9892_v62  ;;  %5977 = vmatpush3.msk.msra.mxu1 %vm3625_vm0, %v9892_v62  ;;  %vm3803_vm0 = vcmask 408576  }
0x1d5a   :  { %5925 = vmatprep.subr.mxu0 %v9893_v60  ;;  %5978 = vmatprep.subr.mxu1 %v9893_v60 }
0x1d5b   :  { %5926 = vmatpush3.msk.msra.mxu0 %vm3468_vm1, %v9892_v62  ;;  %5979 = vmatpush3.msk.msra.mxu1 %vm3624_vm3, %v9892_v62 }
0x1d5c   :  { %5847 = vmatprep.mubr.msk.f32.mxu0 %vm6369_vm2, %v9893_v60  ;;  %5900 = vmatprep.mubr.msk.f32.mxu1 %vm6369_vm2, %v9893_v60 }
0x1d5d   :  { %5927 = vmatprep.subr.mxu0 %v9893_v60  ;;  %5980 = vmatprep.subr.mxu1 %v9893_v60 }
0x1d5e   :  { %5848 = vmatmul.mubr.f32.gmra.mxu0 %v8873_v2  ;;  %5901 = vmatmul.mubr.f32.gmra.mxu1 %v8873_v2 }
0x1d5f   :  { %5928 = vmatpush3.msk.msra.mxu0 %vm3467_vm5, %v9892_v62  ;;  %5981 = vmatpush3.msk.msra.mxu1 %vm3623_vm6, %v9892_v62 }
0x1d60   :  { %5929 = vmatprep.subr.mxu0 %v9893_v60  ;;  %5982 = vmatprep.subr.mxu1 %v9893_v60 }
0x1d61   :  { %5930 = vmatpush3.msk.msra.mxu0 %vm3466_vm7, %v9892_v62  ;;  %5983 = vmatpush3.msk.msra.mxu1 %vm3622_vm8, %v9892_v62 }
0x1d62   :  { %5931 = vmatprep.subr.mxu0 %v9893_v60  ;;  %5984 = vmatprep.subr.mxu1 %v9893_v60 }
0x1d63   :  { %5932 = vmatpush3.msk.msra.mxu0 %vm3465_vm9, %v9892_v62  ;;  %5985 = vmatpush3.msk.msra.mxu1 %vm3621_vm10, %v9892_v62 }
0x1d64   :  { %5933 = vmatprep.subr.mxu0 %v9893_v60  ;;  %5986 = vmatprep.subr.mxu1 %v9893_v60 }
0x1d65   :  { %5934 = vmatpush3.msk.msra.mxu0 %vm3464_vm11, %v9892_v62  ;;  %5935 = vmatprep.mubr.msk.f32.mxu0 %vm6369_vm2, %v9893_v60 }
0x1d66   :  { %5987 = vmatpush3.msk.msra.mxu1 %vm3620_vm12, %v9892_v62  ;;  %5988 = vmatprep.mubr.msk.f32.mxu1 %vm6369_vm2, %v9893_v60 }
0x1d67   :  { %5936 = vmatmul.mubr.f32.vlgmr.msra.gmra.mxu0 %v8659_v50  ;;  %5989 = vmatmul.mubr.f32.vlgmr.msra.gmra.mxu1 %v8659_v50 }
0x1d68   :  { %5938 = vmatprep.mubr.msk.f32.mxu0 %vm6369_vm2, %v9893_v60  ;;  %5991 = vmatprep.mubr.msk.f32.mxu1 %vm6369_vm2, %v9893_v60 }
0x1d69   :  { %6009 = vmatprep.subr.mxu0 %v9893_v60  ;;  %6044 = vmatprep.subr.mxu1 %v9893_v60 }
0x1d6b   :  { %5939 = vmatmul.mubr.f32.gmra.mxu0 %v8685_v5  ;;  %5992 = vmatmul.mubr.f32.gmra.mxu1 %v8685_v5 }
0x1d6c   :  { %5941 = vmatprep.mubr.msk.f32.mxu0 %vm6369_vm2, %v9893_v60  ;;  %5994 = vmatprep.mubr.msk.f32.mxu1 %vm6369_vm2, %v9893_v60 }
0x1d6f   :  { %5942 = vmatmul.mubr.f32.gmra.mxu0 %v8732_v18  ;;  %5995 = vmatmul.mubr.f32.gmra.mxu1 %v8732_v18 }
0x1d70   :  { %5944 = vmatprep.mubr.msk.f32.mxu0 %vm6369_vm2, %v9893_v60  ;;  %5997 = vmatprep.mubr.msk.f32.mxu1 %vm6369_vm2, %v9893_v60 }
0x1d73   :  { %5945 = vmatmul.mubr.f32.gmra.mxu0 %v8778_v61  ;;  %5998 = vmatmul.mubr.f32.gmra.mxu1 %v8778_v61 }
0x1d74   :  { %5947 = vmatprep.mubr.msk.f32.mxu0 %vm6369_vm2, %v9893_v60  ;;  %6000 = vmatprep.mubr.msk.f32.mxu1 %vm6369_vm2, %v9893_v60 }
0x1d77   :  { %5948 = vmatmul.mubr.f32.gmra.mxu0 %v8817_v39  ;;  %6001 = vmatmul.mubr.f32.gmra.mxu1 %v8817_v39 }
0x1d78   :  { %5950 = vmatprep.mubr.msk.f32.mxu0 %vm6369_vm2, %v9893_v60  ;;  %6003 = vmatprep.mubr.msk.f32.mxu1 %vm6369_vm2, %v9893_v60 }
0x1d7b   :  { %5951 = vmatmul.mubr.f32.gmra.mxu0 %v8849_v42  ;;  %6004 = vmatmul.mubr.f32.gmra.mxu1 %v8849_v42 }
0x1d7c   :  { %5953 = vmatprep.mubr.msk.f32.mxu0 %vm6369_vm2, %v9893_v60  ;;  %6006 = vmatprep.mubr.msk.f32.mxu1 %vm6369_vm2, %v9893_v60 }
0x1d7f   :  { %5954 = vmatmul.mubr.f32.gmra.mxu0 %v8873_v2  ;;  %6007 = vmatmul.mubr.f32.gmra.mxu1 %v8873_v2 }
0x1d80   :  { %6023 = vmatprep.mubr.msk.f32.mxu0 %vm6369_vm2, %v9893_v60  ;;  %6058 = vmatprep.mubr.msk.f32.mxu1 %vm6369_vm2, %v9893_v60 }
0x1dfa   :  { %v3266_v23 = vpop.f32.mrf.mxu0  ;;  %v3422_v7 = vpop.f32.mrf.mxu1 }
0x1dfb   :  { %v3300_v62 = vmax.f32 %v8659_v50, %v3266_v23 }
0x1dfc   :  { %v5831_v26 = vpop.f32.mrf.mxu0  ;;  %v5884_v27 = vpop.f32.mrf.mxu1 }
0x1dfd   :  { %v8966_v28 = vmax.f32 %v3300_v62, %v3422_v7 }
0x1e00   :  { %v3271_v56 = vpop.f32.mrf.mxu0  ;;  %v3427_v57 = vpop.f32.mrf.mxu1 }
0x1e01   :  { %v3301_v29 = vmax.f32 %v8685_v5, %v3271_v56 }
0x1e02   :  { %v5834_v54 = vpop.f32.mrf.mxu0  ;;  %v5887_v22 = vpop.f32.mrf.mxu1 }
0x1e03   :  { %v8969_v55 = vmax.f32 %v3301_v29, %v3427_v57 }
0x1e06   :  { %v8971_v33 = vpop.f32.mrf.mxu0  ;;  %v3432_v30 = vpop.f32.mrf.mxu1 }
0x1e08   :  { %v5837_v34 = vpop.f32.mrf.mxu0  ;;  %v5890_v45 = vpop.f32.mrf.mxu1 }
0x1e0c   :  { %v3281_v46 = vpop.f32.mrf.mxu0  ;;  %v3437_v41 = vpop.f32.mrf.mxu1 }
0x1e0d   :  { %v3303_v22 = vmax.f32 %v8778_v61, %v3281_v46  ;;  %v3936_v46 = vadd.s32 2, %v9924_v15 }
0x1e0e   :  { %v5840_v50 = vpop.f32.mrf.mxu0  ;;  %v5893_v11 = vpop.f32.mrf.mxu1 }
0x1e0f   :  { %vm3943_vm15 = vcmp.eq.s32.totalorder %v8348_v31, %v3936_v46 }
0x1e12   :  { %v3286_v59 = vpop.f32.mrf.mxu0  ;;  %v3442_v0 = vpop.f32.mrf.mxu1 }
0x1e13   :  { %v3304_v57 = vmax.f32 %v8817_v39, %v3286_v59 }
0x1e14   :  { %v5843_v32 = vpop.f32.mrf.mxu0  ;;  %v5896_v1 = vpop.f32.mrf.mxu1 }
0x1e15   :  { %v3302_v32 = vmax.f32 %v8732_v18, %v8971_v33  ;;  %v3460_v1 = vmax.f32 %v3304_v57, %v3442_v0  ;;  %v4248_v57 = vadd.s32 4, %v9924_v15 }
0x1e17   :  { %v3458_v59 = vmax.f32 %v3302_v32, %v3432_v30  ;;  %v3775_v30 = vadd.s32 1, %v9924_v15 }
0x1e18   :  { %v3291_v51 = vpop.f32.mrf.mxu0  ;;  %v3447_v49 = vpop.f32.mrf.mxu1 }
0x1e19   :  { %v3305_v62 = vmax.f32 %v8849_v42, %v3291_v51  ;;  %vm3782_vm14 = vcmp.eq.s32.totalorder %v8348_v31, %v3775_v30 }
0x1e1a   :  { %v5846_v5 = vpop.f32.mrf.mxu0  ;;  %v5899_v36 = vpop.f32.mrf.mxu1 }
0x1e1b   :  { %v3461_v34 = vmax.f32 %v3305_v62, %v3447_v49  ;;  %v3459_v36 = vmax.f32 %v3303_v22, %v3437_v41  ;;  %v3942_v62 = vadd.s32 2, %v9918_v25  ;;  %v4249_v22 = vadd.s32 4, %v9923_v13 }
0x1e1e   :  { %v3296_v6 = vpop.f32.mrf.mxu0  ;;  %v3452_v63 = vpop.f32.mrf.mxu1 }
0x1e1f   :  { %v3306_v26 = vmax.f32 %v8873_v2, %v3296_v6 }
0x1e20   :  { %v5849_v12 = vpop.f32.mrf.mxu0  ;;  %v5902_v58 = vpop.f32.mrf.mxu1 }
0x1e21   :  { %v3462_v45 = vmax.f32 %v3306_v26, %v3452_v63  ;;  %v3937_v58 = vadd.s32 2, %v9923_v13 }
0x1e23   :  { %vm3944_vm3 = vcmp.eq.s32.totalorder %v8348_v31, %v3937_v58  ;;  %v4416_v58 = vld [vmem:[%s9443_s14 + $0x60] sm:$0xff] }
0x1e27   :  { %v8973_v38 = vpop.f32.mrf.mxu0  ;;  %v8975_v3 = vpop.f32.mrf.mxu1 }
0x1e28   :  { %v3612_v49 = vmax.f32 %v8966_v28, %v8973_v38  ;;  %v3776_v28 = vadd.s32 1, %v9923_v13 }
0x1e29   :  { %v5937_v53 = vpop.f32.mrf.mxu0  ;;  %v5990_v37 = vpop.f32.mrf.mxu1 }
0x1e2a   :  { %v9033_v38 = vmax.f32 %v3612_v49, %v8975_v3  ;;  %v4976_v53 = vsel %vm3782_vm14, 1.0, %v9893_v60  ;;  %v4991_v37 = vsel %vm3943_vm15, 1.0, %v9893_v60  ;;  %vm3783_vm1 = vcmp.eq.s32.totalorder %v8348_v31, %v3776_v28  ;;  %v4418_v49 = vld [vmem:[%s9443_s14 + $0x70] sm:$0xff]  ;;  %v4417_v28 = vld [vmem:[%s9443_s14 + $0x68] sm:$0xff] }
0x1e2b   :  { %v8977_v14 = vpop.f32.mrf.mxu0  ;;  %v8979_v40 = vpop.f32.mrf.mxu1  ;;  %v3777_v3 = vadd.s32 1, %v9922_v10  ;;  %vm3949_vm15 = vcmp.eq.s32.totalorder %v8348_v31, %v3942_v62 }
0x1e2c   :  { %v3613_v41 = vmax.f32 %v8969_v55, %v8977_v14  ;;  %v3938_v14 = vadd.s32 2, %v9922_v10 }
0x1e2d   :  { %v5940_v16 = vpop.f32.mrf.mxu0  ;;  %v5993_v9 = vpop.f32.mrf.mxu1  ;;  %vm3784_vm5 = vcmp.eq.s32.totalorder %v8348_v31, %v3777_v3  ;;  %v4413_v3 = vld [vmem:[%s9443_s14 + $0x48] sm:$0xff] }
0x1e2e   :  { %v9024_v55 = vmax.f32 %v3613_v41, %v8979_v40  ;;  %v4977_v40 = vsel %vm3783_vm1, 1.0, %v9893_v60  ;;  %v4992_v16 = vsel %vm3944_vm3, 1.0, %v9893_v60  ;;  %vm3945_vm6 = vcmp.eq.s32.totalorder %v8348_v31, %v3938_v14  ;;  %v4412_v14 = vld [vmem:[%s9443_s14 + $0x40] sm:$0xff] }
0x1e2f   :  { %v3588_v52 = vpop.f32.mrf.mxu0  ;;  %v3744_v44 = vpop.f32.mrf.mxu1  ;;  %v3778_v9 = vadd.s32 1, %v9921_v4  ;;  %vm4255_vm3 = vcmp.eq.s32.totalorder %v8348_v31, %v4248_v57 }
0x1e30   :  { %v3614_v18 = vmax.f32 %v3458_v59, %v3588_v52  ;;  %v3939_v52 = vadd.s32 2, %v9921_v4 }
0x1e31   :  { %v5943_v17 = vpop.f32.mrf.mxu0  ;;  %v5996_v8 = vpop.f32.mrf.mxu1  ;;  %vm3785_vm7 = vcmp.eq.s32.totalorder %v8348_v31, %v3778_v9  ;;  %v4409_v9 = vld [vmem:[%s9443_s14 + $0x28] sm:$0xff] }
0x1e32   :  { %v9015_v63 = vmax.f32 %v3614_v18, %v3744_v44  ;;  %v4978_v44 = vsel %vm3784_vm5, 1.0, %v9893_v60  ;;  %v4993_v17 = vsel %vm3945_vm6, 1.0, %v9893_v60  ;;  %vm3946_vm8 = vcmp.eq.s32.totalorder %v8348_v31, %v3939_v52  ;;  %v4408_v52 = vld [vmem:[%s9443_s14 + $0x20] sm:$0xff] }
0x1e33   :  { %v3593_v35 = vpop.f32.mrf.mxu0  ;;  %v3749_v43 = vpop.f32.mrf.mxu1  ;;  %v3779_v8 = vadd.s32 1, %v9920_v20  ;;  %vm4256_vm6 = vcmp.eq.s32.totalorder %v8348_v31, %v4249_v22  ;;  %v4254_v18 = vadd.s32 4, %v9918_v25 }
0x1e34   :  { %v3615_v12 = vmax.f32 %v3459_v36, %v3593_v35  ;;  %v3940_v35 = vadd.s32 2, %v9920_v20  ;;  %v5022_v32 = vsel %vm4256_vm6, 1.0, %v9893_v60 }
0x1e35   :  { %v5946_v24 = vpop.f32.mrf.mxu0  ;;  %v5999_v21 = vpop.f32.mrf.mxu1  ;;  %vm3786_vm9 = vcmp.eq.s32.totalorder %v8348_v31, %v3779_v8  ;;  %v4405_v8 = vld [vmem:[%s9443_s14 + $0x8] sm:$0xff] }
0x1e36   :  { %v9007_v0 = vmax.f32 %v3615_v12, %v3749_v43  ;;  %v4979_v43 = vsel %vm3785_vm7, 1.0, %v9893_v60  ;;  %v4994_v24 = vsel %vm3946_vm8, 1.0, %v9893_v60  ;;  %vm3947_vm10 = vcmp.eq.s32.totalorder %v8348_v31, %v3940_v35  ;;  %v4404_v35 = vld [vmem:[%s9443_s14] sm:$0xff] }
0x1e37   :  { %v3598_v47 = vpop.f32.mrf.mxu0  ;;  %v3754_v19 = vpop.f32.mrf.mxu1  ;;  %v3780_v21 = vadd.s32 1, %v9919_v48 }
0x1e38   :  { %v3616_v6 = vmax.f32 %v3460_v1, %v3598_v47  ;;  %v3941_v47 = vadd.s32 2, %v9919_v48  ;;  %v4251_v1 = vadd.s32 4, %v9921_v4 }
0x1e39   :  { %v5949_v23 = vpop.f32.mrf.mxu0  ;;  %v6002_v7 = vpop.f32.mrf.mxu1  ;;  %vm3787_vm11 = vcmp.eq.s32.totalorder %v8348_v31, %v3780_v21 }
0x1e3a   :  { %v8997_v33 = vmax.f32 %v3616_v6, %v3754_v19  ;;  %v4980_v19 = vsel %vm3786_vm9, 1.0, %v9893_v60  ;;  %v4995_v23 = vsel %vm3947_vm10, 1.0, %v9893_v60  ;;  %vm3948_vm12 = vcmp.eq.s32.totalorder %v8348_v31, %v3941_v47 }
0x1e3b   :  { %v3603_v27 = vpop.f32.mrf.mxu0  ;;  %v3759_v56 = vpop.f32.mrf.mxu1  ;;  %v3781_v7 = vadd.s32 1, %v9918_v25  ;;  %v4981_v26 = vsel %vm3787_vm11, 1.0, %v9893_v60  ;;  %vm4258_vm10 = vcmp.eq.s32.totalorder %v8348_v31, %v4251_v1  ;;  %v4253_v6 = vadd.s32 4, %v9919_v48 }
0x1e3c   :  { %v3617_v5 = vmax.f32 %v3461_v34, %v3603_v27  ;;  %v4996_v27 = vsel %vm3948_vm12, 1.0, %v9893_v60  ;;  %v5024_v36 = vsel %vm4258_vm10, 1.0, %v9893_v60 }
0x1e3d   :  { %v5952_v29 = vpop.f32.mrf.mxu0  ;;  %v6005_v54 = vpop.f32.mrf.mxu1  ;;  %vm3788_vm14 = vcmp.eq.s32.totalorder %v8348_v31, %v3781_v7 }
0x1e3e   :  { %v8989_v61 = vmax.f32 %v3617_v5, %v3759_v56  ;;  %v4092_v56 = vadd.s32 3, %v9924_v15  ;;  %v4982_v29 = vsel %vm3788_vm14, 1.0, %v9893_v60  ;;  %v4997_v54 = vsel %vm3949_vm15, 1.0, %v9893_v60 }
0x1e3f   :  { %v3608_v50 = vpop.f32.mrf.mxu0  ;;  %v3764_v11 = vpop.f32.mrf.mxu1  ;;  %v4093_v15 = vadd.s32 3, %v9923_v13  ;;  %v4094_v13 = vadd.s32 3, %v9922_v10  ;;  %vm4260_vm15 = vcmp.eq.s32.totalorder %v8348_v31, %v4253_v6 }
0x1e40   :  { %v3618_v42 = vmax.f32 %v3462_v45, %v3608_v50  ;;  %vm4099_vm1 = vcmp.eq.s32.totalorder %v8348_v31, %v4092_v56  ;;  %v5021_v45 = vsel %vm4255_vm3, 1.0, %v9893_v60  ;;  %v4250_v50 = vadd.s32 4, %v9922_v10 }
0x1e41   :  { %v5955_v51 = vpop.f32.mrf.mxu0  ;;  %v6008_v2 = vpop.f32.mrf.mxu1  ;;  %v5006_v34 = vsel %vm4099_vm1, 1.0, %v9893_v60  ;;  %vm4100_vm5 = vcmp.eq.s32.totalorder %v8348_v31, %v4093_v15  ;;  %vm4101_vm7 = vcmp.eq.s32.totalorder %v8348_v31, %v4094_v13  ;;  %v4095_v10 = vadd.s32 3, %v9921_v4 }
0x1e42   :  { %v8987_v39 = vmax.f32 %v3618_v42, %v3764_v11  ;;  %v5007_v11 = vsel %vm4100_vm5, 1.0, %v9893_v60  ;;  %vm4257_vm8 = vcmp.eq.s32.totalorder %v8348_v31, %v4250_v50  ;;  %v5008_v5 = vsel %vm4101_vm7, 1.0, %v9893_v60 }
0x1e43   :  { %v5023_v42 = vsel %vm4257_vm8, 1.0, %v9893_v60  ;;  %vm4102_vm9 = vcmp.eq.s32.totalorder %v8348_v31, %v4095_v10  ;;  %v4096_v4 = vadd.s32 3, %v9920_v20  ;;  %v4252_v51 = vadd.s32 4, %v9920_v20 }
0x1e44   :  { %6010 = vmatpush3.msk.msra.mxu0 %vm3825_vm13, %v8987_v39  ;;  %6045 = vmatpush3.msk.msra.mxu1 %vm3825_vm13, %v8987_v39  ;;  %v5009_v2 = vsel %vm4102_vm9, 1.0, %v9893_v60  ;;  %v4097_v20 = vadd.s32 3, %v9919_v48  ;;  %v4098_v48 = vadd.s32 3, %v9918_v25  ;;  %v5026_v46 = vsel %vm4260_vm15, 1.0, %v9893_v60 }
0x1e45   :  { %6011 = vmatprep.subr.mxu0 %v9893_v60  ;;  %6046 = vmatprep.subr.mxu1 %v9893_v60  ;;  %vm4103_vm11 = vcmp.eq.s32.totalorder %v8348_v31, %v4096_v4  ;;  %vm4259_vm12 = vcmp.eq.s32.totalorder %v8348_v31, %v4252_v51  ;;  %vm4261_vm3 = vcmp.eq.s32.totalorder %v8348_v31, %v4254_v18  ;;  %vm4628_vm5 = vcmask 31744  }
0x1e46   :  { %6012 = vmatpush3.msra.mxu0 %v8989_v61  ;;  %6047 = vmatpush3.msra.mxu1 %v8989_v61  ;;  %v5010_v59 = vsel %vm4103_vm11, 1.0, %v9893_v60  ;;  %v5025_v12 = vsel %vm4259_vm12, 1.0, %v9893_v60  ;;  %vm4104_vm14 = vcmp.eq.s32.totalorder %v8348_v31, %v4097_v20  ;;  %vm4105_vm1 = vcmp.eq.s32.totalorder %v8348_v31, %v4098_v48  ;;  %v4419_v31 = vld [vmem:[%s9443_s14 + $0x78] sm:$0xff] }
0x1e47   :  { %6013 = vmatprep.subr.mxu0 %v9893_v60  ;;  %6048 = vmatprep.subr.mxu1 %v9893_v60  ;;  %v5011_v30 = vsel %vm4104_vm14, 1.0, %v9893_v60  ;;  %v5012_v25 = vsel %vm4105_vm1, 1.0, %v9893_v60  ;;  %v5027_v41 = vsel %vm4261_vm3, 1.0, %v9893_v60 }
0x1e48   :  { %6014 = vmatpush3.msra.mxu0 %v8997_v33  ;;  %6049 = vmatpush3.msra.mxu1 %v8997_v33 }
0x1e49   :  { %6015 = vmatprep.subr.mxu0 %v9893_v60  ;;  %6050 = vmatprep.subr.mxu1 %v9893_v60 }
0x1e4a   :  { %6016 = vmatpush3.msra.mxu0 %v9007_v0  ;;  %6051 = vmatpush3.msra.mxu1 %v9007_v0 }
0x1e4b   :  { %6017 = vmatprep.subr.mxu0 %v9893_v60  ;;  %6052 = vmatprep.subr.mxu1 %v9893_v60 }
0x1e4c   :  { %6018 = vmatpush3.msra.mxu0 %v9015_v63  ;;  %6053 = vmatpush3.msra.mxu1 %v9015_v63 }
0x1e4d   :  { %6019 = vmatprep.subr.mxu0 %v9893_v60  ;;  %6054 = vmatprep.subr.mxu1 %v9893_v60 }
0x1e4e   :  { %6020 = vmatpush3.msra.mxu0 %v9024_v55  ;;  %6055 = vmatpush3.msra.mxu1 %v9024_v55 }
0x1e4f   :  { %6021 = vmatprep.subr.mxu0 %v9893_v60  ;;  %6056 = vmatprep.subr.mxu1 %v9893_v60 }
0x1e50   :  { %6022 = vmatpush3.msra.mxu0 %v9033_v38  ;;  %6057 = vmatpush3.msra.mxu1 %v9033_v38 }
0x1e51   :  { %6024 = vmatmul.mubr.msk.f32.vlgmr.msra.gmra.mxu0 %vm3803_vm0, %v4976_v53  ;;  %6059 = vmatmul.mubr.msk.f32.vlgmr.msra.gmra.mxu1 %vm3803_vm0, %v4991_v37  ;;  %v4415_v53 = vld [vmem:[%s9443_s14 + $0x58] sm:$0xff]  ;;  %v4414_v37 = vld [vmem:[%s9443_s14 + $0x50] sm:$0xff] }
0x1e52   :  { %6079 = vmatprep.subr.mxu0 %v9893_v60  ;;  %6114 = vmatprep.subr.mxu1 %v9893_v60 }
0x1e53   :  { %6080 = vmatpush3.msk.msra.mxu0 %vm3825_vm13, %v8987_v39  ;;  %6115 = vmatpush3.msk.msra.mxu1 %vm3825_vm13, %v8987_v39 }
0x1e54   :  { %6081 = vmatprep.subr.mxu0 %v9893_v60  ;;  %6116 = vmatprep.subr.mxu1 %v9893_v60 }
0x1e55   :  { %6026 = vmatprep.mubr.msk.f32.mxu0 %vm6369_vm2, %v9893_v60  ;;  %6061 = vmatprep.mubr.msk.f32.mxu1 %vm6369_vm2, %v9893_v60 }
0x1e56   :  { %6082 = vmatpush3.msra.mxu0 %v8989_v61  ;;  %6117 = vmatpush3.msra.mxu1 %v8989_v61 }
0x1e57   :  { %6027 = vmatmul.mubr.msk.f32.gmra.mxu0 %vm3803_vm0, %v4977_v40  ;;  %6062 = vmatmul.mubr.msk.f32.gmra.mxu1 %vm3803_vm0, %v4992_v16  ;;  %v4411_v40 = vld [vmem:[%s9443_s14 + $0x38] sm:$0xff]  ;;  %v4410_v16 = vld [vmem:[%s9443_s14 + $0x30] sm:$0xff] }
0x1e58   :  { %6083 = vmatprep.subr.mxu0 %v9893_v60  ;;  %6118 = vmatprep.subr.mxu1 %v9893_v60 }
0x1e59   :  { %6084 = vmatpush3.msra.mxu0 %v8997_v33  ;;  %6119 = vmatpush3.msra.mxu1 %v8997_v33 }
0x1e5a   :  { %6085 = vmatprep.subr.mxu0 %v9893_v60  ;;  %6120 = vmatprep.subr.mxu1 %v9893_v60 }
0x1e5b   :  { %6029 = vmatprep.mubr.msk.f32.mxu0 %vm6369_vm2, %v9893_v60  ;;  %6064 = vmatprep.mubr.msk.f32.mxu1 %vm6369_vm2, %v9893_v60 }
0x1e5c   :  { %6086 = vmatpush3.msra.mxu0 %v9007_v0  ;;  %6121 = vmatpush3.msra.mxu1 %v9007_v0 }
0x1e5d   :  { %6030 = vmatmul.mubr.msk.f32.gmra.mxu0 %vm3803_vm0, %v4978_v44  ;;  %6065 = vmatmul.mubr.msk.f32.gmra.mxu1 %vm3803_vm0, %v4993_v17  ;;  %v4407_v44 = vld [vmem:[%s9443_s14 + $0x18] sm:$0xff]  ;;  %v4406_v17 = vld [vmem:[%s9443_s14 + $0x10] sm:$0xff]  ;;  %s4791_s14 = sshll.u32 %s6373_s9, 4  ;;  %s4792_s14 = int_to_ptr.vmem [resolvable:$true] %s4791_s14 }
0x1e5e   :  { %6087 = vmatprep.subr.mxu0 %v9893_v60  ;;  %6122 = vmatprep.subr.mxu1 %v9893_v60  ;;  %p6346_p1 = scmp.lt.s32.totalorder %s4792_s14, %s4792_s14 }
0x1e5f   :  { %6088 = vmatpush3.msra.mxu0 %v9015_v63  ;;  %6123 = vmatpush3.msra.mxu1 %v9015_v63 }
0x1e60   :  { %6089 = vmatprep.subr.mxu0 %v9893_v60  ;;  %6124 = vmatprep.subr.mxu1 %v9893_v60 }
0x1e61   :  { %6032 = vmatprep.mubr.msk.f32.mxu0 %vm6369_vm2, %v9893_v60  ;;  %6067 = vmatprep.mubr.msk.f32.mxu1 %vm6369_vm2, %v9893_v60 }
0x1e62   :  { %6090 = vmatpush3.msra.mxu0 %v9024_v55  ;;  %6125 = vmatpush3.msra.mxu1 %v9024_v55 }
0x1e63   :  { %6033 = vmatmul.mubr.msk.f32.gmra.mxu0 %vm3803_vm0, %v4979_v43  ;;  %6068 = vmatmul.mubr.msk.f32.gmra.mxu1 %vm3803_vm0, %v4994_v24 }
0x1e64   :  { %6091 = vmatprep.subr.mxu0 %v9893_v60  ;;  %6126 = vmatprep.subr.mxu1 %v9893_v60 }
0x1e65   :  { %6092 = vmatpush3.msra.mxu0 %v9033_v38  ;;  %6127 = vmatpush3.msra.mxu1 %v9033_v38 }
0x1e66   :  { %6035 = vmatprep.mubr.msk.f32.mxu0 %vm6369_vm2, %v9893_v60  ;;  %6070 = vmatprep.mubr.msk.f32.mxu1 %vm6369_vm2, %v9893_v60 }
0x1e67   :  { %6036 = vmatmul.mubr.msk.f32.gmra.mxu0 %vm3803_vm0, %v4980_v19  ;;  %6071 = vmatmul.mubr.msk.f32.gmra.mxu1 %vm3803_vm0, %v4995_v23 }
0x1e68   :  { %6038 = vmatprep.mubr.msk.f32.mxu0 %vm6369_vm2, %v9893_v60  ;;  %6073 = vmatprep.mubr.msk.f32.mxu1 %vm6369_vm2, %v9893_v60 }
0x1e69   :  { %6149 = vmatprep.subr.mxu0 %v9893_v60  ;;  %6202 = vmatprep.subr.mxu1 %v9893_v60 }
0x1e6b   :  { %6039 = vmatmul.mubr.msk.f32.gmra.mxu0 %vm3803_vm0, %v4981_v26  ;;  %6074 = vmatmul.mubr.msk.f32.gmra.mxu1 %vm3803_vm0, %v4996_v27 }
0x1e6c   :  { %6041 = vmatprep.mubr.msk.f32.mxu0 %vm6369_vm2, %v9893_v60  ;;  %6076 = vmatprep.mubr.msk.f32.mxu1 %vm6369_vm2, %v9893_v60 }
0x1e6f   :  { %6042 = vmatmul.mubr.msk.f32.gmra.mxu0 %vm3803_vm0, %v4982_v29  ;;  %6077 = vmatmul.mubr.msk.f32.gmra.mxu1 %vm3803_vm0, %v4997_v54 }
0x1e70   :  { %6093 = vmatprep.mubr.msk.f32.mxu0 %vm6369_vm2, %v9893_v60  ;;  %6128 = vmatprep.mubr.msk.f32.mxu1 %vm6369_vm2, %v9893_v60 }
0x1e73   :  { %6094 = vmatmul.mubr.msk.f32.vlgmr.msra.gmra.mxu0 %vm3803_vm0, %v5006_v34  ;;  %6129 = vmatmul.mubr.msk.f32.vlgmr.msra.gmra.mxu1 %vm3803_vm0, %v5021_v45 }
0x1e74   :  { %6096 = vmatprep.mubr.msk.f32.mxu0 %vm6369_vm2, %v9893_v60  ;;  %6131 = vmatprep.mubr.msk.f32.mxu1 %vm6369_vm2, %v9893_v60 }
0x1e75   :  { %6150 = vmatpush3.msra.mxu0 %v4419_v31 }
0x1e76   :  { %6151 = vmatprep.subr.mxu0 %v9893_v60 }
0x1e77   :  { %6097 = vmatmul.mubr.msk.f32.gmra.mxu0 %vm3803_vm0, %v5007_v11  ;;  %6132 = vmatmul.mubr.msk.f32.gmra.mxu1 %vm3803_vm0, %v5022_v32 }
0x1e78   :  { %6099 = vmatprep.mubr.msk.f32.mxu0 %vm6369_vm2, %v9893_v60  ;;  %6134 = vmatprep.mubr.msk.f32.mxu1 %vm6369_vm2, %v9893_v60 }
0x1e79   :  { %6152 = vmatpush3.msra.mxu0 %v4418_v49 }
0x1e7a   :  { %6153 = vmatprep.subr.mxu0 %v9893_v60 }
0x1e7b   :  { %6100 = vmatmul.mubr.msk.f32.gmra.mxu0 %vm3803_vm0, %v5008_v5  ;;  %6135 = vmatmul.mubr.msk.f32.gmra.mxu1 %vm3803_vm0, %v5023_v42 }
0x1e7c   :  { %6102 = vmatprep.mubr.msk.f32.mxu0 %vm6369_vm2, %v9893_v60  ;;  %6137 = vmatprep.mubr.msk.f32.mxu1 %vm6369_vm2, %v9893_v60 }
0x1e7d   :  { %6154 = vmatpush3.msra.mxu0 %v4417_v28 }
0x1e7e   :  { %6155 = vmatprep.subr.mxu0 %v9893_v60 }
0x1e7f   :  { %6103 = vmatmul.mubr.msk.f32.gmra.mxu0 %vm3803_vm0, %v5009_v2  ;;  %6138 = vmatmul.mubr.msk.f32.gmra.mxu1 %vm3803_vm0, %v5024_v36 }
0x1e80   :  { %6105 = vmatprep.mubr.msk.f32.mxu0 %vm6369_vm2, %v9893_v60  ;;  %6140 = vmatprep.mubr.msk.f32.mxu1 %vm6369_vm2, %v9893_v60 }
0x1e81   :  { %6156 = vmatpush3.msra.mxu0 %v4416_v58 }
0x1e82   :  { %6157 = vmatprep.subr.mxu0 %v9893_v60 }
0x1e83   :  { %6106 = vmatmul.mubr.msk.f32.gmra.mxu0 %vm3803_vm0, %v5010_v59  ;;  %6141 = vmatmul.mubr.msk.f32.gmra.mxu1 %vm3803_vm0, %v5025_v12 }
0x1e84   :  { %6108 = vmatprep.mubr.msk.f32.mxu0 %vm6369_vm2, %v9893_v60  ;;  %6143 = vmatprep.mubr.msk.f32.mxu1 %vm6369_vm2, %v9893_v60 }
0x1e85   :  { %6158 = vmatpush3.msra.mxu0 %v4415_v53 }
0x1e86   :  { %6159 = vmatprep.subr.mxu0 %v9893_v60 }
0x1e87   :  { %6109 = vmatmul.mubr.msk.f32.gmra.mxu0 %vm3803_vm0, %v5011_v30  ;;  %6144 = vmatmul.mubr.msk.f32.gmra.mxu1 %vm3803_vm0, %v5026_v46 }
0x1e88   :  { %6111 = vmatprep.mubr.msk.f32.mxu0 %vm6369_vm2, %v9893_v60  ;;  %6146 = vmatprep.mubr.msk.f32.mxu1 %vm6369_vm2, %v9893_v60 }
0x1e89   :  { %6160 = vmatpush3.msra.mxu0 %v4414_v37 }
0x1e8a   :  { %6161 = vmatprep.subr.mxu0 %v9893_v60 }
0x1e8b   :  { %6112 = vmatmul.mubr.msk.f32.gmra.mxu0 %vm3803_vm0, %v5012_v25  ;;  %6147 = vmatmul.mubr.msk.f32.gmra.mxu1 %vm3803_vm0, %v5027_v41 }
0x1e8c   :  { %6181 = vmatprep.mubr.msk.f32.mxu0 %vm6369_vm2, %v9893_v60  ;;  %6216 = vmatprep.mubr.msk.f32.mxu1 %vm6369_vm2, %v9893_v60 }
0x1e8d   :  { %6162 = vmatpush3.msra.mxu0 %v4413_v3 }
0x1e8e   :  { %6163 = vmatprep.subr.mxu0 %v9893_v60 }
0x1e8f   :  { %6164 = vmatpush3.msra.mxu0 %v4412_v14 }
0x1e90   :  { %6165 = vmatprep.subr.mxu0 %v9893_v60 }
0x1e91   :  { %6166 = vmatpush3.msra.mxu0 %v4411_v40 }
0x1e92   :  { %6167 = vmatprep.subr.mxu0 %v9893_v60 }
0x1e93   :  { %6168 = vmatpush3.msra.mxu0 %v4410_v16 }
0x1e94   :  { %6169 = vmatprep.subr.mxu0 %v9893_v60 }
0x1e95   :  { %6170 = vmatpush3.msra.mxu0 %v4409_v9 }
0x1e96   :  { %6171 = vmatprep.subr.mxu0 %v9893_v60 }
0x1e97   :  { %6172 = vmatpush3.msra.mxu0 %v4408_v52 }
0x1e98   :  { %6173 = vmatprep.subr.mxu0 %v9893_v60 }
0x1e99   :  { %6174 = vmatpush3.msra.mxu0 %v4407_v44 }
0x1e9a   :  { %6175 = vmatprep.subr.mxu0 %v9893_v60 }
0x1e9b   :  { %6176 = vmatpush3.msra.mxu0 %v4406_v17 }
0x1e9c   :  { %6177 = vmatprep.subr.mxu0 %v9893_v60 }
0x1e9d   :  { %6178 = vmatpush3.msra.mxu0 %v4405_v8 }
0x1e9e   :  { %6179 = vmatprep.subr.mxu0 %v9893_v60 }
0x1e9f   :  { %6180 = vmatpush3.msra.mxu0 %v4404_v35 }
0x1ea0   :  { %6224 = vmatprep.subr.mxu0 %v9893_v60 }
0x1f11   :  { %v3895_v43 = vpop.f32.mrf.mxu0  ;;  %v4051_v24 = vpop.f32.mrf.mxu1 }
0x1f12   :  { %v3929_v5 = vmax.f32 %v9033_v38, %v3895_v43 }
0x1f13   :  { %v6025_v21 = vpop.f32.mrf.mxu0  ;;  %v6060_v47 = vpop.f32.mrf.mxu1 }
0x1f14   :  { %v4085_v36 = vmax.f32 %v3929_v5, %v4051_v24  ;;  %v4623_v5 = vld [vmem:[%s9446_s17 + $0x60] sm:$0xff] }
0x1f17   :  { %v3900_v19 = vpop.f32.mrf.mxu0  ;;  %v4056_v23 = vpop.f32.mrf.mxu1 }
0x1f18   :  { %v3930_v20 = vmax.f32 %v9024_v55, %v3900_v19 }
0x1f19   :  { %v6028_v7 = vpop.f32.mrf.mxu0  ;;  %v6063_v62 = vpop.f32.mrf.mxu1 }
0x1f1a   :  { %v4086_v30 = vmax.f32 %v3930_v20, %v4056_v23  ;;  %v4617_v20 = vld [vmem:[%s9446_s17 + $0x30] sm:$0xff] }
0x1f1d   :  { %v3905_v26 = vpop.f32.mrf.mxu0  ;;  %v4061_v27 = vpop.f32.mrf.mxu1 }
0x1f1e   :  { %v3931_v46 = vmax.f32 %v9015_v63, %v3905_v26 }
0x1f1f   :  { %v6031_v56 = vpop.f32.mrf.mxu0  ;;  %v6066_v57 = vpop.f32.mrf.mxu1 }
0x1f20   :  { %v4087_v58 = vmax.f32 %v3931_v46, %v4061_v27 }
0x1f23   :  { %v3910_v29 = vpop.f32.mrf.mxu0  ;;  %v4066_v54 = vpop.f32.mrf.mxu1 }
0x1f24   :  { %v3932_v55 = vmax.f32 %v9007_v0, %v3910_v29 }
0x1f25   :  { %v6034_v15 = vpop.f32.mrf.mxu0  ;;  %v6069_v22 = vpop.f32.mrf.mxu1 }
0x1f26   :  { %v4088_v16 = vmax.f32 %v3932_v55, %v4066_v54 }
0x1f27   :  { %v3915_v34 = vpop.f32.mrf.mxu0  ;;  %v4071_v45 = vpop.f32.mrf.mxu1 }
0x1f28   :  { %v3933_v9 = vmax.f32 %v8997_v33, %v3915_v34 }
0x1f29   :  { %v6037_v13 = vpop.f32.mrf.mxu0  ;;  %v6072_v50 = vpop.f32.mrf.mxu1 }
0x1f2a   :  { %v4089_v43 = vmax.f32 %v3933_v9, %v4071_v45 }
0x1f2b   :  { %v3920_v11 = vpop.f32.mrf.mxu0  ;;  %v4076_v32 = vpop.f32.mrf.mxu1 }
0x1f2c   :  { %v3934_v24 = vmax.f32 %v8989_v61, %v3920_v11 }
0x1f2d   :  { %v6040_v10 = vpop.f32.mrf.mxu0  ;;  %v6075_v1 = vpop.f32.mrf.mxu1 }
0x1f2e   :  { %v4090_v62 = vmax.f32 %v3934_v24, %v4076_v32  ;;  %v4626_v32 = vld [vmem:[%s9446_s17 + $0x78] sm:$0xff]  ;;  %v4625_v10 = vld [vmem:[%s9446_s17 + $0x70] sm:$0xff]  ;;  %v4624_v1 = vld [vmem:[%s9446_s17 + $0x68] sm:$0xff] }
0x1f2f   :  { %v3925_v42 = vpop.f32.mrf.mxu0  ;;  %v4081_v4 = vpop.f32.mrf.mxu1  ;;  %v4521_v24 = vld [vmem:[%s9444_s15] sm:$0xff] }
0x1f30   :  { %v3935_v26 = vmax.f32 %v8987_v39, %v3925_v42  ;;  %v4622_v42 = vld [vmem:[%s9446_s17 + $0x58] sm:$0xff] }
0x1f31   :  { %v6043_v51 = vpop.f32.mrf.mxu0  ;;  %v6078_v2 = vpop.f32.mrf.mxu1 }
0x1f32   :  { %v4091_v15 = vmax.f32 %v3935_v26, %v4081_v4  ;;  %v4621_v4 = vld [vmem:[%s9446_s17 + $0x50] sm:$0xff]  ;;  %v4620_v51 = vld [vmem:[%s9446_s17 + $0x48] sm:$0xff]  ;;  %v4619_v2 = vld [vmem:[%s9446_s17 + $0x40] sm:$0xff] }
0x1f33   :  { %v4207_v6 = vpop.f32.mrf.mxu0  ;;  %v4363_v59 = vpop.f32.mrf.mxu1 }
0x1f34   :  { %v4241_v12 = vmax.f32 %v4085_v36, %v4207_v6  ;;  %v4618_v36 = vld [vmem:[%s9446_s17 + $0x38] sm:$0xff]  ;;  %v4616_v6 = vld [vmem:[%s9446_s17 + $0x28] sm:$0xff] }
0x1f35   :  { %v6095_v48 = vpop.f32.mrf.mxu0  ;;  %v6130_v18 = vpop.f32.mrf.mxu1 }
0x1f36   :  { %v4397_v25 = vmax.f32 %v4241_v12, %v4363_v59  ;;  %v4615_v59 = vld [vmem:[%s9446_s17 + $0x20] sm:$0xff]  ;;  %v4614_v12 = vld [vmem:[%s9446_s17 + $0x18] sm:$0xff]  ;;  %v4613_v48 = vld [vmem:[%s9446_s17 + $0x10] sm:$0xff] }
0x1f37   :  { %v4212_v41 = vpop.f32.mrf.mxu0  ;;  %v4368_v31 = vpop.f32.mrf.mxu1  ;;  %v4612_v18 = vld [vmem:[%s9446_s17 + $0x8] sm:$0xff] }
0x1f38   :  { %v4242_v49 = vmax.f32 %v4086_v30, %v4212_v41  ;;  %6182 = vmatmul.mubr.f32.vlgmr.msra.gmra.mxu0 %v4397_v25 }
0x1f39   :  { %v6098_v38 = vpop.f32.mrf.mxu0  ;;  %v6133_v28 = vpop.f32.mrf.mxu1  ;;  %6184 = vmatprep.mubr.msk.f32.mxu0 %vm6369_vm2, %v9893_v60  ;;  %6225 = vmatpush3.msra.mxu0 %v4626_v32 }
0x1f3a   :  { %v4398_v53 = vmax.f32 %v4242_v49, %v4368_v31  ;;  %6226 = vmatprep.subr.mxu0 %v9893_v60 }
0x1f3b   :  { %v4217_v37 = vpop.f32.mrf.mxu0  ;;  %v4373_v3 = vpop.f32.mrf.mxu1  ;;  %6227 = vmatpush3.msra.mxu0 %v4625_v10 }
0x1f3c   :  { %v4243_v14 = vmax.f32 %v4087_v58, %v4217_v37  ;;  %6185 = vmatmul.mubr.f32.gmra.mxu0 %v4398_v53  ;;  %6228 = vmatprep.subr.mxu0 %v9893_v60 }
0x1f3d   :  { %v6101_v40 = vpop.f32.mrf.mxu0  ;;  %v6136_v63 = vpop.f32.mrf.mxu1  ;;  %6187 = vmatprep.mubr.msk.f32.mxu0 %vm6369_vm2, %v9893_v60  ;;  %6229 = vmatpush3.msra.mxu0 %v4624_v1 }
0x1f3e   :  { %v4399_v52 = vmax.f32 %v4243_v14, %v4373_v3  ;;  %6230 = vmatprep.subr.mxu0 %v9893_v60  ;;  %v4527_v3 = vld [vmem:[%s9444_s15 + $0x30] sm:$0x3]  ;;  %v4526_v14 = vld [vmem:[%s9444_s15 + $0x28] sm:$0xff] }
0x1f3f   :  { %v4222_v44 = vpop.f32.mrf.mxu0  ;;  %v4378_v17 = vpop.f32.mrf.mxu1  ;;  %6231 = vmatpush3.msra.mxu0 %v4623_v5 }
0x1f40   :  { %v4244_v8 = vmax.f32 %v4088_v16, %v4222_v44  ;;  %6188 = vmatmul.mubr.f32.gmra.mxu0 %v4399_v52  ;;  %6232 = vmatprep.subr.mxu0 %v9893_v60  ;;  %v4525_v16 = vld [vmem:[%s9444_s15 + $0x20] sm:$0xff]  ;;  %v4524_v44 = vld [vmem:[%s9444_s15 + $0x18] sm:$0xff] }
0x1f41   :  { %v6104_v35 = vpop.f32.mrf.mxu0  ;;  %v6139_v0 = vpop.f32.mrf.mxu1  ;;  %6190 = vmatprep.mubr.msk.f32.mxu0 %vm6369_vm2, %v9893_v60  ;;  %6233 = vmatpush3.msra.mxu0 %v4622_v42 }
0x1f42   :  { %v4400_v21 = vmax.f32 %v4244_v8, %v4378_v17  ;;  %6234 = vmatprep.subr.mxu0 %v9893_v60  ;;  %v4523_v8 = vld [vmem:[%s9444_s15 + $0x10] sm:$0xff]  ;;  %v4522_v0 = vld [vmem:[%s9444_s15 + $0x8] sm:$0xff] }
0x1f43   :  { %v4227_v47 = vpop.f32.mrf.mxu0  ;;  %v4383_v19 = vpop.f32.mrf.mxu1  ;;  %6235 = vmatpush3.msra.mxu0 %v4621_v4 }
0x1f44   :  { %v4245_v23 = vmax.f32 %v4089_v43, %v4227_v47  ;;  %6191 = vmatmul.mubr.f32.gmra.mxu0 %v4400_v21  ;;  %6236 = vmatprep.subr.mxu0 %v9893_v60 }
0x1f45   :  { %v6107_v7 = vpop.f32.mrf.mxu0  ;;  %v6142_v33 = vpop.f32.mrf.mxu1  ;;  %6193 = vmatprep.mubr.msk.f32.mxu0 %vm6369_vm2, %v9893_v60  ;;  %6237 = vmatpush3.msra.mxu0 %v4620_v51 }
0x1f46   :  { %v4401_v27 = vmax.f32 %v4245_v23, %v4383_v19  ;;  %6238 = vmatprep.subr.mxu0 %v9893_v60  ;;  %v4520_v19 = vld [vmem:[%s9445_s16] sm:$0x3] }
0x1f47   :  { %v4232_v56 = vpop.f32.mrf.mxu0  ;;  %v4388_v57 = vpop.f32.mrf.mxu1  ;;  %6239 = vmatpush3.msra.mxu0 %v4619_v2  ;;  %v4627_v23 = vld [vmem:[%s9447_s18] sm:$0xf] }
0x1f48   :  { %v4246_v29 = vmax.f32 %v4090_v62, %v4232_v56  ;;  %6194 = vmatmul.mubr.f32.gmra.mxu0 %v4401_v27  ;;  %6240 = vmatprep.subr.mxu0 %v9893_v60  ;;  %v4611_v7 = vld [vmem:[%s9446_s17] sm:$0xff]  ;;  %s6341_s17 = scalar_lea.vmem %s4792_s14, 32 }
0x1f49   :  { %v6110_v54 = vpop.f32.mrf.mxu0  ;;  %v6145_v61 = vpop.f32.mrf.mxu1  ;;  %6196 = vmatprep.mubr.msk.f32.mxu0 %vm6369_vm2, %v9893_v60  ;;  %6241 = vmatpush3.msra.mxu0 %v4618_v36  ;;  %v9925_v33 = vld [vmem:[#allocation197_spill] sm:$0xff]  ;;  %p6342_p0 = scmp.ne.s32.totalorder %s4792_s14, %s6341_s17  ;;  %p6347_p2 = scmp.lt.s32.totalorder %s6341_s17, %s6341_s17 }
0x1f4a   :  { %v4402_v22 = vmax.f32 %v4246_v29, %v4388_v57  ;;  %6242 = vmatprep.subr.mxu0 %v9893_v60  ;;  %v5040_v29 = vld [vmem:[%s9448_s19] ss:$0 sm:$0xff] }
0x1f4b   :  { %v4237_v34 = vpop.f32.mrf.mxu0  ;;  %v4393_v45 = vpop.f32.mrf.mxu1  ;;  %6243 = vmatpush3.msra.mxu0 %v4617_v20  ;;  %p6348_p3 = por %p6347_p2, %p6346_p1 }
0x1f4c   :  { %v4247_v13 = vmax.f32 %v4091_v15, %v4237_v34  ;;  %6197 = vmatmul.mubr.f32.gmra.mxu0 %v4402_v22  ;;  %6244 = vmatprep.subr.mxu0 %v9893_v60 }
0x1f4d   :  { %v6113_v50 = vpop.f32.mrf.mxu0  ;;  %v6148_v11 = vpop.f32.mrf.mxu1  ;;  %6199 = vmatprep.mubr.msk.f32.mxu0 %vm6369_vm2, %v9893_v60  ;;  %6245 = vmatpush3.msra.mxu0 %v4616_v6  ;;  %p6349_p4 = pnand %p6348_p3, %p6342_p0 }
0x1f4e   :  { %v4403_v39 = vmax.f32 %v4247_v13, %v4393_v45  ;;  %6246 = vmatprep.subr.mxu0 %v9893_v60 }
0x1f4f   :  { %6247 = vmatpush3.msra.mxu0 %v4615_v59 }
0x1f50   :  { %6200 = vmatmul.mubr.f32.gmra.mxu0 %v4403_v39  ;;  %6248 = vmatprep.subr.mxu0 %v9893_v60 }
0x1f51   :  { %6256 = vmatprep.mubr.msk.f32.mxu0 %vm6369_vm2, %v9893_v60  ;;  %6249 = vmatpush3.msra.mxu0 %v4614_v12 }
0x1f52   :  { %6250 = vmatprep.subr.mxu0 %v9893_v60 }
0x1f53   :  { %6251 = vmatpush3.msra.mxu0 %v4613_v48 }
0x1f54   :  { %6252 = vmatprep.subr.mxu0 %v9893_v60 }
0x1f55   :  { %6253 = vmatpush3.msra.mxu0 %v4612_v18 }
0x1f56   :  { %6254 = vmatprep.subr.mxu0 %v9893_v60 }
0x1f57   :  { %6255 = vmatpush3.msra.mxu0 %v4611_v7 }
0x1ff8   :  { %v4486_v30 = vpop.f32.mrf.mxu0 }
0x1ff9   :  { %v4528_v47 = vmul.f32 %v4521_v24, %v4486_v30 }
0x1ffa   :  { %v6183_v46 = vpop.f32.mrf.mxu0 }
0x1ffc   :  { %v4491_v25 = vpop.f32.mrf.mxu0 }
0x1ffd   :  { %v4529_v21 = vmul.f32 %v4522_v0, %v4491_v25 }
0x1ffe   :  { %v6186_v41 = vpop.f32.mrf.mxu0 }
0x2000   :  { %v4496_v31 = vpop.f32.mrf.mxu0 }
0x2001   :  { %v4530_v43 = vmul.f32 %v4523_v8, %v4496_v31 }
0x2002   :  { %v6189_v49 = vpop.f32.mrf.mxu0 }
0x2004   :  { %v4501_v38 = vpop.f32.mrf.mxu0 }
0x2005   :  { %v4531_v35 = vmul.f32 %v4524_v44, %v4501_v38 }
0x2006   :  { %v6192_v28 = vpop.f32.mrf.mxu0 }
0x2008   :  { %v4506_v58 = vpop.f32.mrf.mxu0 }
0x2009   :  { %v4532_v17 = vmul.f32 %v4525_v16, %v4506_v58 }
0x200a   :  { %v6195_v55 = vpop.f32.mrf.mxu0 }
0x200c   :  { %v4511_v53 = vpop.f32.mrf.mxu0 }
0x200d   :  { %v4533_v52 = vmul.f32 %v4526_v14, %v4511_v53 }
0x200e   :  { %v6198_v37 = vpop.f32.mrf.mxu0 }
0x2010   :  { %v4516_v40 = vpop.f32.mrf.mxu0 }
0x2011   :  { %v4534_v63 = vmul.f32 %v4527_v3, %v4516_v40 }
0x2012   :  { %v6201_v9 = vpop.f32.mrf.mxu0 }
0x2013   :  { %6203 = vmatpush3.msk.msra.mxu1 %vm3825_vm13, %v4534_v63  ;;  %vm4632_vm13 = vcmask 1043456  }
0x2014   :  { %6204 = vmatprep.subr.mxu1 %v9893_v60 }
0x2015   :  { %6205 = vmatpush3.msra.mxu1 %v4533_v52 }
0x2016   :  { %6206 = vmatprep.subr.mxu1 %v9893_v60 }
0x2017   :  { %6207 = vmatpush3.msra.mxu1 %v4532_v17 }
0x2018   :  { %6208 = vmatprep.subr.mxu1 %v9893_v60 }
0x2019   :  { %6209 = vmatpush3.msra.mxu1 %v4531_v35 }
0x201a   :  { %6210 = vmatprep.subr.mxu1 %v9893_v60 }
0x201b   :  { %6211 = vmatpush3.msra.mxu1 %v4530_v43 }
0x201c   :  { %6212 = vmatprep.subr.mxu1 %v9893_v60 }
0x201d   :  { %6213 = vmatpush3.msra.mxu1 %v4529_v21 }
0x201e   :  { %6214 = vmatprep.subr.mxu1 %v9893_v60 }
0x201f   :  { %6215 = vmatpush3.msra.mxu1 %v4528_v47 }
0x2020   :  { %6217 = vmatmul.mubr.msk.f32.vlgmr.msra.gmra.mxu1 %vm3803_vm0, %v4520_v19  ;;  %6219 = vmatprep.subr.mxu1 %v9893_v60 }
0x2021   :  { %6220 = vmatpush3.msk.msra.mxu1 %vm4632_vm13, %v4627_v23  ;;  %6221 = vmatprep.mubr.msk.f32.mxu1 %vm6369_vm2, %v9893_v60 }
0x2024   :  { %6222 = vmatmul.mubr.msk.f32.vlgmr.msra.gmra.mxu1 %vm4628_vm5, %v9925_v33 }
0x20e0   :  { %v4607_v62 = vpop.f32.mrf.mxu1 }
0x20e1   :  { %6257 = vmatmul.mubr.f32.vlgmr.msra.gmra.mxu0 %v4607_v62 }
0x20e2   :  { %v6218_v26 = vpop.f32.mrf.mxu1 }
0x20e4   :  { %v4702_v27 = vpop.f32.mrf.mxu1 }
0x20e6   :  { %v6223_v56 = vpop.f32.mrf.mxu1 }
0x21a1   :  { %v4772_v57 = vpop.f32.mrf.mxu0 }
0x21a2   :  { %v4773_v60 = vadd.f32 %v4772_v57, %v4702_v27 }
0x21a3   :  { %v6258_v54 = vpop.f32.mrf.mxu0 }
0x21a4   :  { %v4783_v61 = vadd.f32 %v5040_v29, %v4773_v60 }
0x21a6   :  { %4784 = vst.msk [vmem:[#allocation7] sm:$0x3] %vm2081_vm4, %v4783_v61 }
0x21a7   :  { %6352 = shalt.err (!%p6349_p4)
}
0x21a8   :  { %4794 = dma.vmem_to_hbm [thread:$0]  %s4792_s14, 32, %s9449_s20, [#allocation8]  }
0x21a9   :  { %6365 = dma.done.wait [#allocation8], 32  }
0x21aa   :  { %6366 = vsyncadd [#allocation8], 4294967264 }
0x21ab   :  { %4798 = vsyncpa [#allocation8], 1 }
0x21ac   :  { %4799 = vsyncmov [#allocation5] }
0x21af   :  { %s4800_s19 = vpop.sfrf %4799 }
0x21b0   :  { %p5041_p5 = scmp.ne.s32.totalorder %s4800_s19, 0 }
0x21b2   :  { %4804 = shalt.err (%p5041_p5)  }
0x21b3   :  { %4806 = vsyncmov [#allocation5 + $0x1] }
0x21b6   :  { %s4807_s10 = vpop.sfrf %4806 }
0x21b7   :  { %p5042_p6 = scmp.ne.s32.totalorder %s4807_s10, 0 }
0x21b9   :  { %4811 = shalt.err (%p5042_p6)  }

</bundles_post_ra>
